<compile_context>
chip_gen: v7x
topology: tpu7x:2x2x1
jax: 0.10.0
libtpu: 0.0.40
codegen_flags: <defaults>
</compile_context>

<pallas_src>
import functools

import jax
import jax.numpy as jnp
from jax.experimental import pallas as pl
from jax.experimental.pallas import tpu as pltpu


CIN0 = 4    # logical input channels of the first conv (eta ++ gradient)
CIN0P = 16  # padded to the bf16 sublane tile so the tap-concat stays aligned


# ---------------- complex / centered-orthonormal FFT helpers (JAX glue) ----

def complex_mul(a, b):
    re = a[..., 0] * b[..., 0] - a[..., 1] * b[..., 1]
    im = a[..., 0] * b[..., 1] + a[..., 1] * b[..., 0]
    return jnp.stack([re, im], axis=-1)


def complex_conj(a):
    return jnp.stack([a[..., 0], -a[..., 1]], axis=-1)


def fft2c(x, dims=(2, 3)):
    c = x[..., 0] + 1j * x[..., 1]
    c = jnp.fft.ifftshift(c, axes=dims)
    c = jnp.fft.fftn(c, axes=dims, norm="ortho")
    c = jnp.fft.fftshift(c, axes=dims)
    return jnp.stack([c.real, c.imag], axis=-1)


def ifft2c(x, dims=(2, 3)):
    c = x[..., 0] + 1j * x[..., 1]
    c = jnp.fft.ifftshift(c, axes=dims)
    c = jnp.fft.ifftn(c, axes=dims, norm="ortho")
    c = jnp.fft.fftshift(c, axes=dims)
    return jnp.stack([c.real, c.imag], axis=-1)


def log_likelihood_gradient(eta, masked_kspace, sense, mask, sigma):
    # TODO(synk): FFT has no Pallas TPU primitive; the data-consistency
    # gradient (fft2c / ifft2c) stays in XLA.
    se = complex_mul(eta[:, None], sense)                               # [B,C,H,W,2]
    resid = mask * (fft2c(se) - masked_kspace)
    backproj = ifft2c(resid)
    grad = jnp.sum(complex_mul(backproj, complex_conj(sense)), axis=1)  # [B,H,W,2]
    out = jnp.concatenate([eta, grad], axis=-1)                         # [B,H,W,4]
    return jnp.transpose(out, (0, 3, 1, 2)) / (sigma ** 2)              # [B,4,H,W]


# ---------------- Pallas RIM cell ------------------------------------------

def _conv_taps(k, dil):
    half = (k - 1) // 2
    return [((ky - half) * dil, (kx - half) * dil)
            for ky in range(k) for kx in range(k)]


def make_rim_cell(H, W, F, sigma):
    """Builds the fused per-time-step RIM cell pallas_call.  Returns (call, Sp)."""
    S = H * W
    Sp = ((S + 127) // 128) * 128          # lane-dense spatial length
    sigma_sq = float(sigma) ** 2
    taps0 = _conv_taps(5, 1)               # ConvNonlinear(4->F),  k=5, dil=1
    taps1 = _conv_taps(3, 2)               # ConvNonlinear(F->F),  k=3, dil=2
    tapsf = _conv_taps(3, 1)               # final ConvNonlinear(F->2), k=3, dil=1

    # x-coordinate of every (padded) lane; the only mask data DMA'd in
    # (replaces the previous (25, S) f32 mask array).
    xcoord = (jnp.arange(Sp, dtype=jnp.int32) % W).reshape(1, Sp)

    # TODO(synk): for realistic MRI sizes (e.g. 320x320) add lane-axis tiling
    # with a 2-row halo (and the [C*H, Wpad] layout) so per-tile buffers fit
    # v7x's 64 MiB VMEM and both TensorCores get work when B == 1.

    def kernel(xc_ref, grad_ref, h1_ref, h2_ref,
               w0_ref, b0_ref, wr1_ref, br1_ref, u1_ref,
               w1_ref, b1_ref, wr2_ref, br2_ref, u2_ref,
               wf_ref, bf_ref,
               eta_out_ref, h1_out_ref, h2_out_ref):
        lane = jax.lax.broadcasted_iota(jnp.int32, (1, Sp), 1)
        xc = xc_ref[...]                                   # (1, Sp) int32

        def shifted(v, dy, dx):
            # out[c, s] = v[c, s + dy*W + dx] if (y+dy, x+dx) in bounds else 0
            off = dy * W + dx
            vs = v if off == 0 else pltpu.roll(v, shift=(-off) % Sp, axis=1)
            valid = ((lane >= (-dy) * W) & (lane < (H - dy) * W) &
                     (xc >= -dx) & (xc < W - dx))
            return vs * valid.astype(jnp.float32)

        def conv(v, taps, w_ref, b_ref):
            # ONE MXU matmul per conv: [Cout, ntaps*Cin] @ [ntaps*Cin, Sp],
            # bf16 operands, f32 accumulation.
            stacked = jnp.concatenate(
                [shifted(v, dy, dx).astype(jnp.bfloat16) for dy, dx in taps],
                axis=0)
            return jnp.dot(w_ref[...], stacked,
                           preferred_element_type=jnp.float32) + b_ref[...]

        x = grad_ref[0]        # (CIN0P, Sp) f32; channels >= 4 are zero pad
        h1 = h1_ref[0]         # (F, Sp) f32 recurrent state (carried in f32)
        h2 = h2_ref[0]

        # ConvRNNStack 1: ConvNonlinear(4->F, 5x5, relu) -> IndRNN(F->F, 1x1)
        c0 = jnp.maximum(conv(x, taps0, w0_ref, b0_ref), 0.0)
        h1n = jnp.maximum(
            jnp.dot(wr1_ref[...], c0.astype(jnp.bfloat16),
                    preferred_element_type=jnp.float32)
            + br1_ref[...] + u1_ref[...] * h1, 0.0)

        # ConvRNNStack 2: ConvNonlinear(F->F, 3x3 dil2, relu) -> IndRNN(F->F)
        c1 = jnp.maximum(conv(h1n, taps1, w1_ref, b1_ref), 0.0)
        h2n = jnp.maximum(
            jnp.dot(wr2_ref[...], c1.astype(jnp.bfloat16),
                    preferred_element_type=jnp.float32)
            + br2_ref[...] + u2_ref[...] * h2, 0.0)

        # final_layer: ConvNonlinear(F->2, 3x3, no nonlinearity); residual eta.
        delta = conv(h2n, tapsf, wf_ref, bf_ref)

        # grad channels 0..1 are eta / sigma^2 -> recover eta in-kernel
        # (drops the separate per-batch eta input stream).
        eta_out_ref[0] = x[0:2, :] * sigma_sq + delta
        h1_out_ref[0] = h1n
        h2_out_ref[0] = h2n

    def full_spec(shape):
        n = len(shape)
        return pl.BlockSpec(shape, lambda b: (0,) * n)

    def per_b_spec(c):
        return pl.BlockSpec((1, c, Sp), lambda b: (b, 0, 0))

    def call(grad, h1, h2, p):
        B = grad.shape[0]
        in_specs = [
            full_spec((1, Sp)),                                        # xcoord
            per_b_spec(CIN0P), per_b_spec(F), per_b_spec(F),           # grad, h1, h2
            full_spec((F, 25 * CIN0P)), full_spec((F, 1)),             # conv0
            full_spec((F, F)), full_spec((F, 1)), full_spec((F, 1)),   # IndRNN 1
            full_spec((F, 9 * F)), full_spec((F, 1)),                  # conv1
            full_spec((F, F)), full_spec((F, 1)), full_spec((F, 1)),   # IndRNN 2
            full_spec((2, 9 * F)), full_spec((2, 1)),                  # final conv
        ]
        out_specs = (per_b_spec(2), per_b_spec(F), per_b_spec(F))
        out_shape = (
            jax.ShapeDtypeStruct((B, 2, Sp), jnp.float32),
            jax.ShapeDtypeStruct((B, F, Sp), jnp.float32),
            jax.ShapeDtypeStruct((B, F, Sp), jnp.float32),
        )
        return pl.pallas_call(
            kernel,
            grid=(B,),
            in_specs=in_specs,
            out_specs=out_specs,
            out_shape=out_shape,
            # h1 / h2 recurrent state is updated in place across time steps.
            input_output_aliases={2: 1, 3: 2},
            compiler_params=pltpu.CompilerParams(
                dimension_semantics=("parallel",),
                vmem_limit_bytes=32 * 1024 * 1024),
        )(xcoord, grad, h1, h2,
          p["w0"], p["b0"], p["wr1"], p["br1"], p["u1"],
          p["w1"], p["b1"], p["wr2"], p["br2"], p["u2"],
          p["wf"], p["bf"])

    return call, Sp


# ---------------- RIMBlock forward ------------------------------------------

def rim_block_forward(pred, masked_kspace, sense, mask, params, *,
                      time_steps=8, sigma=1.0, dc_weight=1.0, F=32):
    """Mirrors RIMBlock.forward (dimensionality=2, no_dc=False, eta=None,
    hx=None, keep_eta=False). Returns (list of k-space estimates, None)."""
    B, C, H, W, _ = masked_kspace.shape
    S = H * W
    cell, Sp = make_rim_cell(H, W, F, sigma)

    # MXU operands as bf16 (f32 accumulation inside the kernel); biases,
    # IndRNN recurrent weights u1/u2 and all carried state stay f32.
    p = dict(params)
    w0 = params["w0"].reshape(F, 25, CIN0)
    w0p = jnp.zeros((F, 25, CIN0P), jnp.float32).at[:, :, :CIN0].set(w0)
    p["w0"] = w0p.reshape(F, 25 * CIN0P).astype(jnp.bfloat16)
    for k in ("wr1", "w1", "wr2", "wf"):
        p[k] = params[k].astype(jnp.bfloat16)

    # eta = sum_coils( ifft2c(pred) * conj(sense) )
    eta0 = jnp.sum(complex_mul(ifft2c(pred), complex_conj(sense)), axis=1)  # [B,H,W,2]
    h1_0 = jnp.zeros((B, F, Sp), jnp.float32)   # hx init (recurrent_filters != 0)
    h2_0 = jnp.zeros((B, F, Sp), jnp.float32)

    def step(carry, _):
        eta, h1, h2 = carry
        grad = log_likelihood_gradient(eta, masked_kspace, sense, mask, sigma)
        grad_flat = jnp.pad(grad.reshape(B, CIN0, S),
                            ((0, 0), (0, CIN0P - CIN0), (0, Sp - S)))
        eta_flat, h1, h2 = cell(grad_flat, h1, h2, p)
        eta = jnp.transpose(eta_flat[:, :, :S].reshape(B, 2, H, W),
                            (0, 2, 3, 1))                               # [B,H,W,2]
        return (eta, h1, h2), eta

    _, etas = jax.lax.scan(step, (eta0, h1_0, h2_0), None, length=time_steps)

    # no_dc = False branch: soft data consistency
    soft_dc = jnp.where(mask > 0, pred - masked_kspace, 0.0) * dc_weight
    current_kspace = [
        masked_kspace - soft_dc - fft2c(complex_mul(etas[t][:, None], sense))
        for t in range(time_steps)
    ]
    return current_kspace, None


# ---------------- deterministic synthetic parameters -------------------------

def init_params(key, F):
    ks = jax.random.split(key, 10)
    s = 0.1
    return {
        # Conv weights stored as [Cout, ntaps*Cin], column = tap*Cin + cin
        # (= torch [Cout,Cin,KH,KW].permute(0,2,3,1).reshape(Cout,-1)).
        "w0": s * jax.random.normal(ks[0], (F, 25 * CIN0), jnp.float32),
        "b0": s * jax.random.normal(ks[1], (F, 1), jnp.float32),
        "wr1": s * jax.random.normal(ks[2], (F, F), jnp.float32),
        "br1": s * jax.random.normal(ks[3], (F, 1), jnp.float32),
        "u1": jnp.full((F, 1), 0.5, jnp.float32),      # IndRNN recurrent weight
        "w1": s * jax.random.normal(ks[4], (F, 9 * F), jnp.float32),
        "b1": s * jax.random.normal(ks[5], (F, 1), jnp.float32),
        "wr2": s * jax.random.normal(ks[6], (F, F), jnp.float32),
        "br2": s * jax.random.normal(ks[7], (F, 1), jnp.float32),
        "u2": jnp.full((F, 1), 0.5, jnp.float32),
        "wf": s * jax.random.normal(ks[8], (2, 9 * F), jnp.float32),
        "bf": jnp.zeros((2, 1), jnp.float32),          # conv_bias[-1] = False
    }


if __name__ == "__main__":
    key = jax.random.PRNGKey(0)
    kp, kk, ks, km = jax.random.split(key, 4)

    B, C, H, W, F, T = 2, 4, 16, 16, 32, 8
    params = init_params(kp, F)

    masked_kspace = jax.random.normal(kk, (B, C, H, W, 2), jnp.float32)
    sense = jax.random.normal(ks, (B, C, H, W, 2), jnp.float32)
    rss = jnp.sqrt(jnp.sum(sense[..., 0] ** 2 + sense[..., 1] ** 2,
                           axis=1, keepdims=True))[..., None]
    sense = sense / jnp.maximum(rss, 1e-6)
    mask = (jax.random.uniform(km, (B, 1, H, W, 1)) > 0.5).astype(jnp.float32)
    masked_kspace = masked_kspace * mask
    pred = masked_kspace        # initial k-space prediction

    fwd = jax.jit(functools.partial(rim_block_forward,
                                    time_steps=T, sigma=1.0, F=F))
    kspace_list, hidden = fwd(pred, masked_kspace, sense, mask, params)
    kspace_list = jax.block_until_ready(kspace_list)

    assert hidden is None
    assert len(kspace_list) == T
    assert kspace_list[-1].shape == (B, C, H, W, 2)
    assert all(bool(jnp.all(jnp.isfinite(k))) for k in kspace_list)
    print("KERNEL_OK")
</pallas_src>

<mosaic_0001>
module attributes {stable_mosaic.version = 11 : i64} {
  func.func @kernel(%arg0: i32, %arg1: memref<1x256xi32, #tpu.memory_space<vmem>>, %arg2: memref<1x16x256xf32, #tpu.memory_space<vmem>>, %arg3: memref<1x32x256xf32, #tpu.memory_space<vmem>>, %arg4: memref<1x32x256xf32, #tpu.memory_space<vmem>>, %arg5: memref<32x400xbf16, #tpu.memory_space<vmem>>, %arg6: memref<32x1xf32, #tpu.memory_space<vmem>>, %arg7: memref<32x32xbf16, #tpu.memory_space<vmem>>, %arg8: memref<32x1xf32, #tpu.memory_space<vmem>>, %arg9: memref<32x1xf32, #tpu.memory_space<vmem>>, %arg10: memref<32x288xbf16, #tpu.memory_space<vmem>>, %arg11: memref<32x1xf32, #tpu.memory_space<vmem>>, %arg12: memref<32x32xbf16, #tpu.memory_space<vmem>>, %arg13: memref<32x1xf32, #tpu.memory_space<vmem>>, %arg14: memref<32x1xf32, #tpu.memory_space<vmem>>, %arg15: memref<2x288xbf16, #tpu.memory_space<vmem>>, %arg16: memref<2x1xf32, #tpu.memory_space<vmem>>, %arg17: memref<1x2x256xf32, #tpu.memory_space<vmem>>, %arg18: memref<1x32x256xf32, #tpu.memory_space<vmem>>, %arg19: memref<1x32x256xf32, #tpu.memory_space<vmem>>) attributes {dimension_semantics = [#tpu.dimension_semantics<parallel>], iteration_bounds = array<i64: 2>, scalar_prefetch = 0 : i64, scratch_operands = 0 : i64, tpu.core_type = #tpu.core_type<tc>, window_params = [{pipeline_mode = #tpu.pipeline_mode<synchronous>, transform_indices = @transform_0, window_bounds = array<i64: 1, 256>}, {transform_indices = @transform_1, window_bounds = array<i64: 1, 16, 256>}, {transform_indices = @transform_2, window_bounds = array<i64: 1, 32, 256>}, {transform_indices = @transform_3, window_bounds = array<i64: 1, 32, 256>}, {pipeline_mode = #tpu.pipeline_mode<synchronous>, transform_indices = @transform_4, window_bounds = array<i64: 32, 400>}, {pipeline_mode = #tpu.pipeline_mode<synchronous>, transform_indices = @transform_5, window_bounds = array<i64: 32, 1>}, {pipeline_mode = #tpu.pipeline_mode<synchronous>, transform_indices = @transform_6, window_bounds = array<i64: 32, 32>}, {pipeline_mode = #tpu.pipeline_mode<synchronous>, transform_indices = @transform_7, window_bounds = array<i64: 32, 1>}, {pipeline_mode = #tpu.pipeline_mode<synchronous>, transform_indices = @transform_8, window_bounds = array<i64: 32, 1>}, {pipeline_mode = #tpu.pipeline_mode<synchronous>, transform_indices = @transform_9, window_bounds = array<i64: 32, 288>}, {pipeline_mode = #tpu.pipeline_mode<synchronous>, transform_indices = @transform_10, window_bounds = array<i64: 32, 1>}, {pipeline_mode = #tpu.pipeline_mode<synchronous>, transform_indices = @transform_11, window_bounds = array<i64: 32, 32>}, {pipeline_mode = #tpu.pipeline_mode<synchronous>, transform_indices = @transform_12, window_bounds = array<i64: 32, 1>}, {pipeline_mode = #tpu.pipeline_mode<synchronous>, transform_indices = @transform_13, window_bounds = array<i64: 32, 1>}, {pipeline_mode = #tpu.pipeline_mode<synchronous>, transform_indices = @transform_14, window_bounds = array<i64: 2, 288>}, {pipeline_mode = #tpu.pipeline_mode<synchronous>, transform_indices = @transform_15, window_bounds = array<i64: 2, 1>}, {transform_indices = @transform_16, window_bounds = array<i64: 1, 2, 256>}, {transform_indices = @transform_17, window_bounds = array<i64: 1, 32, 256>}, {transform_indices = @transform_18, window_bounds = array<i64: 1, 32, 256>}]} {
    %0 = tpu.iota {dimensions = array<i32: 1>} : vector<1x256xi32>
    %c0 = arith.constant 0 : index
    %c0_0 = arith.constant 0 : index
    %1 = vector.load %arg1[%c0, %c0_0] : memref<1x256xi32, #tpu.memory_space<vmem>>, vector<1x256xi32>
    %c0_1 = arith.constant 0 : index
    %c0_2 = arith.constant 0 : index
    %c0_3 = arith.constant 0 : index
    %2 = vector.load %arg2[%c0_1, %c0_2, %c0_3] : memref<1x16x256xf32, #tpu.memory_space<vmem>>, vector<1x16x256xf32>
    %3 = vector.shape_cast %2 : vector<1x16x256xf32> to vector<16x256xf32>
    %c0_4 = arith.constant 0 : index
    %c0_5 = arith.constant 0 : index
    %c0_6 = arith.constant 0 : index
    %4 = vector.load %arg3[%c0_4, %c0_5, %c0_6] : memref<1x32x256xf32, #tpu.memory_space<vmem>>, vector<1x32x256xf32>
    %5 = vector.shape_cast %4 : vector<1x32x256xf32> to vector<32x256xf32>
    %c0_7 = arith.constant 0 : index
    %c0_8 = arith.constant 0 : index
    %c0_9 = arith.constant 0 : index
    %6 = vector.load %arg4[%c0_7, %c0_8, %c0_9] : memref<1x32x256xf32, #tpu.memory_space<vmem>>, vector<1x32x256xf32>
    %7 = vector.shape_cast %6 : vector<1x32x256xf32> to vector<32x256xf32>
    %c34_i32 = arith.constant 34 : i32
    %8 = tpu.dynamic_rotate %3 by %c34_i32 dim 1 : vector<16x256xf32>, i32 -> vector<16x256xf32>
    %c32_i32 = arith.constant 32 : i32
    %9 = vector.broadcast %c32_i32 : i32 to vector<1x256xi32>
    %10 = arith.cmpi sge, %0, %9 : vector<1x256xi32>
    %c288_i32 = arith.constant 288 : i32
    %11 = vector.broadcast %c288_i32 : i32 to vector<1x256xi32>
    %12 = arith.cmpi slt, %0, %11 : vector<1x256xi32>
    %13 = arith.andi %10, %12 : vector<1x256xi1>
    %c2_i32 = arith.constant 2 : i32
    %14 = vector.broadcast %c2_i32 : i32 to vector<1x256xi32>
    %15 = arith.cmpi sge, %1, %14 : vector<1x256xi32>
    %16 = arith.andi %13, %15 : vector<1x256xi1>
    %c18_i32 = arith.constant 18 : i32
    %17 = vector.broadcast %c18_i32 : i32 to vector<1x256xi32>
    %18 = arith.cmpi slt, %1, %17 : vector<1x256xi32>
    %19 = arith.andi %16, %18 : vector<1x256xi1>
    %20 = arith.extui %19 : vector<1x256xi1> to vector<1x256xi32>
    %21 = arith.sitofp %20 : vector<1x256xi32> to vector<1x256xf32>
    %22 = vector.broadcast %21 : vector<1x256xf32> to vector<16x256xf32>
    %23 = arith.mulf %8, %22 : vector<16x256xf32>
    %24 = arith.truncf %23 : vector<16x256xf32> to vector<16x256xbf16>
    %c33_i32 = arith.constant 33 : i32
    %25 = tpu.dynamic_rotate %3 by %c33_i32 dim 1 : vector<16x256xf32>, i32 -> vector<16x256xf32>
    %c32_i32_10 = arith.constant 32 : i32
    %26 = vector.broadcast %c32_i32_10 : i32 to vector<1x256xi32>
    %27 = arith.cmpi sge, %0, %26 : vector<1x256xi32>
    %c288_i32_11 = arith.constant 288 : i32
    %28 = vector.broadcast %c288_i32_11 : i32 to vector<1x256xi32>
    %29 = arith.cmpi slt, %0, %28 : vector<1x256xi32>
    %30 = arith.andi %27, %29 : vector<1x256xi1>
    %c1_i32 = arith.constant 1 : i32
    %31 = vector.broadcast %c1_i32 : i32 to vector<1x256xi32>
    %32 = arith.cmpi sge, %1, %31 : vector<1x256xi32>
    %33 = arith.andi %30, %32 : vector<1x256xi1>
    %c17_i32 = arith.constant 17 : i32
    %34 = vector.broadcast %c17_i32 : i32 to vector<1x256xi32>
    %35 = arith.cmpi slt, %1, %34 : vector<1x256xi32>
    %36 = arith.andi %33, %35 : vector<1x256xi1>
    %37 = arith.extui %36 : vector<1x256xi1> to vector<1x256xi32>
    %38 = arith.sitofp %37 : vector<1x256xi32> to vector<1x256xf32>
    %39 = vector.broadcast %38 : vector<1x256xf32> to vector<16x256xf32>
    %40 = arith.mulf %25, %39 : vector<16x256xf32>
    %41 = arith.truncf %40 : vector<16x256xf32> to vector<16x256xbf16>
    %c32_i32_12 = arith.constant 32 : i32
    %42 = tpu.dynamic_rotate %3 by %c32_i32_12 dim 1 : vector<16x256xf32>, i32 -> vector<16x256xf32>
    %c32_i32_13 = arith.constant 32 : i32
    %43 = vector.broadcast %c32_i32_13 : i32 to vector<1x256xi32>
    %44 = arith.cmpi sge, %0, %43 : vector<1x256xi32>
    %c288_i32_14 = arith.constant 288 : i32
    %45 = vector.broadcast %c288_i32_14 : i32 to vector<1x256xi32>
    %46 = arith.cmpi slt, %0, %45 : vector<1x256xi32>
    %47 = arith.andi %44, %46 : vector<1x256xi1>
    %c0_i32 = arith.constant 0 : i32
    %48 = vector.broadcast %c0_i32 : i32 to vector<1x256xi32>
    %49 = arith.cmpi sge, %1, %48 : vector<1x256xi32>
    %50 = arith.andi %47, %49 : vector<1x256xi1>
    %c16_i32 = arith.constant 16 : i32
    %51 = vector.broadcast %c16_i32 : i32 to vector<1x256xi32>
    %52 = arith.cmpi slt, %1, %51 : vector<1x256xi32>
    %53 = arith.andi %50, %52 : vector<1x256xi1>
    %54 = arith.extui %53 : vector<1x256xi1> to vector<1x256xi32>
    %55 = arith.sitofp %54 : vector<1x256xi32> to vector<1x256xf32>
    %56 = vector.broadcast %55 : vector<1x256xf32> to vector<16x256xf32>
    %57 = arith.mulf %42, %56 : vector<16x256xf32>
    %58 = arith.truncf %57 : vector<16x256xf32> to vector<16x256xbf16>
    %c31_i32 = arith.constant 31 : i32
    %59 = tpu.dynamic_rotate %3 by %c31_i32 dim 1 : vector<16x256xf32>, i32 -> vector<16x256xf32>
    %c32_i32_15 = arith.constant 32 : i32
    %60 = vector.broadcast %c32_i32_15 : i32 to vector<1x256xi32>
    %61 = arith.cmpi sge, %0, %60 : vector<1x256xi32>
    %c288_i32_16 = arith.constant 288 : i32
    %62 = vector.broadcast %c288_i32_16 : i32 to vector<1x256xi32>
    %63 = arith.cmpi slt, %0, %62 : vector<1x256xi32>
    %64 = arith.andi %61, %63 : vector<1x256xi1>
    %c-1_i32 = arith.constant -1 : i32
    %65 = vector.broadcast %c-1_i32 : i32 to vector<1x256xi32>
    %66 = arith.cmpi sge, %1, %65 : vector<1x256xi32>
    %67 = arith.andi %64, %66 : vector<1x256xi1>
    %c15_i32 = arith.constant 15 : i32
    %68 = vector.broadcast %c15_i32 : i32 to vector<1x256xi32>
    %69 = arith.cmpi slt, %1, %68 : vector<1x256xi32>
    %70 = arith.andi %67, %69 : vector<1x256xi1>
    %71 = arith.extui %70 : vector<1x256xi1> to vector<1x256xi32>
    %72 = arith.sitofp %71 : vector<1x256xi32> to vector<1x256xf32>
    %73 = vector.broadcast %72 : vector<1x256xf32> to vector<16x256xf32>
    %74 = arith.mulf %59, %73 : vector<16x256xf32>
    %75 = arith.truncf %74 : vector<16x256xf32> to vector<16x256xbf16>
    %c30_i32 = arith.constant 30 : i32
    %76 = tpu.dynamic_rotate %3 by %c30_i32 dim 1 : vector<16x256xf32>, i32 -> vector<16x256xf32>
    %c32_i32_17 = arith.constant 32 : i32
    %77 = vector.broadcast %c32_i32_17 : i32 to vector<1x256xi32>
    %78 = arith.cmpi sge, %0, %77 : vector<1x256xi32>
    %c288_i32_18 = arith.constant 288 : i32
    %79 = vector.broadcast %c288_i32_18 : i32 to vector<1x256xi32>
    %80 = arith.cmpi slt, %0, %79 : vector<1x256xi32>
    %81 = arith.andi %78, %80 : vector<1x256xi1>
    %c-2_i32 = arith.constant -2 : i32
    %82 = vector.broadcast %c-2_i32 : i32 to vector<1x256xi32>
    %83 = arith.cmpi sge, %1, %82 : vector<1x256xi32>
    %84 = arith.andi %81, %83 : vector<1x256xi1>
    %c14_i32 = arith.constant 14 : i32
    %85 = vector.broadcast %c14_i32 : i32 to vector<1x256xi32>
    %86 = arith.cmpi slt, %1, %85 : vector<1x256xi32>
    %87 = arith.andi %84, %86 : vector<1x256xi1>
    %88 = arith.extui %87 : vector<1x256xi1> to vector<1x256xi32>
    %89 = arith.sitofp %88 : vector<1x256xi32> to vector<1x256xf32>
    %90 = vector.broadcast %89 : vector<1x256xf32> to vector<16x256xf32>
    %91 = arith.mulf %76, %90 : vector<16x256xf32>
    %92 = arith.truncf %91 : vector<16x256xf32> to vector<16x256xbf16>
    %c18_i32_19 = arith.constant 18 : i32
    %93 = tpu.dynamic_rotate %3 by %c18_i32_19 dim 1 : vector<16x256xf32>, i32 -> vector<16x256xf32>
    %c16_i32_20 = arith.constant 16 : i32
    %94 = vector.broadcast %c16_i32_20 : i32 to vector<1x256xi32>
    %95 = arith.cmpi sge, %0, %94 : vector<1x256xi32>
    %c272_i32 = arith.constant 272 : i32
    %96 = vector.broadcast %c272_i32 : i32 to vector<1x256xi32>
    %97 = arith.cmpi slt, %0, %96 : vector<1x256xi32>
    %98 = arith.andi %95, %97 : vector<1x256xi1>
    %c2_i32_21 = arith.constant 2 : i32
    %99 = vector.broadcast %c2_i32_21 : i32 to vector<1x256xi32>
    %100 = arith.cmpi sge, %1, %99 : vector<1x256xi32>
    %101 = arith.andi %98, %100 : vector<1x256xi1>
    %c18_i32_22 = arith.constant 18 : i32
    %102 = vector.broadcast %c18_i32_22 : i32 to vector<1x256xi32>
    %103 = arith.cmpi slt, %1, %102 : vector<1x256xi32>
    %104 = arith.andi %101, %103 : vector<1x256xi1>
    %105 = arith.extui %104 : vector<1x256xi1> to vector<1x256xi32>
    %106 = arith.sitofp %105 : vector<1x256xi32> to vector<1x256xf32>
    %107 = vector.broadcast %106 : vector<1x256xf32> to vector<16x256xf32>
    %108 = arith.mulf %93, %107 : vector<16x256xf32>
    %109 = arith.truncf %108 : vector<16x256xf32> to vector<16x256xbf16>
    %c17_i32_23 = arith.constant 17 : i32
    %110 = tpu.dynamic_rotate %3 by %c17_i32_23 dim 1 : vector<16x256xf32>, i32 -> vector<16x256xf32>
    %c16_i32_24 = arith.constant 16 : i32
    %111 = vector.broadcast %c16_i32_24 : i32 to vector<1x256xi32>
    %112 = arith.cmpi sge, %0, %111 : vector<1x256xi32>
    %c272_i32_25 = arith.constant 272 : i32
    %113 = vector.broadcast %c272_i32_25 : i32 to vector<1x256xi32>
    %114 = arith.cmpi slt, %0, %113 : vector<1x256xi32>
    %115 = arith.andi %112, %114 : vector<1x256xi1>
    %c1_i32_26 = arith.constant 1 : i32
    %116 = vector.broadcast %c1_i32_26 : i32 to vector<1x256xi32>
    %117 = arith.cmpi sge, %1, %116 : vector<1x256xi32>
    %118 = arith.andi %115, %117 : vector<1x256xi1>
    %c17_i32_27 = arith.constant 17 : i32
    %119 = vector.broadcast %c17_i32_27 : i32 to vector<1x256xi32>
    %120 = arith.cmpi slt, %1, %119 : vector<1x256xi32>
    %121 = arith.andi %118, %120 : vector<1x256xi1>
    %122 = arith.extui %121 : vector<1x256xi1> to vector<1x256xi32>
    %123 = arith.sitofp %122 : vector<1x256xi32> to vector<1x256xf32>
    %124 = vector.broadcast %123 : vector<1x256xf32> to vector<16x256xf32>
    %125 = arith.mulf %110, %124 : vector<16x256xf32>
    %126 = arith.truncf %125 : vector<16x256xf32> to vector<16x256xbf16>
    %c16_i32_28 = arith.constant 16 : i32
    %127 = tpu.dynamic_rotate %3 by %c16_i32_28 dim 1 : vector<16x256xf32>, i32 -> vector<16x256xf32>
    %c16_i32_29 = arith.constant 16 : i32
    %128 = vector.broadcast %c16_i32_29 : i32 to vector<1x256xi32>
    %129 = arith.cmpi sge, %0, %128 : vector<1x256xi32>
    %c272_i32_30 = arith.constant 272 : i32
    %130 = vector.broadcast %c272_i32_30 : i32 to vector<1x256xi32>
    %131 = arith.cmpi slt, %0, %130 : vector<1x256xi32>
    %132 = arith.andi %129, %131 : vector<1x256xi1>
    %c0_i32_31 = arith.constant 0 : i32
    %133 = vector.broadcast %c0_i32_31 : i32 to vector<1x256xi32>
    %134 = arith.cmpi sge, %1, %133 : vector<1x256xi32>
    %135 = arith.andi %132, %134 : vector<1x256xi1>
    %c16_i32_32 = arith.constant 16 : i32
    %136 = vector.broadcast %c16_i32_32 : i32 to vector<1x256xi32>
    %137 = arith.cmpi slt, %1, %136 : vector<1x256xi32>
    %138 = arith.andi %135, %137 : vector<1x256xi1>
    %139 = arith.extui %138 : vector<1x256xi1> to vector<1x256xi32>
    %140 = arith.sitofp %139 : vector<1x256xi32> to vector<1x256xf32>
    %141 = vector.broadcast %140 : vector<1x256xf32> to vector<16x256xf32>
    %142 = arith.mulf %127, %141 : vector<16x256xf32>
    %143 = arith.truncf %142 : vector<16x256xf32> to vector<16x256xbf16>
    %c15_i32_33 = arith.constant 15 : i32
    %144 = tpu.dynamic_rotate %3 by %c15_i32_33 dim 1 : vector<16x256xf32>, i32 -> vector<16x256xf32>
    %c16_i32_34 = arith.constant 16 : i32
    %145 = vector.broadcast %c16_i32_34 : i32 to vector<1x256xi32>
    %146 = arith.cmpi sge, %0, %145 : vector<1x256xi32>
    %c272_i32_35 = arith.constant 272 : i32
    %147 = vector.broadcast %c272_i32_35 : i32 to vector<1x256xi32>
    %148 = arith.cmpi slt, %0, %147 : vector<1x256xi32>
    %149 = arith.andi %146, %148 : vector<1x256xi1>
    %c-1_i32_36 = arith.constant -1 : i32
    %150 = vector.broadcast %c-1_i32_36 : i32 to vector<1x256xi32>
    %151 = arith.cmpi sge, %1, %150 : vector<1x256xi32>
    %152 = arith.andi %149, %151 : vector<1x256xi1>
    %c15_i32_37 = arith.constant 15 : i32
    %153 = vector.broadcast %c15_i32_37 : i32 to vector<1x256xi32>
    %154 = arith.cmpi slt, %1, %153 : vector<1x256xi32>
    %155 = arith.andi %152, %154 : vector<1x256xi1>
    %156 = arith.extui %155 : vector<1x256xi1> to vector<1x256xi32>
    %157 = arith.sitofp %156 : vector<1x256xi32> to vector<1x256xf32>
    %158 = vector.broadcast %157 : vector<1x256xf32> to vector<16x256xf32>
    %159 = arith.mulf %144, %158 : vector<16x256xf32>
    %160 = arith.truncf %159 : vector<16x256xf32> to vector<16x256xbf16>
    %c14_i32_38 = arith.constant 14 : i32
    %161 = tpu.dynamic_rotate %3 by %c14_i32_38 dim 1 : vector<16x256xf32>, i32 -> vector<16x256xf32>
    %c16_i32_39 = arith.constant 16 : i32
    %162 = vector.broadcast %c16_i32_39 : i32 to vector<1x256xi32>
    %163 = arith.cmpi sge, %0, %162 : vector<1x256xi32>
    %c272_i32_40 = arith.constant 272 : i32
    %164 = vector.broadcast %c272_i32_40 : i32 to vector<1x256xi32>
    %165 = arith.cmpi slt, %0, %164 : vector<1x256xi32>
    %166 = arith.andi %163, %165 : vector<1x256xi1>
    %c-2_i32_41 = arith.constant -2 : i32
    %167 = vector.broadcast %c-2_i32_41 : i32 to vector<1x256xi32>
    %168 = arith.cmpi sge, %1, %167 : vector<1x256xi32>
    %169 = arith.andi %166, %168 : vector<1x256xi1>
    %c14_i32_42 = arith.constant 14 : i32
    %170 = vector.broadcast %c14_i32_42 : i32 to vector<1x256xi32>
    %171 = arith.cmpi slt, %1, %170 : vector<1x256xi32>
    %172 = arith.andi %169, %171 : vector<1x256xi1>
    %173 = arith.extui %172 : vector<1x256xi1> to vector<1x256xi32>
    %174 = arith.sitofp %173 : vector<1x256xi32> to vector<1x256xf32>
    %175 = vector.broadcast %174 : vector<1x256xf32> to vector<16x256xf32>
    %176 = arith.mulf %161, %175 : vector<16x256xf32>
    %177 = arith.truncf %176 : vector<16x256xf32> to vector<16x256xbf16>
    %c2_i32_43 = arith.constant 2 : i32
    %178 = tpu.dynamic_rotate %3 by %c2_i32_43 dim 1 : vector<16x256xf32>, i32 -> vector<16x256xf32>
    %c0_i32_44 = arith.constant 0 : i32
    %179 = vector.broadcast %c0_i32_44 : i32 to vector<1x256xi32>
    %180 = arith.cmpi sge, %0, %179 : vector<1x256xi32>
    %c256_i32 = arith.constant 256 : i32
    %181 = vector.broadcast %c256_i32 : i32 to vector<1x256xi32>
    %182 = arith.cmpi slt, %0, %181 : vector<1x256xi32>
    %183 = arith.andi %180, %182 : vector<1x256xi1>
    %c2_i32_45 = arith.constant 2 : i32
    %184 = vector.broadcast %c2_i32_45 : i32 to vector<1x256xi32>
    %185 = arith.cmpi sge, %1, %184 : vector<1x256xi32>
    %186 = arith.andi %183, %185 : vector<1x256xi1>
    %c18_i32_46 = arith.constant 18 : i32
    %187 = vector.broadcast %c18_i32_46 : i32 to vector<1x256xi32>
    %188 = arith.cmpi slt, %1, %187 : vector<1x256xi32>
    %189 = arith.andi %186, %188 : vector<1x256xi1>
    %190 = arith.extui %189 : vector<1x256xi1> to vector<1x256xi32>
    %191 = arith.sitofp %190 : vector<1x256xi32> to vector<1x256xf32>
    %192 = vector.broadcast %191 : vector<1x256xf32> to vector<16x256xf32>
    %193 = arith.mulf %178, %192 : vector<16x256xf32>
    %194 = arith.truncf %193 : vector<16x256xf32> to vector<16x256xbf16>
    %c1_i32_47 = arith.constant 1 : i32
    %195 = tpu.dynamic_rotate %3 by %c1_i32_47 dim 1 : vector<16x256xf32>, i32 -> vector<16x256xf32>
    %c0_i32_48 = arith.constant 0 : i32
    %196 = vector.broadcast %c0_i32_48 : i32 to vector<1x256xi32>
    %197 = arith.cmpi sge, %0, %196 : vector<1x256xi32>
    %c256_i32_49 = arith.constant 256 : i32
    %198 = vector.broadcast %c256_i32_49 : i32 to vector<1x256xi32>
    %199 = arith.cmpi slt, %0, %198 : vector<1x256xi32>
    %200 = arith.andi %197, %199 : vector<1x256xi1>
    %c1_i32_50 = arith.constant 1 : i32
    %201 = vector.broadcast %c1_i32_50 : i32 to vector<1x256xi32>
    %202 = arith.cmpi sge, %1, %201 : vector<1x256xi32>
    %203 = arith.andi %200, %202 : vector<1x256xi1>
    %c17_i32_51 = arith.constant 17 : i32
    %204 = vector.broadcast %c17_i32_51 : i32 to vector<1x256xi32>
    %205 = arith.cmpi slt, %1, %204 : vector<1x256xi32>
    %206 = arith.andi %203, %205 : vector<1x256xi1>
    %207 = arith.extui %206 : vector<1x256xi1> to vector<1x256xi32>
    %208 = arith.sitofp %207 : vector<1x256xi32> to vector<1x256xf32>
    %209 = vector.broadcast %208 : vector<1x256xf32> to vector<16x256xf32>
    %210 = arith.mulf %195, %209 : vector<16x256xf32>
    %211 = arith.truncf %210 : vector<16x256xf32> to vector<16x256xbf16>
    %c0_i32_52 = arith.constant 0 : i32
    %212 = vector.broadcast %c0_i32_52 : i32 to vector<1x256xi32>
    %213 = arith.cmpi sge, %0, %212 : vector<1x256xi32>
    %c256_i32_53 = arith.constant 256 : i32
    %214 = vector.broadcast %c256_i32_53 : i32 to vector<1x256xi32>
    %215 = arith.cmpi slt, %0, %214 : vector<1x256xi32>
    %216 = arith.andi %213, %215 : vector<1x256xi1>
    %c0_i32_54 = arith.constant 0 : i32
    %217 = vector.broadcast %c0_i32_54 : i32 to vector<1x256xi32>
    %218 = arith.cmpi sge, %1, %217 : vector<1x256xi32>
    %219 = arith.andi %216, %218 : vector<1x256xi1>
    %c16_i32_55 = arith.constant 16 : i32
    %220 = vector.broadcast %c16_i32_55 : i32 to vector<1x256xi32>
    %221 = arith.cmpi slt, %1, %220 : vector<1x256xi32>
    %222 = arith.andi %219, %221 : vector<1x256xi1>
    %223 = arith.extui %222 : vector<1x256xi1> to vector<1x256xi32>
    %224 = arith.sitofp %223 : vector<1x256xi32> to vector<1x256xf32>
    %225 = vector.broadcast %224 : vector<1x256xf32> to vector<16x256xf32>
    %226 = arith.mulf %3, %225 : vector<16x256xf32>
    %227 = arith.truncf %226 : vector<16x256xf32> to vector<16x256xbf16>
    %c255_i32 = arith.constant 255 : i32
    %228 = tpu.dynamic_rotate %3 by %c255_i32 dim 1 : vector<16x256xf32>, i32 -> vector<16x256xf32>
    %c0_i32_56 = arith.constant 0 : i32
    %229 = vector.broadcast %c0_i32_56 : i32 to vector<1x256xi32>
    %230 = arith.cmpi sge, %0, %229 : vector<1x256xi32>
    %c256_i32_57 = arith.constant 256 : i32
    %231 = vector.broadcast %c256_i32_57 : i32 to vector<1x256xi32>
    %232 = arith.cmpi slt, %0, %231 : vector<1x256xi32>
    %233 = arith.andi %230, %232 : vector<1x256xi1>
    %c-1_i32_58 = arith.constant -1 : i32
    %234 = vector.broadcast %c-1_i32_58 : i32 to vector<1x256xi32>
    %235 = arith.cmpi sge, %1, %234 : vector<1x256xi32>
    %236 = arith.andi %233, %235 : vector<1x256xi1>
    %c15_i32_59 = arith.constant 15 : i32
    %237 = vector.broadcast %c15_i32_59 : i32 to vector<1x256xi32>
    %238 = arith.cmpi slt, %1, %237 : vector<1x256xi32>
    %239 = arith.andi %236, %238 : vector<1x256xi1>
    %240 = arith.extui %239 : vector<1x256xi1> to vector<1x256xi32>
    %241 = arith.sitofp %240 : vector<1x256xi32> to vector<1x256xf32>
    %242 = vector.broadcast %241 : vector<1x256xf32> to vector<16x256xf32>
    %243 = arith.mulf %228, %242 : vector<16x256xf32>
    %244 = arith.truncf %243 : vector<16x256xf32> to vector<16x256xbf16>
    %c254_i32 = arith.constant 254 : i32
    %245 = tpu.dynamic_rotate %3 by %c254_i32 dim 1 : vector<16x256xf32>, i32 -> vector<16x256xf32>
    %c0_i32_60 = arith.constant 0 : i32
    %246 = vector.broadcast %c0_i32_60 : i32 to vector<1x256xi32>
    %247 = arith.cmpi sge, %0, %246 : vector<1x256xi32>
    %c256_i32_61 = arith.constant 256 : i32
    %248 = vector.broadcast %c256_i32_61 : i32 to vector<1x256xi32>
    %249 = arith.cmpi slt, %0, %248 : vector<1x256xi32>
    %250 = arith.andi %247, %249 : vector<1x256xi1>
    %c-2_i32_62 = arith.constant -2 : i32
    %251 = vector.broadcast %c-2_i32_62 : i32 to vector<1x256xi32>
    %252 = arith.cmpi sge, %1, %251 : vector<1x256xi32>
    %253 = arith.andi %250, %252 : vector<1x256xi1>
    %c14_i32_63 = arith.constant 14 : i32
    %254 = vector.broadcast %c14_i32_63 : i32 to vector<1x256xi32>
    %255 = arith.cmpi slt, %1, %254 : vector<1x256xi32>
    %256 = arith.andi %253, %255 : vector<1x256xi1>
    %257 = arith.extui %256 : vector<1x256xi1> to vector<1x256xi32>
    %258 = arith.sitofp %257 : vector<1x256xi32> to vector<1x256xf32>
    %259 = vector.broadcast %258 : vector<1x256xf32> to vector<16x256xf32>
    %260 = arith.mulf %245, %259 : vector<16x256xf32>
    %261 = arith.truncf %260 : vector<16x256xf32> to vector<16x256xbf16>
    %c242_i32 = arith.constant 242 : i32
    %262 = tpu.dynamic_rotate %3 by %c242_i32 dim 1 : vector<16x256xf32>, i32 -> vector<16x256xf32>
    %c-16_i32 = arith.constant -16 : i32
    %263 = vector.broadcast %c-16_i32 : i32 to vector<1x256xi32>
    %264 = arith.cmpi sge, %0, %263 : vector<1x256xi32>
    %c240_i32 = arith.constant 240 : i32
    %265 = vector.broadcast %c240_i32 : i32 to vector<1x256xi32>
    %266 = arith.cmpi slt, %0, %265 : vector<1x256xi32>
    %267 = arith.andi %264, %266 : vector<1x256xi1>
    %c2_i32_64 = arith.constant 2 : i32
    %268 = vector.broadcast %c2_i32_64 : i32 to vector<1x256xi32>
    %269 = arith.cmpi sge, %1, %268 : vector<1x256xi32>
    %270 = arith.andi %267, %269 : vector<1x256xi1>
    %c18_i32_65 = arith.constant 18 : i32
    %271 = vector.broadcast %c18_i32_65 : i32 to vector<1x256xi32>
    %272 = arith.cmpi slt, %1, %271 : vector<1x256xi32>
    %273 = arith.andi %270, %272 : vector<1x256xi1>
    %274 = arith.extui %273 : vector<1x256xi1> to vector<1x256xi32>
    %275 = arith.sitofp %274 : vector<1x256xi32> to vector<1x256xf32>
    %276 = vector.broadcast %275 : vector<1x256xf32> to vector<16x256xf32>
    %277 = arith.mulf %262, %276 : vector<16x256xf32>
    %278 = arith.truncf %277 : vector<16x256xf32> to vector<16x256xbf16>
    %c241_i32 = arith.constant 241 : i32
    %279 = tpu.dynamic_rotate %3 by %c241_i32 dim 1 : vector<16x256xf32>, i32 -> vector<16x256xf32>
    %c-16_i32_66 = arith.constant -16 : i32
    %280 = vector.broadcast %c-16_i32_66 : i32 to vector<1x256xi32>
    %281 = arith.cmpi sge, %0, %280 : vector<1x256xi32>
    %c240_i32_67 = arith.constant 240 : i32
    %282 = vector.broadcast %c240_i32_67 : i32 to vector<1x256xi32>
    %283 = arith.cmpi slt, %0, %282 : vector<1x256xi32>
    %284 = arith.andi %281, %283 : vector<1x256xi1>
    %c1_i32_68 = arith.constant 1 : i32
    %285 = vector.broadcast %c1_i32_68 : i32 to vector<1x256xi32>
    %286 = arith.cmpi sge, %1, %285 : vector<1x256xi32>
    %287 = arith.andi %284, %286 : vector<1x256xi1>
    %c17_i32_69 = arith.constant 17 : i32
    %288 = vector.broadcast %c17_i32_69 : i32 to vector<1x256xi32>
    %289 = arith.cmpi slt, %1, %288 : vector<1x256xi32>
    %290 = arith.andi %287, %289 : vector<1x256xi1>
    %291 = arith.extui %290 : vector<1x256xi1> to vector<1x256xi32>
    %292 = arith.sitofp %291 : vector<1x256xi32> to vector<1x256xf32>
    %293 = vector.broadcast %292 : vector<1x256xf32> to vector<16x256xf32>
    %294 = arith.mulf %279, %293 : vector<16x256xf32>
    %295 = arith.truncf %294 : vector<16x256xf32> to vector<16x256xbf16>
    %c240_i32_70 = arith.constant 240 : i32
    %296 = tpu.dynamic_rotate %3 by %c240_i32_70 dim 1 : vector<16x256xf32>, i32 -> vector<16x256xf32>
    %c-16_i32_71 = arith.constant -16 : i32
    %297 = vector.broadcast %c-16_i32_71 : i32 to vector<1x256xi32>
    %298 = arith.cmpi sge, %0, %297 : vector<1x256xi32>
    %c240_i32_72 = arith.constant 240 : i32
    %299 = vector.broadcast %c240_i32_72 : i32 to vector<1x256xi32>
    %300 = arith.cmpi slt, %0, %299 : vector<1x256xi32>
    %301 = arith.andi %298, %300 : vector<1x256xi1>
    %c0_i32_73 = arith.constant 0 : i32
    %302 = vector.broadcast %c0_i32_73 : i32 to vector<1x256xi32>
    %303 = arith.cmpi sge, %1, %302 : vector<1x256xi32>
    %304 = arith.andi %301, %303 : vector<1x256xi1>
    %c16_i32_74 = arith.constant 16 : i32
    %305 = vector.broadcast %c16_i32_74 : i32 to vector<1x256xi32>
    %306 = arith.cmpi slt, %1, %305 : vector<1x256xi32>
    %307 = arith.andi %304, %306 : vector<1x256xi1>
    %308 = arith.extui %307 : vector<1x256xi1> to vector<1x256xi32>
    %309 = arith.sitofp %308 : vector<1x256xi32> to vector<1x256xf32>
    %310 = vector.broadcast %309 : vector<1x256xf32> to vector<16x256xf32>
    %311 = arith.mulf %296, %310 : vector<16x256xf32>
    %312 = arith.truncf %311 : vector<16x256xf32> to vector<16x256xbf16>
    %c239_i32 = arith.constant 239 : i32
    %313 = tpu.dynamic_rotate %3 by %c239_i32 dim 1 : vector<16x256xf32>, i32 -> vector<16x256xf32>
    %c-16_i32_75 = arith.constant -16 : i32
    %314 = vector.broadcast %c-16_i32_75 : i32 to vector<1x256xi32>
    %315 = arith.cmpi sge, %0, %314 : vector<1x256xi32>
    %c240_i32_76 = arith.constant 240 : i32
    %316 = vector.broadcast %c240_i32_76 : i32 to vector<1x256xi32>
    %317 = arith.cmpi slt, %0, %316 : vector<1x256xi32>
    %318 = arith.andi %315, %317 : vector<1x256xi1>
    %c-1_i32_77 = arith.constant -1 : i32
    %319 = vector.broadcast %c-1_i32_77 : i32 to vector<1x256xi32>
    %320 = arith.cmpi sge, %1, %319 : vector<1x256xi32>
    %321 = arith.andi %318, %320 : vector<1x256xi1>
    %c15_i32_78 = arith.constant 15 : i32
    %322 = vector.broadcast %c15_i32_78 : i32 to vector<1x256xi32>
    %323 = arith.cmpi slt, %1, %322 : vector<1x256xi32>
    %324 = arith.andi %321, %323 : vector<1x256xi1>
    %325 = arith.extui %324 : vector<1x256xi1> to vector<1x256xi32>
    %326 = arith.sitofp %325 : vector<1x256xi32> to vector<1x256xf32>
    %327 = vector.broadcast %326 : vector<1x256xf32> to vector<16x256xf32>
    %328 = arith.mulf %313, %327 : vector<16x256xf32>
    %329 = arith.truncf %328 : vector<16x256xf32> to vector<16x256xbf16>
    %c238_i32 = arith.constant 238 : i32
    %330 = tpu.dynamic_rotate %3 by %c238_i32 dim 1 : vector<16x256xf32>, i32 -> vector<16x256xf32>
    %c-16_i32_79 = arith.constant -16 : i32
    %331 = vector.broadcast %c-16_i32_79 : i32 to vector<1x256xi32>
    %332 = arith.cmpi sge, %0, %331 : vector<1x256xi32>
    %c240_i32_80 = arith.constant 240 : i32
    %333 = vector.broadcast %c240_i32_80 : i32 to vector<1x256xi32>
    %334 = arith.cmpi slt, %0, %333 : vector<1x256xi32>
    %335 = arith.andi %332, %334 : vector<1x256xi1>
    %c-2_i32_81 = arith.constant -2 : i32
    %336 = vector.broadcast %c-2_i32_81 : i32 to vector<1x256xi32>
    %337 = arith.cmpi sge, %1, %336 : vector<1x256xi32>
    %338 = arith.andi %335, %337 : vector<1x256xi1>
    %c14_i32_82 = arith.constant 14 : i32
    %339 = vector.broadcast %c14_i32_82 : i32 to vector<1x256xi32>
    %340 = arith.cmpi slt, %1, %339 : vector<1x256xi32>
    %341 = arith.andi %338, %340 : vector<1x256xi1>
    %342 = arith.extui %341 : vector<1x256xi1> to vector<1x256xi32>
    %343 = arith.sitofp %342 : vector<1x256xi32> to vector<1x256xf32>
    %344 = vector.broadcast %343 : vector<1x256xf32> to vector<16x256xf32>
    %345 = arith.mulf %330, %344 : vector<16x256xf32>
    %346 = arith.truncf %345 : vector<16x256xf32> to vector<16x256xbf16>
    %c226_i32 = arith.constant 226 : i32
    %347 = tpu.dynamic_rotate %3 by %c226_i32 dim 1 : vector<16x256xf32>, i32 -> vector<16x256xf32>
    %c-32_i32 = arith.constant -32 : i32
    %348 = vector.broadcast %c-32_i32 : i32 to vector<1x256xi32>
    %349 = arith.cmpi sge, %0, %348 : vector<1x256xi32>
    %c224_i32 = arith.constant 224 : i32
    %350 = vector.broadcast %c224_i32 : i32 to vector<1x256xi32>
    %351 = arith.cmpi slt, %0, %350 : vector<1x256xi32>
    %352 = arith.andi %349, %351 : vector<1x256xi1>
    %c2_i32_83 = arith.constant 2 : i32
    %353 = vector.broadcast %c2_i32_83 : i32 to vector<1x256xi32>
    %354 = arith.cmpi sge, %1, %353 : vector<1x256xi32>
    %355 = arith.andi %352, %354 : vector<1x256xi1>
    %c18_i32_84 = arith.constant 18 : i32
    %356 = vector.broadcast %c18_i32_84 : i32 to vector<1x256xi32>
    %357 = arith.cmpi slt, %1, %356 : vector<1x256xi32>
    %358 = arith.andi %355, %357 : vector<1x256xi1>
    %359 = arith.extui %358 : vector<1x256xi1> to vector<1x256xi32>
    %360 = arith.sitofp %359 : vector<1x256xi32> to vector<1x256xf32>
    %361 = vector.broadcast %360 : vector<1x256xf32> to vector<16x256xf32>
    %362 = arith.mulf %347, %361 : vector<16x256xf32>
    %363 = arith.truncf %362 : vector<16x256xf32> to vector<16x256xbf16>
    %c225_i32 = arith.constant 225 : i32
    %364 = tpu.dynamic_rotate %3 by %c225_i32 dim 1 : vector<16x256xf32>, i32 -> vector<16x256xf32>
    %c-32_i32_85 = arith.constant -32 : i32
    %365 = vector.broadcast %c-32_i32_85 : i32 to vector<1x256xi32>
    %366 = arith.cmpi sge, %0, %365 : vector<1x256xi32>
    %c224_i32_86 = arith.constant 224 : i32
    %367 = vector.broadcast %c224_i32_86 : i32 to vector<1x256xi32>
    %368 = arith.cmpi slt, %0, %367 : vector<1x256xi32>
    %369 = arith.andi %366, %368 : vector<1x256xi1>
    %c1_i32_87 = arith.constant 1 : i32
    %370 = vector.broadcast %c1_i32_87 : i32 to vector<1x256xi32>
    %371 = arith.cmpi sge, %1, %370 : vector<1x256xi32>
    %372 = arith.andi %369, %371 : vector<1x256xi1>
    %c17_i32_88 = arith.constant 17 : i32
    %373 = vector.broadcast %c17_i32_88 : i32 to vector<1x256xi32>
    %374 = arith.cmpi slt, %1, %373 : vector<1x256xi32>
    %375 = arith.andi %372, %374 : vector<1x256xi1>
    %376 = arith.extui %375 : vector<1x256xi1> to vector<1x256xi32>
    %377 = arith.sitofp %376 : vector<1x256xi32> to vector<1x256xf32>
    %378 = vector.broadcast %377 : vector<1x256xf32> to vector<16x256xf32>
    %379 = arith.mulf %364, %378 : vector<16x256xf32>
    %380 = arith.truncf %379 : vector<16x256xf32> to vector<16x256xbf16>
    %c224_i32_89 = arith.constant 224 : i32
    %381 = tpu.dynamic_rotate %3 by %c224_i32_89 dim 1 : vector<16x256xf32>, i32 -> vector<16x256xf32>
    %c-32_i32_90 = arith.constant -32 : i32
    %382 = vector.broadcast %c-32_i32_90 : i32 to vector<1x256xi32>
    %383 = arith.cmpi sge, %0, %382 : vector<1x256xi32>
    %c224_i32_91 = arith.constant 224 : i32
    %384 = vector.broadcast %c224_i32_91 : i32 to vector<1x256xi32>
    %385 = arith.cmpi slt, %0, %384 : vector<1x256xi32>
    %386 = arith.andi %383, %385 : vector<1x256xi1>
    %c0_i32_92 = arith.constant 0 : i32
    %387 = vector.broadcast %c0_i32_92 : i32 to vector<1x256xi32>
    %388 = arith.cmpi sge, %1, %387 : vector<1x256xi32>
    %389 = arith.andi %386, %388 : vector<1x256xi1>
    %c16_i32_93 = arith.constant 16 : i32
    %390 = vector.broadcast %c16_i32_93 : i32 to vector<1x256xi32>
    %391 = arith.cmpi slt, %1, %390 : vector<1x256xi32>
    %392 = arith.andi %389, %391 : vector<1x256xi1>
    %393 = arith.extui %392 : vector<1x256xi1> to vector<1x256xi32>
    %394 = arith.sitofp %393 : vector<1x256xi32> to vector<1x256xf32>
    %395 = vector.broadcast %394 : vector<1x256xf32> to vector<16x256xf32>
    %396 = arith.mulf %381, %395 : vector<16x256xf32>
    %397 = arith.truncf %396 : vector<16x256xf32> to vector<16x256xbf16>
    %c223_i32 = arith.constant 223 : i32
    %398 = tpu.dynamic_rotate %3 by %c223_i32 dim 1 : vector<16x256xf32>, i32 -> vector<16x256xf32>
    %c-32_i32_94 = arith.constant -32 : i32
    %399 = vector.broadcast %c-32_i32_94 : i32 to vector<1x256xi32>
    %400 = arith.cmpi sge, %0, %399 : vector<1x256xi32>
    %c224_i32_95 = arith.constant 224 : i32
    %401 = vector.broadcast %c224_i32_95 : i32 to vector<1x256xi32>
    %402 = arith.cmpi slt, %0, %401 : vector<1x256xi32>
    %403 = arith.andi %400, %402 : vector<1x256xi1>
    %c-1_i32_96 = arith.constant -1 : i32
    %404 = vector.broadcast %c-1_i32_96 : i32 to vector<1x256xi32>
    %405 = arith.cmpi sge, %1, %404 : vector<1x256xi32>
    %406 = arith.andi %403, %405 : vector<1x256xi1>
    %c15_i32_97 = arith.constant 15 : i32
    %407 = vector.broadcast %c15_i32_97 : i32 to vector<1x256xi32>
    %408 = arith.cmpi slt, %1, %407 : vector<1x256xi32>
    %409 = arith.andi %406, %408 : vector<1x256xi1>
    %410 = arith.extui %409 : vector<1x256xi1> to vector<1x256xi32>
    %411 = arith.sitofp %410 : vector<1x256xi32> to vector<1x256xf32>
    %412 = vector.broadcast %411 : vector<1x256xf32> to vector<16x256xf32>
    %413 = arith.mulf %398, %412 : vector<16x256xf32>
    %414 = arith.truncf %413 : vector<16x256xf32> to vector<16x256xbf16>
    %c222_i32 = arith.constant 222 : i32
    %415 = tpu.dynamic_rotate %3 by %c222_i32 dim 1 : vector<16x256xf32>, i32 -> vector<16x256xf32>
    %c-32_i32_98 = arith.constant -32 : i32
    %416 = vector.broadcast %c-32_i32_98 : i32 to vector<1x256xi32>
    %417 = arith.cmpi sge, %0, %416 : vector<1x256xi32>
    %c224_i32_99 = arith.constant 224 : i32
    %418 = vector.broadcast %c224_i32_99 : i32 to vector<1x256xi32>
    %419 = arith.cmpi slt, %0, %418 : vector<1x256xi32>
    %420 = arith.andi %417, %419 : vector<1x256xi1>
    %c-2_i32_100 = arith.constant -2 : i32
    %421 = vector.broadcast %c-2_i32_100 : i32 to vector<1x256xi32>
    %422 = arith.cmpi sge, %1, %421 : vector<1x256xi32>
    %423 = arith.andi %420, %422 : vector<1x256xi1>
    %c14_i32_101 = arith.constant 14 : i32
    %424 = vector.broadcast %c14_i32_101 : i32 to vector<1x256xi32>
    %425 = arith.cmpi slt, %1, %424 : vector<1x256xi32>
    %426 = arith.andi %423, %425 : vector<1x256xi1>
    %427 = arith.extui %426 : vector<1x256xi1> to vector<1x256xi32>
    %428 = arith.sitofp %427 : vector<1x256xi32> to vector<1x256xf32>
    %429 = vector.broadcast %428 : vector<1x256xf32> to vector<16x256xf32>
    %430 = arith.mulf %415, %429 : vector<16x256xf32>
    %431 = arith.truncf %430 : vector<16x256xf32> to vector<16x256xbf16>
    %432 = tpu.concatenate %24, %41, %58, %75, %92, %109, %126, %143, %160, %177, %194, %211, %227, %244, %261, %278 in 0 : vector<16x256xbf16>, vector<16x256xbf16>, vector<16x256xbf16>, vector<16x256xbf16>, vector<16x256xbf16>, vector<16x256xbf16>, vector<16x256xbf16>, vector<16x256xbf16>, vector<16x256xbf16>, vector<16x256xbf16>, vector<16x256xbf16>, vector<16x256xbf16>, vector<16x256xbf16>, vector<16x256xbf16>, vector<16x256xbf16>, vector<16x256xbf16> -> vector<256x256xbf16>
    %433 = tpu.concatenate %295, %312, %329, %346, %363, %380, %397, %414, %431 in 0 : vector<16x256xbf16>, vector<16x256xbf16>, vector<16x256xbf16>, vector<16x256xbf16>, vector<16x256xbf16>, vector<16x256xbf16>, vector<16x256xbf16>, vector<16x256xbf16>, vector<16x256xbf16> -> vector<144x256xbf16>
    %434 = tpu.concatenate %432, %433 in 0 : vector<256x256xbf16>, vector<144x256xbf16> -> vector<400x256xbf16>
    %c0_102 = arith.constant 0 : index
    %c0_103 = arith.constant 0 : index
    %435 = vector.load %arg5[%c0_102, %c0_103] : memref<32x400xbf16, #tpu.memory_space<vmem>>, vector<32x400xbf16>
    %cst = arith.constant dense<0.000000e+00> : vector<32x256xf32>
    %436 = tpu.matmul %435, %434, %cst {dimension_numbers = #tpu.dot_dimension_numbers<[1], [0], [0], [1], [0, 0, 1, 1], [], []>} : vector<32x400xbf16>, vector<400x256xbf16>, vector<32x256xf32> -> vector<32x256xf32>
    %c0_104 = arith.constant 0 : index
    %c0_105 = arith.constant 0 : index
    %437 = vector.load %arg6[%c0_104, %c0_105] : memref<32x1xf32, #tpu.memory_space<vmem>>, vector<32x1xf32>
    %438 = vector.broadcast %437 : vector<32x1xf32> to vector<32x256xf32>
    %439 = arith.addf %436, %438 : vector<32x256xf32>
    %cst_106 = arith.constant 0.000000e+00 : f32
    %440 = vector.broadcast %cst_106 : f32 to vector<32x256xf32>
    %441 = arith.maximumf %439, %440 : vector<32x256xf32>
    %c0_107 = arith.constant 0 : index
    %c0_108 = arith.constant 0 : index
    %442 = vector.load %arg7[%c0_107, %c0_108] : memref<32x32xbf16, #tpu.memory_space<vmem>>, vector<32x32xbf16>
    %443 = arith.truncf %441 : vector<32x256xf32> to vector<32x256xbf16>
    %cst_109 = arith.constant dense<0.000000e+00> : vector<32x256xf32>
    %444 = tpu.matmul %442, %443, %cst_109 {dimension_numbers = #tpu.dot_dimension_numbers<[1], [0], [0], [1], [0, 0, 1, 1], [], []>} : vector<32x32xbf16>, vector<32x256xbf16>, vector<32x256xf32> -> vector<32x256xf32>
    %c0_110 = arith.constant 0 : index
    %c0_111 = arith.constant 0 : index
    %445 = vector.load %arg8[%c0_110, %c0_111] : memref<32x1xf32, #tpu.memory_space<vmem>>, vector<32x1xf32>
    %446 = vector.broadcast %445 : vector<32x1xf32> to vector<32x256xf32>
    %447 = arith.addf %444, %446 : vector<32x256xf32>
    %c0_112 = arith.constant 0 : index
    %c0_113 = arith.constant 0 : index
    %448 = vector.load %arg9[%c0_112, %c0_113] : memref<32x1xf32, #tpu.memory_space<vmem>>, vector<32x1xf32>
    %449 = vector.broadcast %448 : vector<32x1xf32> to vector<32x256xf32>
    %450 = arith.mulf %449, %5 : vector<32x256xf32>
    %451 = arith.addf %447, %450 : vector<32x256xf32>
    %cst_114 = arith.constant 0.000000e+00 : f32
    %452 = vector.broadcast %cst_114 : f32 to vector<32x256xf32>
    %453 = arith.maximumf %451, %452 : vector<32x256xf32>
    %c34_i32_115 = arith.constant 34 : i32
    %454 = tpu.dynamic_rotate %453 by %c34_i32_115 dim 1 : vector<32x256xf32>, i32 -> vector<32x256xf32>
    %c32_i32_116 = arith.constant 32 : i32
    %455 = vector.broadcast %c32_i32_116 : i32 to vector<1x256xi32>
    %456 = arith.cmpi sge, %0, %455 : vector<1x256xi32>
    %c288_i32_117 = arith.constant 288 : i32
    %457 = vector.broadcast %c288_i32_117 : i32 to vector<1x256xi32>
    %458 = arith.cmpi slt, %0, %457 : vector<1x256xi32>
    %459 = arith.andi %456, %458 : vector<1x256xi1>
    %c2_i32_118 = arith.constant 2 : i32
    %460 = vector.broadcast %c2_i32_118 : i32 to vector<1x256xi32>
    %461 = arith.cmpi sge, %1, %460 : vector<1x256xi32>
    %462 = arith.andi %459, %461 : vector<1x256xi1>
    %c18_i32_119 = arith.constant 18 : i32
    %463 = vector.broadcast %c18_i32_119 : i32 to vector<1x256xi32>
    %464 = arith.cmpi slt, %1, %463 : vector<1x256xi32>
    %465 = arith.andi %462, %464 : vector<1x256xi1>
    %466 = arith.extui %465 : vector<1x256xi1> to vector<1x256xi32>
    %467 = arith.sitofp %466 : vector<1x256xi32> to vector<1x256xf32>
    %468 = vector.broadcast %467 : vector<1x256xf32> to vector<32x256xf32>
    %469 = arith.mulf %454, %468 : vector<32x256xf32>
    %470 = arith.truncf %469 : vector<32x256xf32> to vector<32x256xbf16>
    %c32_i32_120 = arith.constant 32 : i32
    %471 = tpu.dynamic_rotate %453 by %c32_i32_120 dim 1 : vector<32x256xf32>, i32 -> vector<32x256xf32>
    %c32_i32_121 = arith.constant 32 : i32
    %472 = vector.broadcast %c32_i32_121 : i32 to vector<1x256xi32>
    %473 = arith.cmpi sge, %0, %472 : vector<1x256xi32>
    %c288_i32_122 = arith.constant 288 : i32
    %474 = vector.broadcast %c288_i32_122 : i32 to vector<1x256xi32>
    %475 = arith.cmpi slt, %0, %474 : vector<1x256xi32>
    %476 = arith.andi %473, %475 : vector<1x256xi1>
    %c0_i32_123 = arith.constant 0 : i32
    %477 = vector.broadcast %c0_i32_123 : i32 to vector<1x256xi32>
    %478 = arith.cmpi sge, %1, %477 : vector<1x256xi32>
    %479 = arith.andi %476, %478 : vector<1x256xi1>
    %c16_i32_124 = arith.constant 16 : i32
    %480 = vector.broadcast %c16_i32_124 : i32 to vector<1x256xi32>
    %481 = arith.cmpi slt, %1, %480 : vector<1x256xi32>
    %482 = arith.andi %479, %481 : vector<1x256xi1>
    %483 = arith.extui %482 : vector<1x256xi1> to vector<1x256xi32>
    %484 = arith.sitofp %483 : vector<1x256xi32> to vector<1x256xf32>
    %485 = vector.broadcast %484 : vector<1x256xf32> to vector<32x256xf32>
    %486 = arith.mulf %471, %485 : vector<32x256xf32>
    %487 = arith.truncf %486 : vector<32x256xf32> to vector<32x256xbf16>
    %c30_i32_125 = arith.constant 30 : i32
    %488 = tpu.dynamic_rotate %453 by %c30_i32_125 dim 1 : vector<32x256xf32>, i32 -> vector<32x256xf32>
    %c32_i32_126 = arith.constant 32 : i32
    %489 = vector.broadcast %c32_i32_126 : i32 to vector<1x256xi32>
    %490 = arith.cmpi sge, %0, %489 : vector<1x256xi32>
    %c288_i32_127 = arith.constant 288 : i32
    %491 = vector.broadcast %c288_i32_127 : i32 to vector<1x256xi32>
    %492 = arith.cmpi slt, %0, %491 : vector<1x256xi32>
    %493 = arith.andi %490, %492 : vector<1x256xi1>
    %c-2_i32_128 = arith.constant -2 : i32
    %494 = vector.broadcast %c-2_i32_128 : i32 to vector<1x256xi32>
    %495 = arith.cmpi sge, %1, %494 : vector<1x256xi32>
    %496 = arith.andi %493, %495 : vector<1x256xi1>
    %c14_i32_129 = arith.constant 14 : i32
    %497 = vector.broadcast %c14_i32_129 : i32 to vector<1x256xi32>
    %498 = arith.cmpi slt, %1, %497 : vector<1x256xi32>
    %499 = arith.andi %496, %498 : vector<1x256xi1>
    %500 = arith.extui %499 : vector<1x256xi1> to vector<1x256xi32>
    %501 = arith.sitofp %500 : vector<1x256xi32> to vector<1x256xf32>
    %502 = vector.broadcast %501 : vector<1x256xf32> to vector<32x256xf32>
    %503 = arith.mulf %488, %502 : vector<32x256xf32>
    %504 = arith.truncf %503 : vector<32x256xf32> to vector<32x256xbf16>
    %c2_i32_130 = arith.constant 2 : i32
    %505 = tpu.dynamic_rotate %453 by %c2_i32_130 dim 1 : vector<32x256xf32>, i32 -> vector<32x256xf32>
    %c0_i32_131 = arith.constant 0 : i32
    %506 = vector.broadcast %c0_i32_131 : i32 to vector<1x256xi32>
    %507 = arith.cmpi sge, %0, %506 : vector<1x256xi32>
    %c256_i32_132 = arith.constant 256 : i32
    %508 = vector.broadcast %c256_i32_132 : i32 to vector<1x256xi32>
    %509 = arith.cmpi slt, %0, %508 : vector<1x256xi32>
    %510 = arith.andi %507, %509 : vector<1x256xi1>
    %c2_i32_133 = arith.constant 2 : i32
    %511 = vector.broadcast %c2_i32_133 : i32 to vector<1x256xi32>
    %512 = arith.cmpi sge, %1, %511 : vector<1x256xi32>
    %513 = arith.andi %510, %512 : vector<1x256xi1>
    %c18_i32_134 = arith.constant 18 : i32
    %514 = vector.broadcast %c18_i32_134 : i32 to vector<1x256xi32>
    %515 = arith.cmpi slt, %1, %514 : vector<1x256xi32>
    %516 = arith.andi %513, %515 : vector<1x256xi1>
    %517 = arith.extui %516 : vector<1x256xi1> to vector<1x256xi32>
    %518 = arith.sitofp %517 : vector<1x256xi32> to vector<1x256xf32>
    %519 = vector.broadcast %518 : vector<1x256xf32> to vector<32x256xf32>
    %520 = arith.mulf %505, %519 : vector<32x256xf32>
    %521 = arith.truncf %520 : vector<32x256xf32> to vector<32x256xbf16>
    %c0_i32_135 = arith.constant 0 : i32
    %522 = vector.broadcast %c0_i32_135 : i32 to vector<1x256xi32>
    %523 = arith.cmpi sge, %0, %522 : vector<1x256xi32>
    %c256_i32_136 = arith.constant 256 : i32
    %524 = vector.broadcast %c256_i32_136 : i32 to vector<1x256xi32>
    %525 = arith.cmpi slt, %0, %524 : vector<1x256xi32>
    %526 = arith.andi %523, %525 : vector<1x256xi1>
    %c0_i32_137 = arith.constant 0 : i32
    %527 = vector.broadcast %c0_i32_137 : i32 to vector<1x256xi32>
    %528 = arith.cmpi sge, %1, %527 : vector<1x256xi32>
    %529 = arith.andi %526, %528 : vector<1x256xi1>
    %c16_i32_138 = arith.constant 16 : i32
    %530 = vector.broadcast %c16_i32_138 : i32 to vector<1x256xi32>
    %531 = arith.cmpi slt, %1, %530 : vector<1x256xi32>
    %532 = arith.andi %529, %531 : vector<1x256xi1>
    %533 = arith.extui %532 : vector<1x256xi1> to vector<1x256xi32>
    %534 = arith.sitofp %533 : vector<1x256xi32> to vector<1x256xf32>
    %535 = vector.broadcast %534 : vector<1x256xf32> to vector<32x256xf32>
    %536 = arith.mulf %453, %535 : vector<32x256xf32>
    %537 = arith.truncf %536 : vector<32x256xf32> to vector<32x256xbf16>
    %c254_i32_139 = arith.constant 254 : i32
    %538 = tpu.dynamic_rotate %453 by %c254_i32_139 dim 1 : vector<32x256xf32>, i32 -> vector<32x256xf32>
    %c0_i32_140 = arith.constant 0 : i32
    %539 = vector.broadcast %c0_i32_140 : i32 to vector<1x256xi32>
    %540 = arith.cmpi sge, %0, %539 : vector<1x256xi32>
    %c256_i32_141 = arith.constant 256 : i32
    %541 = vector.broadcast %c256_i32_141 : i32 to vector<1x256xi32>
    %542 = arith.cmpi slt, %0, %541 : vector<1x256xi32>
    %543 = arith.andi %540, %542 : vector<1x256xi1>
    %c-2_i32_142 = arith.constant -2 : i32
    %544 = vector.broadcast %c-2_i32_142 : i32 to vector<1x256xi32>
    %545 = arith.cmpi sge, %1, %544 : vector<1x256xi32>
    %546 = arith.andi %543, %545 : vector<1x256xi1>
    %c14_i32_143 = arith.constant 14 : i32
    %547 = vector.broadcast %c14_i32_143 : i32 to vector<1x256xi32>
    %548 = arith.cmpi slt, %1, %547 : vector<1x256xi32>
    %549 = arith.andi %546, %548 : vector<1x256xi1>
    %550 = arith.extui %549 : vector<1x256xi1> to vector<1x256xi32>
    %551 = arith.sitofp %550 : vector<1x256xi32> to vector<1x256xf32>
    %552 = vector.broadcast %551 : vector<1x256xf32> to vector<32x256xf32>
    %553 = arith.mulf %538, %552 : vector<32x256xf32>
    %554 = arith.truncf %553 : vector<32x256xf32> to vector<32x256xbf16>
    %c226_i32_144 = arith.constant 226 : i32
    %555 = tpu.dynamic_rotate %453 by %c226_i32_144 dim 1 : vector<32x256xf32>, i32 -> vector<32x256xf32>
    %c-32_i32_145 = arith.constant -32 : i32
    %556 = vector.broadcast %c-32_i32_145 : i32 to vector<1x256xi32>
    %557 = arith.cmpi sge, %0, %556 : vector<1x256xi32>
    %c224_i32_146 = arith.constant 224 : i32
    %558 = vector.broadcast %c224_i32_146 : i32 to vector<1x256xi32>
    %559 = arith.cmpi slt, %0, %558 : vector<1x256xi32>
    %560 = arith.andi %557, %559 : vector<1x256xi1>
    %c2_i32_147 = arith.constant 2 : i32
    %561 = vector.broadcast %c2_i32_147 : i32 to vector<1x256xi32>
    %562 = arith.cmpi sge, %1, %561 : vector<1x256xi32>
    %563 = arith.andi %560, %562 : vector<1x256xi1>
    %c18_i32_148 = arith.constant 18 : i32
    %564 = vector.broadcast %c18_i32_148 : i32 to vector<1x256xi32>
    %565 = arith.cmpi slt, %1, %564 : vector<1x256xi32>
    %566 = arith.andi %563, %565 : vector<1x256xi1>
    %567 = arith.extui %566 : vector<1x256xi1> to vector<1x256xi32>
    %568 = arith.sitofp %567 : vector<1x256xi32> to vector<1x256xf32>
    %569 = vector.broadcast %568 : vector<1x256xf32> to vector<32x256xf32>
    %570 = arith.mulf %555, %569 : vector<32x256xf32>
    %571 = arith.truncf %570 : vector<32x256xf32> to vector<32x256xbf16>
    %c224_i32_149 = arith.constant 224 : i32
    %572 = tpu.dynamic_rotate %453 by %c224_i32_149 dim 1 : vector<32x256xf32>, i32 -> vector<32x256xf32>
    %c-32_i32_150 = arith.constant -32 : i32
    %573 = vector.broadcast %c-32_i32_150 : i32 to vector<1x256xi32>
    %574 = arith.cmpi sge, %0, %573 : vector<1x256xi32>
    %c224_i32_151 = arith.constant 224 : i32
    %575 = vector.broadcast %c224_i32_151 : i32 to vector<1x256xi32>
    %576 = arith.cmpi slt, %0, %575 : vector<1x256xi32>
    %577 = arith.andi %574, %576 : vector<1x256xi1>
    %c0_i32_152 = arith.constant 0 : i32
    %578 = vector.broadcast %c0_i32_152 : i32 to vector<1x256xi32>
    %579 = arith.cmpi sge, %1, %578 : vector<1x256xi32>
    %580 = arith.andi %577, %579 : vector<1x256xi1>
    %c16_i32_153 = arith.constant 16 : i32
    %581 = vector.broadcast %c16_i32_153 : i32 to vector<1x256xi32>
    %582 = arith.cmpi slt, %1, %581 : vector<1x256xi32>
    %583 = arith.andi %580, %582 : vector<1x256xi1>
    %584 = arith.extui %583 : vector<1x256xi1> to vector<1x256xi32>
    %585 = arith.sitofp %584 : vector<1x256xi32> to vector<1x256xf32>
    %586 = vector.broadcast %585 : vector<1x256xf32> to vector<32x256xf32>
    %587 = arith.mulf %572, %586 : vector<32x256xf32>
    %588 = arith.truncf %587 : vector<32x256xf32> to vector<32x256xbf16>
    %c222_i32_154 = arith.constant 222 : i32
    %589 = tpu.dynamic_rotate %453 by %c222_i32_154 dim 1 : vector<32x256xf32>, i32 -> vector<32x256xf32>
    %c-32_i32_155 = arith.constant -32 : i32
    %590 = vector.broadcast %c-32_i32_155 : i32 to vector<1x256xi32>
    %591 = arith.cmpi sge, %0, %590 : vector<1x256xi32>
    %c224_i32_156 = arith.constant 224 : i32
    %592 = vector.broadcast %c224_i32_156 : i32 to vector<1x256xi32>
    %593 = arith.cmpi slt, %0, %592 : vector<1x256xi32>
    %594 = arith.andi %591, %593 : vector<1x256xi1>
    %c-2_i32_157 = arith.constant -2 : i32
    %595 = vector.broadcast %c-2_i32_157 : i32 to vector<1x256xi32>
    %596 = arith.cmpi sge, %1, %595 : vector<1x256xi32>
    %597 = arith.andi %594, %596 : vector<1x256xi1>
    %c14_i32_158 = arith.constant 14 : i32
    %598 = vector.broadcast %c14_i32_158 : i32 to vector<1x256xi32>
    %599 = arith.cmpi slt, %1, %598 : vector<1x256xi32>
    %600 = arith.andi %597, %599 : vector<1x256xi1>
    %601 = arith.extui %600 : vector<1x256xi1> to vector<1x256xi32>
    %602 = arith.sitofp %601 : vector<1x256xi32> to vector<1x256xf32>
    %603 = vector.broadcast %602 : vector<1x256xf32> to vector<32x256xf32>
    %604 = arith.mulf %589, %603 : vector<32x256xf32>
    %605 = arith.truncf %604 : vector<32x256xf32> to vector<32x256xbf16>
    %606 = tpu.concatenate %470, %487, %504, %521, %537, %554, %571, %588, %605 in 0 : vector<32x256xbf16>, vector<32x256xbf16>, vector<32x256xbf16>, vector<32x256xbf16>, vector<32x256xbf16>, vector<32x256xbf16>, vector<32x256xbf16>, vector<32x256xbf16>, vector<32x256xbf16> -> vector<288x256xbf16>
    %c0_159 = arith.constant 0 : index
    %c0_160 = arith.constant 0 : index
    %607 = vector.load %arg10[%c0_159, %c0_160] : memref<32x288xbf16, #tpu.memory_space<vmem>>, vector<32x288xbf16>
    %cst_161 = arith.constant dense<0.000000e+00> : vector<32x256xf32>
    %608 = tpu.matmul %607, %606, %cst_161 {dimension_numbers = #tpu.dot_dimension_numbers<[1], [0], [0], [1], [0, 0, 1, 1], [], []>} : vector<32x288xbf16>, vector<288x256xbf16>, vector<32x256xf32> -> vector<32x256xf32>
    %c0_162 = arith.constant 0 : index
    %c0_163 = arith.constant 0 : index
    %609 = vector.load %arg11[%c0_162, %c0_163] : memref<32x1xf32, #tpu.memory_space<vmem>>, vector<32x1xf32>
    %610 = vector.broadcast %609 : vector<32x1xf32> to vector<32x256xf32>
    %611 = arith.addf %608, %610 : vector<32x256xf32>
    %cst_164 = arith.constant 0.000000e+00 : f32
    %612 = vector.broadcast %cst_164 : f32 to vector<32x256xf32>
    %613 = arith.maximumf %611, %612 : vector<32x256xf32>
    %c0_165 = arith.constant 0 : index
    %c0_166 = arith.constant 0 : index
    %614 = vector.load %arg12[%c0_165, %c0_166] : memref<32x32xbf16, #tpu.memory_space<vmem>>, vector<32x32xbf16>
    %615 = arith.truncf %613 : vector<32x256xf32> to vector<32x256xbf16>
    %cst_167 = arith.constant dense<0.000000e+00> : vector<32x256xf32>
    %616 = tpu.matmul %614, %615, %cst_167 {dimension_numbers = #tpu.dot_dimension_numbers<[1], [0], [0], [1], [0, 0, 1, 1], [], []>} : vector<32x32xbf16>, vector<32x256xbf16>, vector<32x256xf32> -> vector<32x256xf32>
    %c0_168 = arith.constant 0 : index
    %c0_169 = arith.constant 0 : index
    %617 = vector.load %arg13[%c0_168, %c0_169] : memref<32x1xf32, #tpu.memory_space<vmem>>, vector<32x1xf32>
    %618 = vector.broadcast %617 : vector<32x1xf32> to vector<32x256xf32>
    %619 = arith.addf %616, %618 : vector<32x256xf32>
    %c0_170 = arith.constant 0 : index
    %c0_171 = arith.constant 0 : index
    %620 = vector.load %arg14[%c0_170, %c0_171] : memref<32x1xf32, #tpu.memory_space<vmem>>, vector<32x1xf32>
    %621 = vector.broadcast %620 : vector<32x1xf32> to vector<32x256xf32>
    %622 = arith.mulf %621, %7 : vector<32x256xf32>
    %623 = arith.addf %619, %622 : vector<32x256xf32>
    %cst_172 = arith.constant 0.000000e+00 : f32
    %624 = vector.broadcast %cst_172 : f32 to vector<32x256xf32>
    %625 = arith.maximumf %623, %624 : vector<32x256xf32>
    %c17_i32_173 = arith.constant 17 : i32
    %626 = tpu.dynamic_rotate %625 by %c17_i32_173 dim 1 : vector<32x256xf32>, i32 -> vector<32x256xf32>
    %c16_i32_174 = arith.constant 16 : i32
    %627 = vector.broadcast %c16_i32_174 : i32 to vector<1x256xi32>
    %628 = arith.cmpi sge, %0, %627 : vector<1x256xi32>
    %c272_i32_175 = arith.constant 272 : i32
    %629 = vector.broadcast %c272_i32_175 : i32 to vector<1x256xi32>
    %630 = arith.cmpi slt, %0, %629 : vector<1x256xi32>
    %631 = arith.andi %628, %630 : vector<1x256xi1>
    %c1_i32_176 = arith.constant 1 : i32
    %632 = vector.broadcast %c1_i32_176 : i32 to vector<1x256xi32>
    %633 = arith.cmpi sge, %1, %632 : vector<1x256xi32>
    %634 = arith.andi %631, %633 : vector<1x256xi1>
    %c17_i32_177 = arith.constant 17 : i32
    %635 = vector.broadcast %c17_i32_177 : i32 to vector<1x256xi32>
    %636 = arith.cmpi slt, %1, %635 : vector<1x256xi32>
    %637 = arith.andi %634, %636 : vector<1x256xi1>
    %638 = arith.extui %637 : vector<1x256xi1> to vector<1x256xi32>
    %639 = arith.sitofp %638 : vector<1x256xi32> to vector<1x256xf32>
    %640 = vector.broadcast %639 : vector<1x256xf32> to vector<32x256xf32>
    %641 = arith.mulf %626, %640 : vector<32x256xf32>
    %642 = arith.truncf %641 : vector<32x256xf32> to vector<32x256xbf16>
    %c16_i32_178 = arith.constant 16 : i32
    %643 = tpu.dynamic_rotate %625 by %c16_i32_178 dim 1 : vector<32x256xf32>, i32 -> vector<32x256xf32>
    %c16_i32_179 = arith.constant 16 : i32
    %644 = vector.broadcast %c16_i32_179 : i32 to vector<1x256xi32>
    %645 = arith.cmpi sge, %0, %644 : vector<1x256xi32>
    %c272_i32_180 = arith.constant 272 : i32
    %646 = vector.broadcast %c272_i32_180 : i32 to vector<1x256xi32>
    %647 = arith.cmpi slt, %0, %646 : vector<1x256xi32>
    %648 = arith.andi %645, %647 : vector<1x256xi1>
    %c0_i32_181 = arith.constant 0 : i32
    %649 = vector.broadcast %c0_i32_181 : i32 to vector<1x256xi32>
    %650 = arith.cmpi sge, %1, %649 : vector<1x256xi32>
    %651 = arith.andi %648, %650 : vector<1x256xi1>
    %c16_i32_182 = arith.constant 16 : i32
    %652 = vector.broadcast %c16_i32_182 : i32 to vector<1x256xi32>
    %653 = arith.cmpi slt, %1, %652 : vector<1x256xi32>
    %654 = arith.andi %651, %653 : vector<1x256xi1>
    %655 = arith.extui %654 : vector<1x256xi1> to vector<1x256xi32>
    %656 = arith.sitofp %655 : vector<1x256xi32> to vector<1x256xf32>
    %657 = vector.broadcast %656 : vector<1x256xf32> to vector<32x256xf32>
    %658 = arith.mulf %643, %657 : vector<32x256xf32>
    %659 = arith.truncf %658 : vector<32x256xf32> to vector<32x256xbf16>
    %c15_i32_183 = arith.constant 15 : i32
    %660 = tpu.dynamic_rotate %625 by %c15_i32_183 dim 1 : vector<32x256xf32>, i32 -> vector<32x256xf32>
    %c16_i32_184 = arith.constant 16 : i32
    %661 = vector.broadcast %c16_i32_184 : i32 to vector<1x256xi32>
    %662 = arith.cmpi sge, %0, %661 : vector<1x256xi32>
    %c272_i32_185 = arith.constant 272 : i32
    %663 = vector.broadcast %c272_i32_185 : i32 to vector<1x256xi32>
    %664 = arith.cmpi slt, %0, %663 : vector<1x256xi32>
    %665 = arith.andi %662, %664 : vector<1x256xi1>
    %c-1_i32_186 = arith.constant -1 : i32
    %666 = vector.broadcast %c-1_i32_186 : i32 to vector<1x256xi32>
    %667 = arith.cmpi sge, %1, %666 : vector<1x256xi32>
    %668 = arith.andi %665, %667 : vector<1x256xi1>
    %c15_i32_187 = arith.constant 15 : i32
    %669 = vector.broadcast %c15_i32_187 : i32 to vector<1x256xi32>
    %670 = arith.cmpi slt, %1, %669 : vector<1x256xi32>
    %671 = arith.andi %668, %670 : vector<1x256xi1>
    %672 = arith.extui %671 : vector<1x256xi1> to vector<1x256xi32>
    %673 = arith.sitofp %672 : vector<1x256xi32> to vector<1x256xf32>
    %674 = vector.broadcast %673 : vector<1x256xf32> to vector<32x256xf32>
    %675 = arith.mulf %660, %674 : vector<32x256xf32>
    %676 = arith.truncf %675 : vector<32x256xf32> to vector<32x256xbf16>
    %c1_i32_188 = arith.constant 1 : i32
    %677 = tpu.dynamic_rotate %625 by %c1_i32_188 dim 1 : vector<32x256xf32>, i32 -> vector<32x256xf32>
    %c0_i32_189 = arith.constant 0 : i32
    %678 = vector.broadcast %c0_i32_189 : i32 to vector<1x256xi32>
    %679 = arith.cmpi sge, %0, %678 : vector<1x256xi32>
    %c256_i32_190 = arith.constant 256 : i32
    %680 = vector.broadcast %c256_i32_190 : i32 to vector<1x256xi32>
    %681 = arith.cmpi slt, %0, %680 : vector<1x256xi32>
    %682 = arith.andi %679, %681 : vector<1x256xi1>
    %c1_i32_191 = arith.constant 1 : i32
    %683 = vector.broadcast %c1_i32_191 : i32 to vector<1x256xi32>
    %684 = arith.cmpi sge, %1, %683 : vector<1x256xi32>
    %685 = arith.andi %682, %684 : vector<1x256xi1>
    %c17_i32_192 = arith.constant 17 : i32
    %686 = vector.broadcast %c17_i32_192 : i32 to vector<1x256xi32>
    %687 = arith.cmpi slt, %1, %686 : vector<1x256xi32>
    %688 = arith.andi %685, %687 : vector<1x256xi1>
    %689 = arith.extui %688 : vector<1x256xi1> to vector<1x256xi32>
    %690 = arith.sitofp %689 : vector<1x256xi32> to vector<1x256xf32>
    %691 = vector.broadcast %690 : vector<1x256xf32> to vector<32x256xf32>
    %692 = arith.mulf %677, %691 : vector<32x256xf32>
    %693 = arith.truncf %692 : vector<32x256xf32> to vector<32x256xbf16>
    %c0_i32_193 = arith.constant 0 : i32
    %694 = vector.broadcast %c0_i32_193 : i32 to vector<1x256xi32>
    %695 = arith.cmpi sge, %0, %694 : vector<1x256xi32>
    %c256_i32_194 = arith.constant 256 : i32
    %696 = vector.broadcast %c256_i32_194 : i32 to vector<1x256xi32>
    %697 = arith.cmpi slt, %0, %696 : vector<1x256xi32>
    %698 = arith.andi %695, %697 : vector<1x256xi1>
    %c0_i32_195 = arith.constant 0 : i32
    %699 = vector.broadcast %c0_i32_195 : i32 to vector<1x256xi32>
    %700 = arith.cmpi sge, %1, %699 : vector<1x256xi32>
    %701 = arith.andi %698, %700 : vector<1x256xi1>
    %c16_i32_196 = arith.constant 16 : i32
    %702 = vector.broadcast %c16_i32_196 : i32 to vector<1x256xi32>
    %703 = arith.cmpi slt, %1, %702 : vector<1x256xi32>
    %704 = arith.andi %701, %703 : vector<1x256xi1>
    %705 = arith.extui %704 : vector<1x256xi1> to vector<1x256xi32>
    %706 = arith.sitofp %705 : vector<1x256xi32> to vector<1x256xf32>
    %707 = vector.broadcast %706 : vector<1x256xf32> to vector<32x256xf32>
    %708 = arith.mulf %625, %707 : vector<32x256xf32>
    %709 = arith.truncf %708 : vector<32x256xf32> to vector<32x256xbf16>
    %c255_i32_197 = arith.constant 255 : i32
    %710 = tpu.dynamic_rotate %625 by %c255_i32_197 dim 1 : vector<32x256xf32>, i32 -> vector<32x256xf32>
    %c0_i32_198 = arith.constant 0 : i32
    %711 = vector.broadcast %c0_i32_198 : i32 to vector<1x256xi32>
    %712 = arith.cmpi sge, %0, %711 : vector<1x256xi32>
    %c256_i32_199 = arith.constant 256 : i32
    %713 = vector.broadcast %c256_i32_199 : i32 to vector<1x256xi32>
    %714 = arith.cmpi slt, %0, %713 : vector<1x256xi32>
    %715 = arith.andi %712, %714 : vector<1x256xi1>
    %c-1_i32_200 = arith.constant -1 : i32
    %716 = vector.broadcast %c-1_i32_200 : i32 to vector<1x256xi32>
    %717 = arith.cmpi sge, %1, %716 : vector<1x256xi32>
    %718 = arith.andi %715, %717 : vector<1x256xi1>
    %c15_i32_201 = arith.constant 15 : i32
    %719 = vector.broadcast %c15_i32_201 : i32 to vector<1x256xi32>
    %720 = arith.cmpi slt, %1, %719 : vector<1x256xi32>
    %721 = arith.andi %718, %720 : vector<1x256xi1>
    %722 = arith.extui %721 : vector<1x256xi1> to vector<1x256xi32>
    %723 = arith.sitofp %722 : vector<1x256xi32> to vector<1x256xf32>
    %724 = vector.broadcast %723 : vector<1x256xf32> to vector<32x256xf32>
    %725 = arith.mulf %710, %724 : vector<32x256xf32>
    %726 = arith.truncf %725 : vector<32x256xf32> to vector<32x256xbf16>
    %c241_i32_202 = arith.constant 241 : i32
    %727 = tpu.dynamic_rotate %625 by %c241_i32_202 dim 1 : vector<32x256xf32>, i32 -> vector<32x256xf32>
    %c-16_i32_203 = arith.constant -16 : i32
    %728 = vector.broadcast %c-16_i32_203 : i32 to vector<1x256xi32>
    %729 = arith.cmpi sge, %0, %728 : vector<1x256xi32>
    %c240_i32_204 = arith.constant 240 : i32
    %730 = vector.broadcast %c240_i32_204 : i32 to vector<1x256xi32>
    %731 = arith.cmpi slt, %0, %730 : vector<1x256xi32>
    %732 = arith.andi %729, %731 : vector<1x256xi1>
    %c1_i32_205 = arith.constant 1 : i32
    %733 = vector.broadcast %c1_i32_205 : i32 to vector<1x256xi32>
    %734 = arith.cmpi sge, %1, %733 : vector<1x256xi32>
    %735 = arith.andi %732, %734 : vector<1x256xi1>
    %c17_i32_206 = arith.constant 17 : i32
    %736 = vector.broadcast %c17_i32_206 : i32 to vector<1x256xi32>
    %737 = arith.cmpi slt, %1, %736 : vector<1x256xi32>
    %738 = arith.andi %735, %737 : vector<1x256xi1>
    %739 = arith.extui %738 : vector<1x256xi1> to vector<1x256xi32>
    %740 = arith.sitofp %739 : vector<1x256xi32> to vector<1x256xf32>
    %741 = vector.broadcast %740 : vector<1x256xf32> to vector<32x256xf32>
    %742 = arith.mulf %727, %741 : vector<32x256xf32>
    %743 = arith.truncf %742 : vector<32x256xf32> to vector<32x256xbf16>
    %c240_i32_207 = arith.constant 240 : i32
    %744 = tpu.dynamic_rotate %625 by %c240_i32_207 dim 1 : vector<32x256xf32>, i32 -> vector<32x256xf32>
    %c-16_i32_208 = arith.constant -16 : i32
    %745 = vector.broadcast %c-16_i32_208 : i32 to vector<1x256xi32>
    %746 = arith.cmpi sge, %0, %745 : vector<1x256xi32>
    %c240_i32_209 = arith.constant 240 : i32
    %747 = vector.broadcast %c240_i32_209 : i32 to vector<1x256xi32>
    %748 = arith.cmpi slt, %0, %747 : vector<1x256xi32>
    %749 = arith.andi %746, %748 : vector<1x256xi1>
    %c0_i32_210 = arith.constant 0 : i32
    %750 = vector.broadcast %c0_i32_210 : i32 to vector<1x256xi32>
    %751 = arith.cmpi sge, %1, %750 : vector<1x256xi32>
    %752 = arith.andi %749, %751 : vector<1x256xi1>
    %c16_i32_211 = arith.constant 16 : i32
    %753 = vector.broadcast %c16_i32_211 : i32 to vector<1x256xi32>
    %754 = arith.cmpi slt, %1, %753 : vector<1x256xi32>
    %755 = arith.andi %752, %754 : vector<1x256xi1>
    %756 = arith.extui %755 : vector<1x256xi1> to vector<1x256xi32>
    %757 = arith.sitofp %756 : vector<1x256xi32> to vector<1x256xf32>
    %758 = vector.broadcast %757 : vector<1x256xf32> to vector<32x256xf32>
    %759 = arith.mulf %744, %758 : vector<32x256xf32>
    %760 = arith.truncf %759 : vector<32x256xf32> to vector<32x256xbf16>
    %c239_i32_212 = arith.constant 239 : i32
    %761 = tpu.dynamic_rotate %625 by %c239_i32_212 dim 1 : vector<32x256xf32>, i32 -> vector<32x256xf32>
    %c-16_i32_213 = arith.constant -16 : i32
    %762 = vector.broadcast %c-16_i32_213 : i32 to vector<1x256xi32>
    %763 = arith.cmpi sge, %0, %762 : vector<1x256xi32>
    %c240_i32_214 = arith.constant 240 : i32
    %764 = vector.broadcast %c240_i32_214 : i32 to vector<1x256xi32>
    %765 = arith.cmpi slt, %0, %764 : vector<1x256xi32>
    %766 = arith.andi %763, %765 : vector<1x256xi1>
    %c-1_i32_215 = arith.constant -1 : i32
    %767 = vector.broadcast %c-1_i32_215 : i32 to vector<1x256xi32>
    %768 = arith.cmpi sge, %1, %767 : vector<1x256xi32>
    %769 = arith.andi %766, %768 : vector<1x256xi1>
    %c15_i32_216 = arith.constant 15 : i32
    %770 = vector.broadcast %c15_i32_216 : i32 to vector<1x256xi32>
    %771 = arith.cmpi slt, %1, %770 : vector<1x256xi32>
    %772 = arith.andi %769, %771 : vector<1x256xi1>
    %773 = arith.extui %772 : vector<1x256xi1> to vector<1x256xi32>
    %774 = arith.sitofp %773 : vector<1x256xi32> to vector<1x256xf32>
    %775 = vector.broadcast %774 : vector<1x256xf32> to vector<32x256xf32>
    %776 = arith.mulf %761, %775 : vector<32x256xf32>
    %777 = arith.truncf %776 : vector<32x256xf32> to vector<32x256xbf16>
    %778 = tpu.concatenate %642, %659, %676, %693, %709, %726, %743, %760, %777 in 0 : vector<32x256xbf16>, vector<32x256xbf16>, vector<32x256xbf16>, vector<32x256xbf16>, vector<32x256xbf16>, vector<32x256xbf16>, vector<32x256xbf16>, vector<32x256xbf16>, vector<32x256xbf16> -> vector<288x256xbf16>
    %c0_217 = arith.constant 0 : index
    %c0_218 = arith.constant 0 : index
    %779 = vector.load %arg15[%c0_217, %c0_218] : memref<2x288xbf16, #tpu.memory_space<vmem>>, vector<2x288xbf16>
    %cst_219 = arith.constant dense<0.000000e+00> : vector<2x256xf32>
    %780 = tpu.matmul %779, %778, %cst_219 {dimension_numbers = #tpu.dot_dimension_numbers<[1], [0], [0], [1], [0, 0, 1, 1], [], []>} : vector<2x288xbf16>, vector<288x256xbf16>, vector<2x256xf32> -> vector<2x256xf32>
    %c0_220 = arith.constant 0 : index
    %c0_221 = arith.constant 0 : index
    %781 = vector.load %arg16[%c0_220, %c0_221] : memref<2x1xf32, #tpu.memory_space<vmem>>, vector<2x1xf32>
    %782 = vector.broadcast %781 : vector<2x1xf32> to vector<2x256xf32>
    %783 = arith.addf %780, %782 : vector<2x256xf32>
    %784 = vector.extract_strided_slice %3 {offsets = [0, 0], sizes = [2, 256], strides = [1, 1]} : vector<16x256xf32> to vector<2x256xf32>
    %cst_222 = arith.constant 1.000000e+00 : f32
    %785 = vector.broadcast %cst_222 : f32 to vector<2x256xf32>
    %786 = arith.mulf %784, %785 : vector<2x256xf32>
    %787 = arith.addf %786, %783 : vector<2x256xf32>
    %c0_223 = arith.constant 0 : index
    %c0_224 = arith.constant 0 : index
    %c0_225 = arith.constant 0 : index
    %788 = vector.load %arg17[%c0_223, %c0_224, %c0_225] : memref<1x2x256xf32, #tpu.memory_space<vmem>>, vector<1x2x256xf32>
    %789 = vector.shape_cast %788 : vector<1x2x256xf32> to vector<2x256xf32>
    %790 = vector.shape_cast %787 : vector<2x256xf32> to vector<1x2x256xf32>
    tpu.vector_store %arg17[%c0_223, %c0_224, %c0_225], %790 {strides = array<i32>} : memref<1x2x256xf32, #tpu.memory_space<vmem>>, vector<1x2x256xf32>,
    %c0_226 = arith.constant 0 : index
    %c0_227 = arith.constant 0 : index
    %c0_228 = arith.constant 0 : index
    %791 = vector.load %arg18[%c0_226, %c0_227, %c0_228] : memref<1x32x256xf32, #tpu.memory_space<vmem>>, vector<1x32x256xf32>
    %792 = vector.shape_cast %791 : vector<1x32x256xf32> to vector<32x256xf32>
    %793 = vector.shape_cast %453 : vector<32x256xf32> to vector<1x32x256xf32>
    tpu.vector_store %arg18[%c0_226, %c0_227, %c0_228], %793 {strides = array<i32>} : memref<1x32x256xf32, #tpu.memory_space<vmem>>, vector<1x32x256xf32>,
    %c0_229 = arith.constant 0 : index
    %c0_230 = arith.constant 0 : index
    %c0_231 = arith.constant 0 : index
    %794 = vector.load %arg19[%c0_229, %c0_230, %c0_231] : memref<1x32x256xf32, #tpu.memory_space<vmem>>, vector<1x32x256xf32>
    %795 = vector.shape_cast %794 : vector<1x32x256xf32> to vector<32x256xf32>
    %796 = vector.shape_cast %625 : vector<32x256xf32> to vector<1x32x256xf32>
    tpu.vector_store %arg19[%c0_229, %c0_230, %c0_231], %796 {strides = array<i32>} : memref<1x32x256xf32, #tpu.memory_space<vmem>>, vector<1x32x256xf32>,
    return
  }
  func.func @transform_0(%arg0: i32) -> (i32, i32) {
    %c0_i32 = arith.constant 0 : i32
    %c0_i32_0 = arith.constant 0 : i32
    %c0_i32_1 = arith.constant 0 : i32
    return %c0_i32, %c0_i32_0 : i32, i32
  }
  func.func @transform_1(%arg0: i32) -> (i32, i32, i32) {
    %c0_i32 = arith.constant 0 : i32
    %c0_i32_0 = arith.constant 0 : i32
    %c0_i32_1 = arith.constant 0 : i32
    return %arg0, %c0_i32, %c0_i32_0 : i32, i32, i32
  }
  func.func @transform_2(%arg0: i32) -> (i32, i32, i32) {
    %c0_i32 = arith.constant 0 : i32
    %c0_i32_0 = arith.constant 0 : i32
    %c0_i32_1 = arith.constant 0 : i32
    return %arg0, %c0_i32, %c0_i32_0 : i32, i32, i32
  }
  func.func @transform_3(%arg0: i32) -> (i32, i32, i32) {
    %c0_i32 = arith.constant 0 : i32
    %c0_i32_0 = arith.constant 0 : i32
    %c0_i32_1 = arith.constant 0 : i32
    return %arg0, %c0_i32, %c0_i32_0 : i32, i32, i32
  }
  func.func @transform_4(%arg0: i32) -> (i32, i32) {
    %c0_i32 = arith.constant 0 : i32
    %c0_i32_0 = arith.constant 0 : i32
    %c0_i32_1 = arith.constant 0 : i32
    return %c0_i32, %c0_i32_0 : i32, i32
  }
  func.func @transform_5(%arg0: i32) -> (i32, i32) {
    %c0_i32 = arith.constant 0 : i32
    %c0_i32_0 = arith.constant 0 : i32
    %c0_i32_1 = arith.constant 0 : i32
    return %c0_i32, %c0_i32_0 : i32, i32
  }
  func.func @transform_6(%arg0: i32) -> (i32, i32) {
    %c0_i32 = arith.constant 0 : i32
    %c0_i32_0 = arith.constant 0 : i32
    %c0_i32_1 = arith.constant 0 : i32
    return %c0_i32, %c0_i32_0 : i32, i32
  }
  func.func @transform_7(%arg0: i32) -> (i32, i32) {
    %c0_i32 = arith.constant 0 : i32
    %c0_i32_0 = arith.constant 0 : i32
    %c0_i32_1 = arith.constant 0 : i32
    return %c0_i32, %c0_i32_0 : i32, i32
  }
  func.func @transform_8(%arg0: i32) -> (i32, i32) {
    %c0_i32 = arith.constant 0 : i32
    %c0_i32_0 = arith.constant 0 : i32
    %c0_i32_1 = arith.constant 0 : i32
    return %c0_i32, %c0_i32_0 : i32, i32
  }
  func.func @transform_9(%arg0: i32) -> (i32, i32) {
    %c0_i32 = arith.constant 0 : i32
    %c0_i32_0 = arith.constant 0 : i32
    %c0_i32_1 = arith.constant 0 : i32
    return %c0_i32, %c0_i32_0 : i32, i32
  }
  func.func @transform_10(%arg0: i32) -> (i32, i32) {
    %c0_i32 = arith.constant 0 : i32
    %c0_i32_0 = arith.constant 0 : i32
    %c0_i32_1 = arith.constant 0 : i32
    return %c0_i32, %c0_i32_0 : i32, i32
  }
  func.func @transform_11(%arg0: i32) -> (i32, i32) {
    %c0_i32 = arith.constant 0 : i32
    %c0_i32_0 = arith.constant 0 : i32
    %c0_i32_1 = arith.constant 0 : i32
    return %c0_i32, %c0_i32_0 : i32, i32
  }
  func.func @transform_12(%arg0: i32) -> (i32, i32) {
    %c0_i32 = arith.constant 0 : i32
    %c0_i32_0 = arith.constant 0 : i32
    %c0_i32_1 = arith.constant 0 : i32
    return %c0_i32, %c0_i32_0 : i32, i32
  }
  func.func @transform_13(%arg0: i32) -> (i32, i32) {
    %c0_i32 = arith.constant 0 : i32
    %c0_i32_0 = arith.constant 0 : i32
    %c0_i32_1 = arith.constant 0 : i32
    return %c0_i32, %c0_i32_0 : i32, i32
  }
  func.func @transform_14(%arg0: i32) -> (i32, i32) {
    %c0_i32 = arith.constant 0 : i32
    %c0_i32_0 = arith.constant 0 : i32
    %c0_i32_1 = arith.constant 0 : i32
    return %c0_i32, %c0_i32_0 : i32, i32
  }
  func.func @transform_15(%arg0: i32) -> (i32, i32) {
    %c0_i32 = arith.constant 0 : i32
    %c0_i32_0 = arith.constant 0 : i32
    %c0_i32_1 = arith.constant 0 : i32
    return %c0_i32, %c0_i32_0 : i32, i32
  }
  func.func @transform_16(%arg0: i32) -> (i32, i32, i32) {
    %c0_i32 = arith.constant 0 : i32
    %c0_i32_0 = arith.constant 0 : i32
    %c0_i32_1 = arith.constant 0 : i32
    return %arg0, %c0_i32, %c0_i32_0 : i32, i32, i32
  }
  func.func @transform_17(%arg0: i32) -> (i32, i32, i32) {
    %c0_i32 = arith.constant 0 : i32
    %c0_i32_0 = arith.constant 0 : i32
    %c0_i32_1 = arith.constant 0 : i32
    return %arg0, %c0_i32, %c0_i32_0 : i32, i32, i32
  }
  func.func @transform_18(%arg0: i32) -> (i32, i32, i32) {
    %c0_i32 = arith.constant 0 : i32
    %c0_i32_0 = arith.constant 0 : i32
    %c0_i32_1 = arith.constant 0 : i32
    return %arg0, %c0_i32, %c0_i32_0 : i32, i32, i32
  }
}

</mosaic_0001>

<bundles_post_ra>
// kernel: custom-call
= control target key start
LH: loop header
LB: loop body
LE: loop exit
PB: predicated region body
PF: predicated region fallthrough
CT: control target
= control target key end

     0   :  { %s6_s0 = inlined_call_operand.vmem [shape: f32[8,2,16,16,2], index: 0, kind: output, shape index: {}]  }

// kernel: closed_call.17
= control target key start
LH: loop header
LB: loop body
LE: loop exit
PB: predicated region body
PF: predicated region fallthrough
CT: control target
= control target key end

     0   :  { %s3572_s27 = smov 0   ;;  %s5732_s0 = inlined_call_operand.vmem [shape: s32[1,256], index: 0, kind: input, shape index: {}]   ;;  %s5733_s1 = inlined_call_operand.vmem [shape: f32[2,16,256], index: 1, kind: input, shape index: {}]   ;;  %s5734_s2 = inlined_call_operand.vmem [shape: f32[2,32,256], index: 2, kind: input, shape index: {}, may-alias: {2,17}]   ;;  %s5735_s3 = inlined_call_operand.vmem [shape: f32[2,32,256], index: 3, kind: input, shape index: {}, may-alias: {3,18}]   ;;  %s5736_s4 = inlined_call_operand.vmem [shape: bf16[32,400], index: 4, kind: input, shape index: {}]   ;;  %s5737_s5 = inlined_call_operand.vmem [shape: f32[32,1], index: 5, kind: input, shape index: {}]   ;;  %s5738_s6 = inlined_call_operand.vmem [shape: bf16[32,32], index: 6, kind: input, shape index: {}]   ;;  %s5739_s7 = inlined_call_operand.vmem [shape: f32[32,1], index: 7, kind: input, shape index: {}]   ;;  %s5740_s8 = inlined_call_operand.vmem [shape: f32[32,1], index: 8, kind: input, shape index: {}]   ;;  %s5741_s9 = inlined_call_operand.vmem [shape: bf16[32,288], index: 9, kind: input, shape index: {}]   ;;  %s5742_s10 = inlined_call_operand.vmem [shape: f32[32,1], index: 10, kind: input, shape index: {}]   ;;  %s5743_s11 = inlined_call_operand.vmem [shape: bf16[32,32], index: 11, kind: input, shape index: {}]   ;;  %s5744_s12 = inlined_call_operand.vmem [shape: f32[32,1], index: 12, kind: input, shape index: {}]   ;;  %s5745_s13 = inlined_call_operand.vmem [shape: f32[32,1], index: 13, kind: input, shape index: {}]   ;;  %s5746_s14 = inlined_call_operand.vmem [shape: bf16[2,288], index: 14, kind: input, shape index: {}]   ;;  %s5747_s15 = inlined_call_operand.vmem [shape: f32[2,1], index: 15, kind: input, shape index: {}]   ;;  %s5748_s16 = inlined_call_operand.vmem [shape: f32[2,2,256], index: 16, kind: output, shape index: {0}]   ;;  %s5749_s17 = inlined_call_operand.vmem [shape: f32[2,32,256], index: 17, kind: output, shape index: {1}, may-alias: {2,17}]   ;;  %s5750_s18 = inlined_call_operand.vmem [shape: f32[2,32,256], index: 18, kind: output, shape index: {2}, may-alias: {3,18}]  }
   0x1   :  { %5816 = sst [smem:[#allocation6_spill]] %s5732_s0 }
   0x2   :  { %5817 = sst [smem:[#allocation7_spill]] %s5733_s1 }
   0x3   :  { %5818 = sst [smem:[#allocation8_spill]] %s5734_s2 }
   0x4 LB: > { %s3243_s28 = sadd.s32 4294967295, %s3448_s27   ;;  %p3247_p0 = scmp.ge.s32.totalorder %s3448_s27, 1  ;;  %s3448_s27 = sphi %s3572_s27, %s29_s27  }
   0x5   : > { %p537_p1 = scmp.lt.s32.totalorder %s3448_s27, 3 }
   0x7   : > { %p538_p2 = pnand %p3247_p0, %p537_p1 }
   0x9   : > { %541 = sbr.rel (%p538_p2) target bundleno = 1960 (0x7a8), region = 84 }
  0x10   : > { %p611_p3 = scmp.lt.s32.totalorder %s3243_s28, 1  ;;  %v642_v0 = vlaneseq  ;;  %s5819_s0 = sld [smem:[#allocation6_spill]]  ;;  %v5806_v2 = vmov 0   ;;  %v5837_v37 = vmov 0  ;;  %v5841_v43 = vmov 0  ;;  %v1688_v15 = vld [vmem:[%s5737_s5 + $0x10] sm:$0xff] }
  0x11   : > { %3415 = vset.pattern.permute.xlu1 %v5806_v2  ;;  %3414 = vset.pattern.permute.xlu0 %v5806_v2  ;;  %s5820_s21 = sld [smem:[#allocation7_spill]]  ;;  %s3451_s2 = smov 34   ;;  %v5843_v44 = vmov 0  ;;  %v3466_v47 = vmov 0.0   ;;  %v5848_v54 = vmov 0  ;;  %v5850_v55 = vmov 0 }
  0x12   : > { %s6039_s28 = smov (!%p611_p3, %s3243_s28), 1  ;;  %v3592_v3 = vshrl.u32 %v642_v0, 7  ;;  %1950 = vmatprep.mubr.bf16.mxu1 %v5806_v2  ;;  %s3452_s23 = smov 33   ;;  %v3826_v40 = vand.u32 127, %v642_v0  ;;  %v3418_v56 = vld [vmem:[%s5736_s4 + $0x4] ss:$16 sps:$4 sm:$0xff]  }
  0x13   : > { %s3341_s19 = sshll.u32 %s6039_s28, 5  ;;  %s3453_s24 = smov 32   ;;  %1787 = vmatprep.mubr.bf16.mxu0 %v3418_v56  ;;  %v1689_v16 = vld [vmem:[%s5737_s5 + $0x18] sm:$0xff]  ;;  %v1971_v21 = vld [vmem:[%s5740_s8] sm:$0xff]  ;;  %v1972_v22 = vld [vmem:[%s5740_s8 + $0x8] sm:$0xff] }
  0x14   : > { %v3600_v5 = vsub.s32 0, %v3592_v3  ;;  %s3454_s25 = smov 31   ;;  %s3455_s26 = smov 30   ;;  %v3819_v39 = vsub.s32 1, %v3592_v3  ;;  %v1973_v33 = vld [vmem:[%s5740_s8 + $0x10] sm:$0xff] }
  0x15   : > { %s3456_s29 = smov 18   ;;  %s5788_s30 = smov 17  }
  0x16   : > { %v3583_v1 = vld [vmem:[%s5819_s0] sm:$0x3]  ;;  %s5786_s0 = smov 16   ;;  %s3460_s1 = smov 14  }
  0x17   : > { %vm685_vm0 = vcmp.ge.s32.totalorder %v3583_v1, 2  ;;  %vm699_vm1 = vcmp.lt.s32.totalorder %v3583_v1, 18  ;;  %s3608_s22 = scalar_lea.vmem %s5820_s21, %s3341_s19  ;;  %vm744_vm2 = vcmp.ge.s32.totalorder %v3583_v1, 1  ;;  %vm758_vm3 = vcmp.lt.s32.totalorder %v3583_v1, 17  ;;  %s5784_s19 = smov 15  }
  0x18   : > { %v3596_v4 = vsel %vm685_vm0, 1, %v5806_v2  ;;  %v3603_v6 = vsel %vm699_vm1, 1, %v5806_v2  ;;  %v3611_v7 = vld [vmem:[%s3608_s22 + $0x8] sm:$0xff]  ;;  %v3614_v8 = vld [vmem:[%s3608_s22] sm:$0xff]  ;;  %v3627_v11 = vld [vmem:[%s3608_s22 + $0x18] sm:$0xff]  ;;  %v3633_v13 = vsel %vm744_vm2, 1, %v5806_v2 }
  0x19   : > { %v690_v9 = vrot.slane %v3596_v4, %v3600_v5  ;;  %670 = vrot.lane.b32.xlu1 %v3611_v7, %s3451_s2  ;;  %666 = vrot.lane.b32.xlu0 %v3614_v8, %s3451_s2  ;;  %v704_v10 = vrot.slane %v3603_v6, %v3600_v5  ;;  %v3630_v12 = vld [vmem:[%s3608_s22 + $0x10] sm:$0xff]  ;;  %v3636_v14 = vsel %vm758_vm3, 1, %v5806_v2  ;;  %vm803_vm5 = vcmp.ge.s32.totalorder %v3583_v1, 0  ;;  %s3461_s20 = smov 2   ;;  %s5782_s21 = smov 1  }
  0x1a   : > { %vm817_vm7 = vcmp.lt.s32.totalorder %v3583_v1, 16  ;;  %v749_v17 = vrot.slane %v3633_v13, %v3600_v5  ;;  %v763_v18 = vrot.slane %v3636_v14, %v3600_v5  ;;  %v3661_v19 = vsel %vm803_vm5, 1, %v5806_v2 }
  0x1b   : > { %vm3638_vm4 = vcmp.ne.s32.totalorder %v690_v9, 0  ;;  %vm3647_vm6 = vcmp.ne.s32.totalorder %v704_v10, 0  ;;  %v3664_v20 = vsel %vm817_vm7, 1, %v5806_v2  ;;  %v808_v23 = vrot.slane %v3661_v19, %v3600_v5 }
  0x1c   : > { %vm3668_vm9 = vcmp.ne.s32.totalorder %v749_v17, 0  ;;  %vm3672_vm10 = vcmp.ne.s32.totalorder %v763_v18, 0  ;;  %v822_v24 = vrot.slane %v3664_v20, %v3600_v5  ;;  %vm862_vm11 = vcmp.ge.s32.totalorder %v3583_v1, 4294967295 }
  0x1d   : > { %672 = vrot.lane.b32.xlu1 %v3627_v11, %s3451_s2  ;;  %668 = vrot.lane.b32.xlu0 %v3630_v12, %s3451_s2  ;;  %vm876_vm12 = vcmp.lt.s32.totalorder %v3583_v1, 15  ;;  %v3689_v25 = vsel %vm862_vm11, 1, %v5806_v2  ;;  %vm3694_vm14 = vcmp.ne.s32.totalorder %v808_v23, 0  ;;  %vm921_vm1 = vcmp.ge.s32.totalorder %v3583_v1, 4294967294 }
  0x1e   : > { %v3692_v26 = vsel %vm876_vm12, 1, %v5806_v2  ;;  %vm3698_vm15 = vcmp.ne.s32.totalorder %v822_v24, 0  ;;  %v867_v29 = vrot.slane %v3689_v25, %v3600_v5  ;;  %vm935_vm2 = vcmp.lt.s32.totalorder %v3583_v1, 14 }
  0x1f   : > { %v881_v30 = vrot.slane %v3692_v26, %v3600_v5  ;;  %v3717_v31 = vsel %vm921_vm1, 1, %v5806_v2  ;;  %v3720_v32 = vsel %vm935_vm2, 1, %v5806_v2  ;;  %v694_v41 = vrot.slane %v3596_v4, %v3819_v39 }
  0x20   : > { %vm3726_vm3 = vcmp.ne.s32.totalorder %v867_v29, 0  ;;  %v926_v35 = vrot.slane %v3717_v31, %v3600_v5  ;;  %v940_v36 = vrot.slane %v3720_v32, %v3600_v5  ;;  %v708_v42 = vrot.slane %v3603_v6, %v3819_v39 }
  0x21   : > { %733 = vrot.lane.b32.xlu1 %v3630_v12, %s3452_s23  ;;  %731 = vrot.lane.b32.xlu0 %v3614_v8, %s3452_s23  ;;  %vm3730_vm5 = vcmp.ne.s32.totalorder %v881_v30, 0  ;;  %vm5751_vm2 = vcmp.ge.s32.totalorder %v3826_v40, 32  ;;  %vm3837_vm1 = vcmp.ne.s32.totalorder %v694_v41, 0  ;;  %v753_v45 = vrot.slane %v3633_v13, %v3819_v39 }
  0x22   : > { %vm3744_vm11 = vcmp.ne.s32.totalorder %v926_v35, 0  ;;  %vm3748_vm12 = vcmp.ne.s32.totalorder %v940_v36, 0  ;;  %v5842_v43 = vsel %vm3837_vm1, 4294967295, %v5841_v43  ;;  %vm3841_vm7 = vcmp.ne.s32.totalorder %v708_v42, 0  ;;  %vm697_vm0 = vmand %vm5751_vm2, %vm3638_vm4 }
  0x23   : > { %v5838_v37 = vsel %vm3744_vm11, 4294967295, %v5837_v37  ;;  %v5844_v44 = vsel %vm3841_vm7, 4294967295, %v5843_v44  ;;  %vm712_vm13 = vmand %vm3837_vm1, %vm3841_vm7  ;;  %v767_v46 = vrot.slane %v3636_v14, %v3819_v39  ;;  %vm5758_vm2 = vcmp.lt.s32.totalorder %v3826_v40, 34 }
  0x24   : > { %vm711_vm8 = vmand %vm697_vm0, %vm3647_vm6  ;;  %v3261_v48 = vsel %vm712_vm13, 1.0, %v3466_v47  ;;  %vm5845_vm0 = vcmp.ge.s32.totalorder %v3826_v40, 32  ;;  %vm3879_vm1 = vcmp.ne.s32.totalorder %v753_v45, 0  ;;  %v812_v62 = vrot.slane %v3661_v19, %v3819_v39 }
  0x25   : > { %737 = vrot.lane.b32.xlu1 %v3627_v11, %s3452_s23  ;;  %735 = vrot.lane.b32.xlu0 %v3611_v7, %s3452_s23  ;;  %s5756_s23 = smov 127   ;;  %v3260_v49 = vsel %vm711_vm8, 1.0, %v3466_v47  ;;  %vm3872_vm7 = vmand %vm5845_vm0, %vm3668_vm9  ;;  %v3877_v53 = vrot.slane %v3261_v48, %v3600_v5  ;;  %v5849_v54 = vsel %vm3879_vm1, 4294967295, %v5848_v54  ;;  %vm3883_vm13 = vcmp.ne.s32.totalorder %v767_v46, 0 }
  0x26   : > { %v5851_v55 = vsel %vm3883_vm13, 4294967295, %v5850_v55  ;;  %v3895_v58 = vrot.slane %v3260_v49, %v3600_v5  ;;  %vm770_vm8 = vmand %vm3872_vm7, %vm3672_vm10  ;;  %v826_v4 = vrot.slane %v3664_v20, %v3819_v39  ;;  %v5855_v24 = vmov 0 }
  0x27   : > { %vm771_vm0 = vmand %vm3879_vm1, %vm3883_vm13  ;;  %v3262_v13 = vsel %vm770_vm8, 1.0, %v3466_v47  ;;  %vm3938_vm1 = vcmp.ne.s32.totalorder %v812_v62, 0  ;;  %v5857_v29 = vmov 0  ;;  %vm739_vm8 = vcmp.lt.s32.totalorder %v3826_v40, 33 }
  0x28   : > { %v3263_v14 = vsel %vm771_vm0, 1.0, %v3466_v47  ;;  %v5856_v24 = vsel %vm3938_vm1, 4294967295, %v5855_v24  ;;  %vm3942_vm7 = vcmp.ne.s32.totalorder %v826_v4, 0  ;;  %v779_v30 = vrot.slane %v3262_v13, %v3600_v5 }
  0x29   : > { %792 = vrot.lane.b32.xlu1 %v3630_v12, %s3453_s24  ;;  %790 = vrot.lane.b32.xlu0 %v3614_v8, %s3453_s24  ;;  %v5858_v29 = vsel %vm3942_vm7, 4294967295, %v5857_v29  ;;  %v3953_v35 = vrot.slane %v3263_v14, %v3600_v5  ;;  %vm830_vm0 = vmand %vm3938_vm1, %vm3942_vm7  ;;  %v871_v42 = vrot.slane %v3689_v25, %v3819_v39  ;;  %v885_v45 = vrot.slane %v3692_v26, %v3819_v39 }
  0x2a   : > { %v3265_v26 = vsel %vm830_vm0, 1.0, %v3466_v47  ;;  %v930_v13 = vrot.slane %v3717_v31, %v3819_v39  ;;  %v944_v14 = vrot.slane %v3720_v32, %v3819_v39 }
  0x2b   : > { %vm3988_vm1 = vcmp.ne.s32.totalorder %v871_v42, 0 }
  0x2d   : > { %796 = vrot.lane.b32.xlu1 %v3627_v11, %s3453_s24  ;;  %794 = vrot.lane.b32.xlu0 %v3611_v7, %s3453_s24 }
  0x31   : > { %851 = vrot.lane.b32.xlu1 %v3630_v12, %s3454_s25  ;;  %849 = vrot.lane.b32.xlu0 %v3614_v8, %s3454_s25 }
  0x35   : > { %855 = vrot.lane.b32.xlu1 %v3627_v11, %s3454_s25  ;;  %853 = vrot.lane.b32.xlu0 %v3611_v7, %s3454_s25  ;;  %s5796_s25 = smov 126  }
  0x39   : > { %910 = vrot.lane.b32.xlu1 %v3630_v12, %s3455_s26  ;;  %908 = vrot.lane.b32.xlu0 %v3614_v8, %s3455_s26 }
  0x3d   : > { %914 = vrot.lane.b32.xlu1 %v3627_v11, %s3455_s26  ;;  %912 = vrot.lane.b32.xlu0 %v3611_v7, %s3455_s26 }
  0x41   : > { %969 = vrot.lane.b32.xlu1 %v3630_v12, %s3456_s29  ;;  %967 = vrot.lane.b32.xlu0 %v3614_v8, %s3456_s29 }
  0x45   : > { %973 = vrot.lane.b32.xlu1 %v3627_v11, %s3456_s29  ;;  %971 = vrot.lane.b32.xlu0 %v3611_v7, %s3456_s29  ;;  %s3465_s29 = smov 114  }
  0x49   : > { %1010 = vrot.lane.b32.xlu1 %v3630_v12, %s5788_s30  ;;  %1008 = vrot.lane.b32.xlu0 %v3614_v8, %s5788_s30 }
  0x4d   : > { %1014 = vrot.lane.b32.xlu1 %v3627_v11, %s5788_s30  ;;  %1012 = vrot.lane.b32.xlu0 %v3611_v7, %s5788_s30  ;;  %s5971_s30 = smov 127  }
  0x51   : > { %1045 = vrot.lane.b32.xlu1 %v3630_v12, %s5786_s0  ;;  %1043 = vrot.lane.b32.xlu0 %v3614_v8, %s5786_s0 }
  0x55   : > { %1049 = vrot.lane.b32.xlu1 %v3627_v11, %s5786_s0  ;;  %1047 = vrot.lane.b32.xlu0 %v3611_v7, %s5786_s0 }
  0x59   : > { %1080 = vrot.lane.b32.xlu1 %v3630_v12, %s5784_s19  ;;  %1078 = vrot.lane.b32.xlu0 %v3614_v8, %s5784_s19 }
  0x5d   : > { %1084 = vrot.lane.b32.xlu1 %v3627_v11, %s5784_s19  ;;  %1082 = vrot.lane.b32.xlu0 %v3611_v7, %s5784_s19  ;;  %s4682_s19 = sshll.u32 %s6039_s28, 6 }
  0x5e   : > { %s4692_s0 = scalar_lea.vmem %s5749_s17, %s4682_s19 }
  0x61   : > { %1115 = vrot.lane.b32.xlu1 %v3630_v12, %s3460_s1  ;;  %1113 = vrot.lane.b32.xlu0 %v3614_v8, %s3460_s1 }
  0x65   : > { %1119 = vrot.lane.b32.xlu1 %v3627_v11, %s3460_s1  ;;  %1117 = vrot.lane.b32.xlu0 %v3611_v7, %s3460_s1  ;;  %s5774_s1 = smov 111  }
  0x69   : > { %1150 = vrot.lane.b32.xlu1 %v3630_v12, %s3461_s20  ;;  %1148 = vrot.lane.b32.xlu0 %v3614_v8, %s3461_s20 }
  0x6d   : > { %1154 = vrot.lane.b32.xlu1 %v3627_v11, %s3461_s20  ;;  %1152 = vrot.lane.b32.xlu0 %v3611_v7, %s3461_s20 }
  0x71   : > { %1191 = vrot.lane.b32.xlu1 %v3630_v12, %s5782_s21  ;;  %1189 = vrot.lane.b32.xlu0 %v3614_v8, %s5782_s21 }
  0x75   : > { %1195 = vrot.lane.b32.xlu1 %v3627_v11, %s5782_s21  ;;  %1193 = vrot.lane.b32.xlu0 %v3611_v7, %s5782_s21  ;;  %s5922_s21 = smov 126  }
  0x79   : > { %1248 = vrot.lane.b32.xlu1 %v3630_v12, %s5756_s23  ;;  %1246 = vrot.lane.b32.xlu0 %v3614_v8, %s5756_s23 }
  0x7d   : > { %1252 = vrot.lane.b32.xlu1 %v3627_v11, %s5756_s23  ;;  %1250 = vrot.lane.b32.xlu0 %v3611_v7, %s5756_s23  ;;  %s5779_s23 = smov 113  }
  0x81   : > { %1283 = vrot.lane.b32.xlu1 %v3630_v12, %s5796_s25  ;;  %1281 = vrot.lane.b32.xlu0 %v3614_v8, %s5796_s25 }
  0x85   : > { %1287 = vrot.lane.b32.xlu1 %v3627_v11, %s5796_s25  ;;  %1285 = vrot.lane.b32.xlu0 %v3611_v7, %s5796_s25  ;;  %s5925_s25 = smov 94  }
  0x89   : > { %1318 = vrot.lane.b32.xlu1 %v3630_v12, %s3465_s29  ;;  %1316 = vrot.lane.b32.xlu0 %v3614_v8, %s3465_s29 }
  0x8b   : > { %v671_v50 = vpop.permute.xlu1 %670  ;;  %v667_v51 = vpop.permute.xlu0 %666 }
  0x8c   : > { %v675_v57 = vsel %vm5758_vm2, %v667_v51, %v671_v50  ;;  %v677_v59 = vsel %vm5758_vm2, %v671_v50, %v667_v51 }
  0x8d   : > { %1322 = vrot.lane.b32.xlu1 %v3627_v11, %s3465_s29  ;;  %1320 = vrot.lane.b32.xlu0 %v3611_v7, %s3465_s29  ;;  %v726_v1 = vmul.f32 %v3877_v53, %v675_v57  ;;  %v725_v9 = vmul.f32 %v3895_v58, %v677_v59  ;;  %s5776_s29 = smov 112  }
  0x8f   : > { %v673_v60 = vpop.permute.xlu1 %672  ;;  %v669_v61 = vpop.permute.xlu0 %668 }
  0x90   : > { %v678_v63 = vsel %vm5758_vm2, %v673_v60, %v669_v61  ;;  %v676_v0 = vsel %vm5758_vm2, %v669_v61, %v673_v60  ;;  %vm5852_vm2 = vcmp.ge.s32.totalorder %v3826_v40, 32 }
  0x91   : > { %1359 = vrot.lane.b32.xlu1 %v3630_v12, %s5779_s23  ;;  %1357 = vrot.lane.b32.xlu0 %v3614_v8, %s5779_s23  ;;  %v728_v6 = vmul.f32 %v3877_v53, %v676_v0  ;;  %v727_v10 = vmul.f32 %v3895_v58, %v678_v63  ;;  %vm3934_vm13 = vmand %vm5852_vm2, %vm3694_vm14  ;;  %v5862_v0 = vmov 0 }
  0x92   : > { %vm829_vm2 = vmand %vm3934_vm13, %vm3698_vm15  ;;  %v5863_v0 = vsel %vm3988_vm1, 4294967295, %v5862_v0  ;;  %vm3992_vm13 = vcmp.ne.s32.totalorder %v885_v45, 0 }
  0x93   : > { %v734_v17 = vpop.permute.xlu1 %733  ;;  %v732_v18 = vpop.permute.xlu0 %731  ;;  %v730_v19 = vpack.c.bf16 %v728_v6, %v726_v1  ;;  %v729_v20 = vpack.c.bf16 %v727_v10, %v725_v9  ;;  %v3264_v25 = vsel %vm829_vm2, 1.0, %v3466_v47  ;;  %v5864_v1 = vmov 0 }
  0x94   : > { %v5865_v1 = vsel %vm3992_vm13, 4294967295, %v5864_v1  ;;  %vm5767_vm2 = vcmp.lt.s32.totalorder %v3826_v40, 32  ;;  %v4000_v4 = vrot.slane %v3264_v25, %v3600_v5  ;;  %v4003_v6 = vrot.slane %v3265_v26, %v3600_v5 }
  0x95   : > { %1363 = vrot.lane.b32.xlu1 %v3627_v11, %s5779_s23  ;;  %1361 = vrot.lane.b32.xlu0 %v3611_v7, %s5779_s23  ;;  %s3474_s23 = smov 95  }
  0x96   : > { %1755 = vmatprep.subr.bf16.mxu0 %v730_v19 }
  0x97   : > { %1756 = vmatpush1.bf16.msra.mxu0 %v729_v20  ;;  %v738_v36 = vpop.permute.xlu1 %737  ;;  %v736_v41 = vpop.permute.xlu0 %735 }
  0x98   : > { %v741_v46 = vsel %vm739_vm8, %v734_v17, %v738_v36  ;;  %v743_v48 = vsel %vm739_vm8, %v738_v36, %v734_v17  ;;  %v740_v49 = vsel %vm739_vm8, %v732_v18, %v736_v41  ;;  %v742_v50 = vsel %vm739_vm8, %v736_v41, %v732_v18 }
  0x99   : > { %v786_v51 = vmul.f32 %v779_v30, %v743_v48  ;;  %v787_v52 = vmul.f32 %v3953_v35, %v741_v46  ;;  %v784_v56 = vmul.f32 %v779_v30, %v742_v50  ;;  %v785_v57 = vmul.f32 %v3953_v35, %v740_v49  ;;  %1394 = vrot.lane.b32.xlu1 %v3630_v12, %s5776_s29 }
  0x9a   : > { %1392 = vrot.lane.b32.xlu0 %v3614_v8, %s5776_s29  ;;  %vm5859_vm8 = vcmp.ge.s32.totalorder %v3826_v40, 32 }
  0x9b   : > { %v793_v59 = vpop.permute.xlu1 %792  ;;  %v791_v60 = vpop.permute.xlu0 %790  ;;  %v789_v61 = vpack.c.bf16 %v787_v52, %v785_v57  ;;  %v788_v62 = vpack.c.bf16 %v786_v51, %v784_v56  ;;  %vm3984_vm7 = vmand %vm5859_vm8, %vm3726_vm3 }
  0x9c   : > { %vm888_vm0 = vmand %vm3984_vm7, %vm3730_vm5  ;;  %vm4054_vm7 = vcmp.ne.s32.totalorder %v944_v14, 0 }
  0x9d   : > { %1398 = vrot.lane.b32.xlu1 %v3627_v11, %s5776_s29  ;;  %1757 = vmatprep.subr.bf16.mxu0 %v789_v61  ;;  %vm889_vm8 = vmand %vm3988_vm1, %vm3992_vm13  ;;  %v3266_v39 = vsel %vm888_vm0, 1.0, %v3466_v47  ;;  %vm4050_vm1 = vcmp.ne.s32.totalorder %v930_v13, 0  ;;  %vm857_vm0 = vcmp.lt.s32.totalorder %v3826_v40, 31 }
  0x9e   : > { %1396 = vrot.lane.b32.xlu0 %v3611_v7, %s5776_s29  ;;  %1758 = vmatpush1.bf16.msra.mxu0 %v788_v62  ;;  %v3267_v36 = vsel %vm889_vm8, 1.0, %v3466_v47  ;;  %v897_v51 = vrot.slane %v3266_v39, %v3600_v5  ;;  %vm980_vm8 = vcmp.ge.s32.totalorder %v3826_v40, 16  ;;  %s3472_s29 = smov 97  }
  0x9f   : > { %v797_v9 = vpop.permute.xlu1 %796  ;;  %v795_v10 = vpop.permute.xlu0 %794  ;;  %v4063_v52 = vrot.slane %v3267_v36, %v3600_v5 }
  0xa0   : > { %v800_v17 = vsel %vm5767_vm2, %v793_v59, %v797_v9  ;;  %v802_v18 = vsel %vm5767_vm2, %v797_v9, %v793_v59  ;;  %v799_v19 = vsel %vm5767_vm2, %v791_v60, %v795_v10  ;;  %v801_v20 = vsel %vm5767_vm2, %v795_v10, %v791_v60 }
  0xa1   : > { %v845_v23 = vmul.f32 %v4000_v4, %v802_v18  ;;  %v846_v30 = vmul.f32 %v4003_v6, %v800_v17  ;;  %v843_v31 = vmul.f32 %v4000_v4, %v801_v20  ;;  %v844_v32 = vmul.f32 %v4003_v6, %v799_v19  ;;  %1429 = vrot.lane.b32.xlu1 %v3630_v12, %s5774_s1 }
  0xa2   : > { %1427 = vrot.lane.b32.xlu0 %v3614_v8, %s5774_s1  ;;  %vm5866_vm2 = vcmp.ge.s32.totalorder %v3826_v40, 32 }
  0xa3   : > { %v852_v41 = vpop.permute.xlu1 %851  ;;  %v850_v42 = vpop.permute.xlu0 %849  ;;  %v848_v45 = vpack.c.bf16 %v846_v30, %v844_v32  ;;  %v847_v46 = vpack.c.bf16 %v845_v23, %v843_v31  ;;  %vm4046_vm13 = vmand %vm5866_vm2, %vm3744_vm11 }
  0xa4   : > { %vm947_vm2 = vmand %vm4046_vm13, %vm3748_vm12  ;;  %vm5805_vm13 = vcmp.lt.s32.totalorder %v3826_v40, 30 }
  0xa5   : > { %1433 = vrot.lane.b32.xlu1 %v3627_v11, %s5774_s1  ;;  %1759 = vmatprep.subr.bf16.mxu0 %v848_v45  ;;  %vm948_vm11 = vmand %vm4050_vm1, %vm4054_vm7  ;;  %v3268_v10 = vsel %vm947_vm2, 1.0, %v3466_v47 }
  0xa6   : > { %1431 = vrot.lane.b32.xlu0 %v3611_v7, %s5774_s1  ;;  %1760 = vmatpush1.bf16.msra.mxu0 %v847_v46  ;;  %s3470_s1 = smov 110   ;;  %v3269_v13 = vsel %vm948_vm11, 1.0, %v3466_v47  ;;  %v4098_v23 = vrot.slane %v3268_v10, %v3600_v5  ;;  %vm4129_vm2 = vmand %vm980_vm8, %vm3668_vm9 }
  0xa7   : > { %v856_v56 = vpop.permute.xlu1 %855  ;;  %v854_v57 = vpop.permute.xlu0 %853  ;;  %v4101_v30 = vrot.slane %v3269_v13, %v3600_v5 }
  0xa8   : > { %v859_v25 = vsel %vm857_vm0, %v852_v41, %v856_v56  ;;  %v861_v26 = vsel %vm857_vm0, %v856_v56, %v852_v41  ;;  %v858_v59 = vsel %vm857_vm0, %v850_v42, %v854_v57  ;;  %v860_v60 = vsel %vm857_vm0, %v854_v57, %v850_v42  ;;  %vm4091_vm0 = vmand %vm980_vm8, %vm3638_vm4 }
  0xa9   : > { %v904_v61 = vmul.f32 %v897_v51, %v861_v26  ;;  %v905_v62 = vmul.f32 %v4063_v52, %v859_v25  ;;  %v902_v63 = vmul.f32 %v897_v51, %v860_v60  ;;  %v903_v9 = vmul.f32 %v4063_v52, %v858_v59  ;;  %1464 = vrot.lane.b32.xlu1 %v3630_v12, %s3470_s1  ;;  %vm988_vm11 = vmand %vm4091_vm0, %vm3647_vm6 }
  0xaa   : > { %1462 = vrot.lane.b32.xlu0 %v3614_v8, %s3470_s1  ;;  %v3270_v56 = vsel %vm988_vm11, 1.0, %v3466_v47  ;;  %vm975_vm0 = vcmp.lt.s32.totalorder %v3826_v40, 18  ;;  %vm1023_vm11 = vmand %vm4129_vm2, %vm3672_vm10 }
  0xab   : > { %v911_v14 = vpop.permute.xlu1 %910  ;;  %v909_v17 = vpop.permute.xlu0 %908  ;;  %v907_v18 = vpack.c.bf16 %v905_v62, %v903_v9  ;;  %v906_v19 = vpack.c.bf16 %v904_v61, %v902_v63  ;;  %v997_v61 = vrot.slane %v3270_v56, %v3600_v5  ;;  %vm4152_vm2 = vmand %vm980_vm8, %vm3694_vm14 }
  0xad   : > { %1468 = vrot.lane.b32.xlu1 %v3627_v11, %s3470_s1  ;;  %1761 = vmatprep.subr.bf16.mxu0 %v907_v18 }
  0xae   : > { %1466 = vrot.lane.b32.xlu0 %v3611_v7, %s3470_s1  ;;  %1762 = vmatpush1.bf16.msra.mxu0 %v906_v19  ;;  %s5794_s1 = smov 98  }
  0xaf   : > { %v915_v31 = vpop.permute.xlu1 %914  ;;  %v913_v32 = vpop.permute.xlu0 %912 }
  0xb0   : > { %v918_v39 = vsel %vm5805_vm13, %v911_v14, %v915_v31  ;;  %v920_v36 = vsel %vm5805_vm13, %v915_v31, %v911_v14  ;;  %v917_v41 = vsel %vm5805_vm13, %v909_v17, %v913_v32  ;;  %v919_v42 = vsel %vm5805_vm13, %v913_v32, %v909_v17 }
  0xb1   : > { %v963_v45 = vmul.f32 %v4098_v23, %v920_v36  ;;  %v964_v46 = vmul.f32 %v4101_v30, %v918_v39  ;;  %v961_v48 = vmul.f32 %v4098_v23, %v919_v42  ;;  %v962_v51 = vmul.f32 %v4101_v30, %v917_v41  ;;  %1499 = vrot.lane.b32.xlu1 %v3630_v12, %s5794_s1 }
  0xb2   : > { %1497 = vrot.lane.b32.xlu0 %v3614_v8, %s5794_s1  ;;  %v3272_v31 = vsel %vm1023_vm11, 1.0, %v3466_v47  ;;  %vm1058_vm11 = vmand %vm4152_vm2, %vm3698_vm15 }
  0xb3   : > { %v970_v57 = vpop.permute.xlu1 %969  ;;  %v968_v25 = vpop.permute.xlu0 %967  ;;  %v966_v26 = vpack.c.bf16 %v964_v46, %v962_v51  ;;  %v965_v59 = vpack.c.bf16 %v963_v45, %v961_v48  ;;  %v4157_v45 = vrot.slane %v3272_v31, %v3600_v5  ;;  %vm4187_vm2 = vmand %vm980_vm8, %vm3726_vm3 }
  0xb5   : > { %1503 = vrot.lane.b32.xlu1 %v3627_v11, %s5794_s1  ;;  %1763 = vmatprep.subr.bf16.mxu0 %v966_v26 }
  0xb6   : > { %1501 = vrot.lane.b32.xlu0 %v3611_v7, %s5794_s1  ;;  %1764 = vmatpush1.bf16.msra.mxu0 %v965_v59  ;;  %s5921_s1 = sld [smem:[#allocation8_spill]] }
  0xb7   : > { %v974_v62 = vpop.permute.xlu1 %973  ;;  %v972_v63 = vpop.permute.xlu0 %971 }
  0xb8   : > { %v977_v9 = vsel %vm975_vm0, %v970_v57, %v974_v62  ;;  %v979_v10 = vsel %vm975_vm0, %v974_v62, %v970_v57  ;;  %v976_v13 = vsel %vm975_vm0, %v968_v25, %v972_v63  ;;  %v978_v14 = vsel %vm975_vm0, %v972_v63, %v968_v25 }
  0xb9   : > { %v1004_v17 = vmul.f32 %v997_v61, %v979_v10  ;;  %v1005_v18 = vmul.f32 %v977_v9, %v3877_v53  ;;  %v1002_v19 = vmul.f32 %v997_v61, %v978_v14  ;;  %v1003_v20 = vmul.f32 %v976_v13, %v3877_v53  ;;  %1540 = vrot.lane.b32.xlu1 %v3630_v12, %s3472_s29 }
  0xba   : > { %1538 = vrot.lane.b32.xlu0 %v3614_v8, %s3472_s29  ;;  %vm5778_vm0 = vcmp.lt.s32.totalorder %v3826_v40, 17  ;;  %v3274_v62 = vsel %vm1058_vm11, 1.0, %v3466_v47  ;;  %vm1093_vm11 = vmand %vm4187_vm2, %vm3730_vm5  ;;  %vm5881_vm2 = vnez %v5838_v37 }
  0xbb   : > { %v1011_v32 = vpop.permute.xlu1 %1010  ;;  %v1009_v39 = vpop.permute.xlu0 %1008  ;;  %v1007_v36 = vpack.c.bf16 %v1005_v18, %v1003_v20  ;;  %v1006_v41 = vpack.c.bf16 %v1004_v17, %v1002_v19  ;;  %v4195_v17 = vrot.slane %v3274_v62, %v3600_v5 }
  0xbd   : > { %1544 = vrot.lane.b32.xlu1 %v3627_v11, %s3472_s29  ;;  %1765 = vmatprep.subr.bf16.mxu0 %v1007_v36 }
  0xbe   : > { %1542 = vrot.lane.b32.xlu0 %v3611_v7, %s3472_s29  ;;  %1766 = vmatpush1.bf16.msra.mxu0 %v1006_v41  ;;  %s5792_s29 = smov 96  }
  0xbf   : > { %v1015_v46 = vpop.permute.xlu1 %1014  ;;  %v1013_v48 = vpop.permute.xlu0 %1012 }
  0xc0   : > { %v1018_v51 = vsel %vm5778_vm0, %v1011_v32, %v1015_v46  ;;  %v1020_v56 = vsel %vm5778_vm0, %v1015_v46, %v1011_v32  ;;  %v1017_v57 = vsel %vm5778_vm0, %v1009_v39, %v1013_v48  ;;  %v1019_v25 = vsel %vm5778_vm0, %v1013_v48, %v1009_v39 }
  0xc1   : > { %v1039_v26 = vmul.f32 %v4157_v45, %v1020_v56  ;;  %v1040_v59 = vmul.f32 %v1018_v51, %v3953_v35  ;;  %v1037_v60 = vmul.f32 %v4157_v45, %v1019_v25  ;;  %v1038_v61 = vmul.f32 %v1017_v57, %v3953_v35  ;;  %1575 = vrot.lane.b32.xlu1 %v3630_v12, %s5792_s29 }
  0xc2   : > { %1573 = vrot.lane.b32.xlu0 %v3614_v8, %s5792_s29  ;;  %vm5781_vm0 = vcmp.lt.s32.totalorder %v3826_v40, 16  ;;  %v3276_v48 = vsel %vm1093_vm11, 1.0, %v3466_v47  ;;  %vm5801_vm11 = vcmp.lt.s32.totalorder %v3826_v40, 15 }
  0xc3   : > { %v1046_v63 = vpop.permute.xlu1 %1045  ;;  %v1044_v9 = vpop.permute.xlu0 %1043  ;;  %v1042_v10 = vpack.c.bf16 %v1040_v59, %v1038_v61  ;;  %v1041_v13 = vpack.c.bf16 %v1039_v26, %v1037_v60  ;;  %v4227_v59 = vrot.slane %v3276_v48, %v3600_v5 }
  0xc5   : > { %1579 = vrot.lane.b32.xlu1 %v3627_v11, %s5792_s29  ;;  %1767 = vmatprep.subr.bf16.mxu0 %v1042_v10 }
  0xc6   : > { %1577 = vrot.lane.b32.xlu0 %v3611_v7, %s5792_s29  ;;  %1768 = vmatpush1.bf16.msra.mxu0 %v1041_v13  ;;  %s620_s29 = scalar_lea.vmem %s5921_s1, %s4682_s19  ;;  %s5968_s1 = smov 16  }
  0xc7   : > { %v1050_v18 = vpop.permute.xlu1 %1049  ;;  %v1048_v19 = vpop.permute.xlu0 %1047 }
  0xc8   : > { %v1053_v20 = vsel %vm5781_vm0, %v1046_v63, %v1050_v18  ;;  %v1055_v31 = vsel %vm5781_vm0, %v1050_v18, %v1046_v63  ;;  %v1052_v32 = vsel %vm5781_vm0, %v1044_v9, %v1048_v19  ;;  %v1054_v39 = vsel %vm5781_vm0, %v1048_v19, %v1044_v9  ;;  %vm4222_vm0 = vmand %vm980_vm8, %vm5881_vm2 }
  0xc9   : > { %v1074_v36 = vmul.f32 %v4195_v17, %v1055_v31  ;;  %v1075_v41 = vmul.f32 %v1053_v20, %v4003_v6  ;;  %v1072_v42 = vmul.f32 %v4195_v17, %v1054_v39  ;;  %v1073_v46 = vmul.f32 %v1052_v32, %v4003_v6  ;;  %1610 = vrot.lane.b32.xlu1 %v3630_v12, %s3474_s23  ;;  %vm1128_vm8 = vmand %vm4222_vm0, %vm3748_vm12 }
  0xca   : > { %1608 = vrot.lane.b32.xlu0 %v3614_v8, %s3474_s23  ;;  %v3278_v20 = vsel %vm1128_vm8, 1.0, %v3466_v47  ;;  %vm1121_vm0 = vcmp.lt.s32.totalorder %v3826_v40, 14  ;;  %vm5884_vm8 = vmand %vm3638_vm4, %vm3647_vm6  ;;  %vm5803_vm4 = vcmp.lt.s32.totalorder %v3826_v40, 2 }
  0xcb   : > { %v1081_v51 = vpop.permute.xlu1 %1080  ;;  %v1079_v56 = vpop.permute.xlu0 %1078  ;;  %v1077_v57 = vpack.c.bf16 %v1075_v41, %v1073_v46  ;;  %v1076_v25 = vpack.c.bf16 %v1074_v36, %v1072_v42  ;;  %v1137_v41 = vrot.slane %v3278_v20, %v3600_v5  ;;  %vm5885_vm6 = vmand %vm3668_vm9, %vm3672_vm10  ;;  %vm5799_vm9 = vcmp.lt.s32.totalorder %v3826_v40, 1 }
  0xcc   : > { %vm5887_vm10 = vmand %vm3726_vm3, %vm3730_vm5  ;;  %vm5890_vm5 = vnez %v5842_v43 }
  0xcd   : > { %1614 = vrot.lane.b32.xlu1 %v3627_v11, %s3474_s23  ;;  %1769 = vmatprep.subr.bf16.mxu0 %v1077_v57  ;;  %vm5889_vm3 = vmand %vm5881_vm2, %vm3748_vm12  ;;  %vm5802_vm12 = vcmp.lt.s32.totalorder %v3826_v40, 126  ;;  %vm5893_vm2 = vnez %v5844_v44 }
  0xce   : > { %1612 = vrot.lane.b32.xlu0 %v3611_v7, %s3474_s23  ;;  %1770 = vmatpush1.bf16.msra.mxu0 %v1076_v25  ;;  %s5790_s23 = smov 94  }
  0xcf   : > { %v1085_v60 = vpop.permute.xlu1 %1084  ;;  %v1083_v61 = vpop.permute.xlu0 %1082 }
  0xd0   : > { %v1088_v62 = vsel %vm5801_vm11, %v1081_v51, %v1085_v60  ;;  %v1090_v63 = vsel %vm5801_vm11, %v1085_v60, %v1081_v51  ;;  %v1087_v9 = vsel %vm5801_vm11, %v1079_v56, %v1083_v61  ;;  %v1089_v10 = vsel %vm5801_vm11, %v1083_v61, %v1079_v56 }
  0xd1   : > { %v1109_v13 = vmul.f32 %v4227_v59, %v1090_v63  ;;  %v1110_v14 = vmul.f32 %v1088_v62, %v4063_v52  ;;  %v1107_v18 = vmul.f32 %v4227_v59, %v1089_v10  ;;  %v1108_v19 = vmul.f32 %v1087_v9, %v4063_v52  ;;  %1645 = vrot.lane.b32.xlu1 %v3630_v12, %s5790_s23  ;;  %v1687_v63 = vld [vmem:[%s5737_s5 + $0x8] sm:$0xff]  ;;  %v1686_v9 = vld [vmem:[%s5737_s5] sm:$0xff] }
  0xd2   : > { %1643 = vrot.lane.b32.xlu0 %v3614_v8, %s5790_s23  ;;  %v3280_v62 = vsel %vm5884_vm8, 1.0, %v3466_v47  ;;  %vm5804_vm11 = vcmp.lt.s32.totalorder %v3826_v40, 112 }
  0xd3   : > { %v1116_v31 = vpop.permute.xlu1 %1115  ;;  %v1114_v32 = vpop.permute.xlu0 %1113  ;;  %v1112_v39 = vpack.c.bf16 %v1110_v14, %v1108_v19  ;;  %v1111_v36 = vpack.c.bf16 %v1109_v13, %v1107_v18  ;;  %v4280_v19 = vrot.slane %v3280_v62, %v3600_v5 }
  0xd5   : > { %1649 = vrot.lane.b32.xlu1 %v3627_v11, %s5790_s23  ;;  %1771 = vmatprep.subr.bf16.mxu0 %v1112_v39 }
  0xd6   : > { %1647 = vrot.lane.b32.xlu0 %v3611_v7, %s5790_s23  ;;  %1772 = vmatpush1.bf16.msra.mxu0 %v1111_v36  ;;  %s5970_s23 = smov 1  }
  0xd7   : > { %v1120_v42 = vpop.permute.xlu1 %1119  ;;  %v1118_v46 = vpop.permute.xlu0 %1117 }
  0xd8   : > { %v1123_v48 = vsel %vm1121_vm0, %v1116_v31, %v1120_v42  ;;  %v1125_v51 = vsel %vm1121_vm0, %v1120_v42, %v1116_v31  ;;  %v1122_v56 = vsel %vm1121_vm0, %v1114_v32, %v1118_v46  ;;  %v1124_v57 = vsel %vm1121_vm0, %v1118_v46, %v1114_v32  ;;  %v1877_v42 = vld [vmem:[%s5739_s7] sm:$0xff]  ;;  %v1878_v46 = vld [vmem:[%s5739_s7 + $0x8] sm:$0xff]  ;;  %vm5886_vm0 = vmand %vm3694_vm14, %vm3698_vm15 }
  0xd9   : > { %v1144_v25 = vmul.f32 %v1137_v41, %v1125_v51  ;;  %v1145_v26 = vmul.f32 %v1123_v48, %v4101_v30  ;;  %v1142_v60 = vmul.f32 %v1137_v41, %v1124_v57  ;;  %v1143_v61 = vmul.f32 %v1122_v56, %v4101_v30  ;;  %1697 = vperm.xlu1 %3415, %v1687_v63  }
  0xda   : > { %1692 = vperm.xlu0 %3414, %v1686_v9   ;;  %vm5798_vm14 = vcmp.lt.s32.totalorder %v3826_v40, 127 }
  0xdb   : > { %v1151_v10 = vpop.permute.xlu1 %1150  ;;  %v1149_v13 = vpop.permute.xlu0 %1148  ;;  %v1147_v14 = vpack.c.bf16 %v1145_v26, %v1143_v61  ;;  %v1146_v18 = vpack.c.bf16 %v1144_v25, %v1142_v60  ;;  %v3282_v25 = vsel %vm5885_vm6, 1.0, %v3466_v47  ;;  %v3284_v26 = vsel %vm5886_vm0, 1.0, %v3466_v47 }
  0xdc   : > { %v4320_v27 = vrot.slane %v3282_v25, %v3600_v5  ;;  %v4324_v28 = vrot.slane %v3284_v26, %v3600_v5  ;;  %v4359_v26 = vadd.s32 128, %v3826_v40  ;;  %vm5894_vm0 = vnez %v5849_v54 }
  0xdd   : > { %1773 = vmatprep.subr.bf16.mxu0 %v1147_v14  ;;  %1702 = vperm.xlu1 %3415, %v1688_v15   ;;  %v1243_v14 = vmul.f32 %v4003_v6, %v3627_v11  ;;  %v1880_v11 = vld [vmem:[%s5739_s7 + $0x18] sm:$0xff] }
  0xde   : > { %1774 = vmatpush1.bf16.msra.mxu0 %v1146_v18  ;;  %1707 = vperm.xlu0 %3414, %v1689_v16   ;;  %vm1332_vm15 = vcmp.lt.s32.totalorder %v4359_v26, 240  ;;  %vm1513_vm13 = vcmp.lt.s32.totalorder %v4359_v26, 224 }
  0xdf   : > { %v1155_v20 = vpop.permute.xlu1 %1154  ;;  %v1153_v31 = vpop.permute.xlu0 %1152  ;;  %vm4394_vm8 = vmand %vm1332_vm15, %vm5890_vm5 }
  0xe0   : > { %v1158_v32 = vsel %vm5803_vm4, %v1151_v10, %v1155_v20  ;;  %v1160_v39 = vsel %vm5803_vm4, %v1155_v20, %v1151_v10  ;;  %v1157_v36 = vsel %vm5803_vm4, %v1149_v13, %v1153_v31  ;;  %v1159_v41 = vsel %vm5803_vm4, %v1153_v31, %v1149_v13  ;;  %vm1338_vm6 = vmand %vm4394_vm8, %vm5893_vm2 }
  0xe1   : > { %v1185_v48 = vmul.f32 %v4280_v19, %v1160_v39  ;;  %v1186_v51 = vmul.f32 %v1158_v32, %v3877_v53  ;;  %v1183_v56 = vmul.f32 %v4280_v19, %v1159_v41  ;;  %v1184_v57 = vmul.f32 %v1157_v36, %v3877_v53  ;;  %1883 = vperm.xlu1 %3415, %v1877_v42  }
  0xe2   : > { %1888 = vperm.xlu0 %3414, %v1878_v46   ;;  %v1241_v13 = vmul.f32 %v4003_v6, %v3611_v7  ;;  %v1879_v7 = vld [vmem:[%s5739_s7 + $0x10] sm:$0xff]  ;;  %v3286_v41 = vsel %vm5887_vm10, 1.0, %v3466_v47  ;;  %v1240_v42 = vmul.f32 %v4324_v28, %v3614_v8  ;;  %v1242_v46 = vmul.f32 %v4324_v28, %v3630_v12  ;;  %v1974_v8 = vld [vmem:[%s5740_s8 + $0x18] sm:$0xff]  ;;  %vm4423_vm10 = vmand %vm1332_vm15, %vm5894_vm0 }
  0xe3   : > { %v1192_v60 = vpop.permute.xlu1 %1191  ;;  %v1190_v61 = vpop.permute.xlu0 %1189  ;;  %v1188_v62 = vpack.c.bf16 %v1186_v51, %v1184_v57  ;;  %v1187_v63 = vpack.c.bf16 %v1185_v48, %v1183_v56  ;;  %v4365_v34 = vrot.slane %v3286_v41, %v3600_v5  ;;  %vm5897_vm8 = vnez %v5851_v55 }
  0xe4   : > { %v1245_v25 = vpack.c.bf16 %v1243_v14, %v1241_v13  ;;  %v1244_v12 = vpack.c.bf16 %v1242_v46, %v1240_v42  ;;  %vm1748_vm4 = vcmask 130048  }
  0xe5   : > { %1775 = vmatprep.subr.bf16.mxu0 %v1188_v62  ;;  %1977 = vperm.xlu1 %3415, %v1971_v21   ;;  %5888 = vst [vmem:[#allocation2_spill] sm:$0xff] %v4365_v34 }
  0xe6   : > { %1776 = vmatpush1.bf16.msra.mxu0 %v1187_v63  ;;  %1982 = vperm.xlu0 %3414, %v1972_v22  }
  0xe7   : > { %v1196_v9 = vpop.permute.xlu1 %1195  ;;  %v1194_v10 = vpop.permute.xlu0 %1193 }
  0xe8   : > { %v1199_v18 = vsel %vm5799_vm9, %v1192_v60, %v1196_v9  ;;  %v1201_v15 = vsel %vm5799_vm9, %v1196_v9, %v1192_v60  ;;  %v1198_v16 = vsel %vm5799_vm9, %v1190_v61, %v1194_v10  ;;  %v1200_v20 = vsel %vm5799_vm9, %v1194_v10, %v1190_v61 }
  0xe9   : > { %v1220_v31 = vmul.f32 %v4320_v27, %v1201_v15  ;;  %v1221_v32 = vmul.f32 %v1199_v18, %v3953_v35  ;;  %v1218_v39 = vmul.f32 %v4320_v27, %v1200_v20  ;;  %v1219_v36 = vmul.f32 %v1198_v16, %v3953_v35  ;;  %1893 = vperm.xlu1 %3415, %v1879_v7  }
  0xea   : > { %1898 = vperm.xlu0 %3414, %v1880_v11   ;;  %v3288_v18 = vsel %vm5889_vm3, 1.0, %v3466_v47  ;;  %vm1324_vm3 = vcmp.lt.s32.totalorder %v3826_v40, 114 }
  0xeb   : > { %v1249_v48 = vpop.permute.xlu1 %1248  ;;  %v1247_v51 = vpop.permute.xlu0 %1246  ;;  %v1223_v56 = vpack.c.bf16 %v1221_v32, %v1219_v36  ;;  %v1222_v57 = vpack.c.bf16 %v1220_v31, %v1218_v39  ;;  %v4399_v31 = vrot.slane %v3288_v18, %v3600_v5 }
  0xed   : > { %1777 = vmatprep.subr.bf16.mxu0 %v1223_v56  ;;  %1987 = vperm.xlu1 %3415, %v1973_v33   ;;  %v3291_v56 = vsel %vm1338_vm6, 1.0, %v3466_v47  ;;  %vm1373_vm6 = vmand %vm4423_vm10, %vm5897_vm8  ;;  %vm5898_vm10 = vnez %v5856_v24 }
  0xee   : > { %1778 = vmatpush1.bf16.msra.mxu0 %v1222_v57  ;;  %1992 = vperm.xlu0 %3414, %v1974_v8  }
  0xef   : > { %v1253_v60 = vpop.permute.xlu1 %1252  ;;  %v1251_v61 = vpop.permute.xlu0 %1250  ;;  %1779 = vmatprep.subr.bf16.mxu0 %v1245_v25 }
  0xf0   : > { %v1256_v62 = vsel %vm5798_vm14, %v1249_v48, %v1253_v60  ;;  %v1258_v63 = vsel %vm5798_vm14, %v1253_v60, %v1249_v48  ;;  %v1255_v21 = vsel %vm5798_vm14, %v1247_v51, %v1251_v61  ;;  %v1257_v22 = vsel %vm5798_vm14, %v1251_v61, %v1247_v51  ;;  %vm4440_vm14 = vmand %vm1332_vm15, %vm5898_vm10 }
  0xf1   : > { %v1277_v9 = vmul.f32 %v4365_v34, %v1256_v62  ;;  %v1278_v10 = vmul.f32 %v1258_v63, %v4063_v52  ;;  %v1275_v13 = vmul.f32 %v4365_v34, %v1255_v21  ;;  %v1276_v14 = vmul.f32 %v1257_v22, %v4063_v52 }
  0xf2   : > { %1780 = vmatpush1.bf16.msra.mxu0 %v1244_v12  ;;  %v1350_v60 = vrot.slane %v3291_v56, %v3600_v5 }
  0xf3   : > { %v1284_v15 = vpop.permute.xlu1 %1283  ;;  %v1282_v16 = vpop.permute.xlu0 %1281  ;;  %v1280_v20 = vpack.c.bf16 %v1278_v10, %v1276_v14  ;;  %v1279_v7 = vpack.c.bf16 %v1277_v9, %v1275_v13 }
  0xf5   : > { %1781 = vmatprep.subr.bf16.mxu0 %v1280_v20 }
  0xf6   : > { %1782 = vmatpush1.bf16.msra.mxu0 %v1279_v7 }
  0xf7   : > { %v1288_v37 = vpop.permute.xlu1 %1287  ;;  %v1286_v38 = vpop.permute.xlu0 %1285 }
  0xf8   : > { %v1291_v32 = vsel %vm5802_vm12, %v1284_v15, %v1288_v37  ;;  %v1293_v39 = vsel %vm5802_vm12, %v1288_v37, %v1284_v15  ;;  %v1290_v36 = vsel %vm5802_vm12, %v1282_v16, %v1286_v38  ;;  %v1292_v41 = vsel %vm5802_vm12, %v1286_v38, %v1282_v16 }
  0xf9   : > { %v1312_v42 = vmul.f32 %v4399_v31, %v1291_v32  ;;  %v1313_v46 = vmul.f32 %v1293_v39, %v4101_v30  ;;  %v1310_v48 = vmul.f32 %v4399_v31, %v1290_v36  ;;  %v1311_v51 = vmul.f32 %v1292_v41, %v4101_v30  ;;  %v3416_v32 = vld [vmem:[%s5736_s4] ss:$16 sps:$4 sm:$0xff]   ;;  %v3419_v39 = vld [vmem:[%s5736_s4 + $0x24] ss:$16 sps:$4 sm:$0xff]  }
  0xfa   : > { %v3293_v15 = vsel %vm1373_vm6, 1.0, %v3466_v47  ;;  %vm5902_vm6 = vnez %v5858_v29 }
  0xfb   : > { %v1319_v57 = vpop.permute.xlu1 %1318  ;;  %v1317_v25 = vpop.permute.xlu0 %1316  ;;  %v1315_v33 = vpack.c.bf16 %v1313_v46, %v1311_v51  ;;  %v1314_v8 = vpack.c.bf16 %v1312_v42, %v1310_v48  ;;  %v4446_v38 = vrot.slane %v3293_v15, %v3600_v5  ;;  %vm1408_vm9 = vmand %vm4440_vm14, %vm5902_vm6  ;;  %vm5903_vm14 = vnez %v5863_v0 }
  0xfd   : > { %1783 = vmatprep.subr.bf16.mxu0 %v1315_v33  ;;  %5901 = vst [vmem:[#allocation3_spill] sm:$0xff] %v4446_v38 }
  0xfe   : > { %1784 = vmatpush1.bf16.msra.mxu0 %v1314_v8  ;;  %v3295_v8 = vsel %vm1408_vm9, 1.0, %v3466_v47  ;;  %vm5907_vm9 = vnez %v5865_v1 }
  0xff   : > { %v1323_v61 = vpop.permute.xlu1 %1322  ;;  %v1321_v62 = vpop.permute.xlu0 %1320 }
 0x100   : > { %v1326_v63 = vsel %vm1324_vm3, %v1319_v57, %v1323_v61  ;;  %v1328_v21 = vsel %vm1324_vm3, %v1323_v61, %v1319_v57  ;;  %v1325_v22 = vsel %vm1324_vm3, %v1317_v25, %v1321_v62  ;;  %v1327_v9 = vsel %vm1324_vm3, %v1321_v62, %v1317_v25 }
 0x101   : > { %v1353_v10 = vmul.f32 %v1326_v63, %v4280_v19  ;;  %v1354_v13 = vmul.f32 %v1350_v60, %v1328_v21  ;;  %v1351_v14 = vmul.f32 %v1325_v22, %v4280_v19  ;;  %v1352_v18 = vmul.f32 %v1350_v60, %v1327_v9  ;;  %v3421_v22 = vld [vmem:[%s5736_s4 + $0x20] ss:$16 sps:$4 sm:$0xff]   ;;  %v3424_v9 = vld [vmem:[%s5736_s4 + $0xc] ss:$16 sps:$4 sm:$0xff]  }
 0x102   : > { %vm5800_vm3 = vcmp.lt.s32.totalorder %v3826_v40, 113  ;;  %v4481_v21 = vrot.slane %v3295_v8, %v3600_v5 }
 0x103   : > { %v1360_v16 = vpop.permute.xlu1 %1359  ;;  %v1358_v20 = vpop.permute.xlu0 %1357  ;;  %v1356_v7 = vpack.c.bf16 %v1354_v13, %v1352_v18  ;;  %v1355_v11 = vpack.c.bf16 %v1353_v10, %v1351_v14 }
 0x104   : > { %5906 = vst [vmem:[#allocation4_spill] sm:$0xff] %v4481_v21 }
 0x105   : > { %1785 = vmatprep.subr.bf16.mxu0 %v1356_v7 }
 0x106   : > { %1786 = vmatpush1.bf16.msra.mxu0 %v1355_v11 }
 0x107   : > { %v1364_v36 = vpop.permute.xlu1 %1363  ;;  %v1362_v41 = vpop.permute.xlu0 %1361 }
 0x108   : > { %v1367_v42 = vsel %vm5800_vm3, %v1360_v16, %v1364_v36  ;;  %v1369_v46 = vsel %vm5800_vm3, %v1364_v36, %v1360_v16  ;;  %v1366_v48 = vsel %vm5800_vm3, %v1358_v20, %v1362_v41  ;;  %v1368_v51 = vsel %vm5800_vm3, %v1362_v41, %v1358_v20  ;;  %vm4475_vm3 = vmand %vm1332_vm15, %vm5903_vm14 }
 0x109   : > { %v1388_v56 = vmul.f32 %v1367_v42, %v4320_v27  ;;  %v1389_v57 = vmul.f32 %v4446_v38, %v1369_v46  ;;  %v1386_v25 = vmul.f32 %v1366_v48, %v4320_v27  ;;  %v1387_v33 = vmul.f32 %v4446_v38, %v1368_v51  ;;  %1788 = vmatmul.mubr.bf16.vlgmr.msra.gmra.mrb[0].mxu0 %v3416_v32  ;;  %vm1443_vm12 = vmand %vm4475_vm3, %vm5907_vm9 }
 0x10a   : > { %1797 = vmatprep.mubr.bf16.mxu0 %v3419_v39  ;;  %v3297_v32 = vsel %vm1443_vm12, 1.0, %v3466_v47  ;;  %vm4511_vm3 = vmand %vm1332_vm15, %vm4050_vm1 }
 0x10b   : > { %v1390_v12 = vpack.c.bf16 %v1388_v56, %v1386_v25  ;;  %v1395_v60 = vpop.permute.xlu1 %1394  ;;  %v1391_v61 = vpack.c.bf16 %v1389_v57, %v1387_v33  ;;  %v4517_v48 = vrot.slane %v3297_v32, %v3600_v5  ;;  %vm1478_vm12 = vmand %vm4511_vm3, %vm4054_vm7  ;;  %vm1470_vm3 = vcmp.lt.s32.totalorder %v3826_v40, 110 }
 0x10c   : > { %v1393_v63 = vpop.permute.xlu0 %1392  ;;  %vm4541_vm15 = vmand %vm1513_vm13, %vm5890_vm5 }
 0x10d   : > { %1808 = vmatprep.subr.bf16.mxu0 %v1391_v61  ;;  %5910 = vst [vmem:[#allocation5_spill] sm:$0xff] %v4517_v48  ;;  %vm4558_vm5 = vmand %vm1513_vm13, %vm5894_vm0 }
 0x10e   : > { %1809 = vmatpush1.bf16.msra.mxu0 %v1390_v12  ;;  %vm4587_vm0 = vmand %vm1513_vm13, %vm5898_vm10 }
 0x10f   : > { %v1399_v10 = vpop.permute.xlu1 %1398  ;;  %vm4604_vm10 = vmand %vm1513_vm13, %vm5903_vm14 }
 0x110   : > { %v1402_v13 = vsel %vm5804_vm11, %v1395_v60, %v1399_v10  ;;  %v1404_v14 = vsel %vm5804_vm11, %v1399_v10, %v1395_v60  ;;  %v1397_v18 = vpop.permute.xlu0 %1396  ;;  %vm4633_vm14 = vmand %vm1513_vm13, %vm4050_vm1  ;;  %vm1651_vm1 = vcmp.lt.s32.totalorder %v3826_v40, 94  ;;  %vm5926_vm13 = vcmp.lt.s32.totalorder %v3826_v40, 34 }
 0x111   : > { %v1423_v15 = vmul.f32 %v1402_v13, %v4324_v28  ;;  %v1424_v16 = vmul.f32 %v4481_v21, %v1404_v14  ;;  %v1401_v20 = vsel %vm5804_vm11, %v1393_v63, %v1397_v18  ;;  %v1403_v7 = vsel %vm5804_vm11, %v1397_v18, %v1393_v63  ;;  %1798 = vmatmul.mubr.bf16.gmra.mrb[4].mxu0 %v3421_v22 }
 0x112   : > { %v1421_v11 = vmul.f32 %v1401_v20, %v4324_v28  ;;  %v1422_v37 = vmul.f32 %v4481_v21, %v1403_v7  ;;  %3318 = vmatprep.mubr.msk.bf16.mxu0 %vm1748_vm4, %v3424_v9  ;;  %vm1435_vm11 = vcmp.lt.s32.totalorder %v3826_v40, 111  ;;  %v3299_v63 = vsel %vm1478_vm12, 1.0, %v3466_v47  ;;  %vm1519_vm12 = vmand %vm4541_vm15, %vm5893_vm2 }
 0x113   : > { %v1430_v39 = vpop.permute.xlu1 %1429  ;;  %v1490_v18 = vrot.slane %v3299_v63, %v3600_v5  ;;  %vm1505_vm2 = vcmp.lt.s32.totalorder %v3826_v40, 98  ;;  %vm1554_vm15 = vmand %vm4558_vm5, %vm5897_vm8  ;;  %vm1546_vm8 = vcmp.lt.s32.totalorder %v3826_v40, 97 }
 0x114   : > { %v1425_v36 = vpack.c.bf16 %v1423_v15, %v1421_v11  ;;  %v1428_v41 = vpop.permute.xlu0 %1427  ;;  %v1426_v42 = vpack.c.bf16 %v1424_v16, %v1422_v37  ;;  %vm1659_vm5 = vmand %vm4633_vm14, %vm4054_vm7  ;;  %vm1911_vm7 = vcmask 261120  }
 0x116   : > { %1810 = vmatprep.subr.bf16.mxu0 %v1426_v42 }
 0x117   : > { %1811 = vmatpush1.bf16.msra.mxu0 %v1425_v36  ;;  %v1434_v51 = vpop.permute.xlu1 %1433 }
 0x118   : > { %v1437_v56 = vsel %vm1435_vm11, %v1430_v39, %v1434_v51  ;;  %v1439_v57 = vsel %vm1435_vm11, %v1434_v51, %v1430_v39  ;;  %v1432_v25 = vpop.permute.xlu0 %1431 }
 0x119   : > { %v1458_v33 = vmul.f32 %v1437_v56, %v4365_v34  ;;  %v1459_v8 = vmul.f32 %v4517_v48, %v1439_v57  ;;  %v1436_v12 = vsel %vm1435_vm11, %v1428_v41, %v1432_v25  ;;  %v1438_v60 = vsel %vm1435_vm11, %v1432_v25, %v1428_v41 }
 0x11a   : > { %v1456_v61 = vmul.f32 %v1436_v12, %v4365_v34  ;;  %v1457_v62 = vmul.f32 %v4517_v48, %v1438_v60  ;;  %v3301_v41 = vsel %vm1519_vm12, 1.0, %v3466_v47  ;;  %vm1624_vm12 = vmand %vm4604_vm10, %vm5907_vm9  ;;  %vm1616_vm9 = vcmp.lt.s32.totalorder %v3826_v40, 95 }
 0x11b   : > { %v1465_v22 = vpop.permute.xlu1 %1464  ;;  %v4564_v57 = vrot.slane %v3301_v41, %v3600_v5 }
 0x11c   : > { %v1460_v9 = vpack.c.bf16 %v1458_v33, %v1456_v61  ;;  %v1463_v10 = vpop.permute.xlu0 %1462  ;;  %v1461_v13 = vpack.c.bf16 %v1459_v8, %v1457_v62 }
 0x11e   : > { %1812 = vmatprep.subr.bf16.mxu0 %v1461_v13 }
 0x11f   : > { %1813 = vmatpush1.bf16.msra.mxu0 %v1460_v9  ;;  %v1469_v15 = vpop.permute.xlu1 %1468 }
 0x120   : > { %v1472_v16 = vsel %vm1470_vm3, %v1465_v22, %v1469_v15  ;;  %v1474_v43 = vsel %vm1470_vm3, %v1469_v15, %v1465_v22  ;;  %v1467_v20 = vpop.permute.xlu0 %1466  ;;  %v3303_v22 = vsel %vm1554_vm15, 1.0, %v3466_v47 }
 0x121   : > { %v1493_v7 = vmul.f32 %v1472_v16, %v4399_v31  ;;  %v1494_v11 = vmul.f32 %v1490_v18, %v1474_v43  ;;  %v1471_v37 = vsel %vm1470_vm3, %v1463_v10, %v1467_v20  ;;  %v1473_v32 = vsel %vm1470_vm3, %v1467_v20, %v1463_v10  ;;  %vm1589_vm3 = vmand %vm4587_vm0, %vm5902_vm6 }
 0x122   : > { %v1491_v39 = vmul.f32 %v1471_v37, %v4399_v31  ;;  %v1492_v36 = vmul.f32 %v1490_v18, %v1473_v32  ;;  %v1566_v15 = vrot.slane %v3303_v22, %v3600_v5  ;;  %v3305_v41 = vsel %vm1589_vm3, 1.0, %v3466_v47 }
 0x123   : > { %v1500_v42 = vpop.permute.xlu1 %1499  ;;  %vm1581_vm6 = vcmp.lt.s32.totalorder %v3826_v40, 96  ;;  %v4610_v56 = vrot.slane %v3305_v41, %v3600_v5 }
 0x124   : > { %v1495_v46 = vpack.c.bf16 %v1493_v7, %v1491_v39  ;;  %v1498_v51 = vpop.permute.xlu0 %1497  ;;  %v1496_v44 = vpack.c.bf16 %v1494_v11, %v1492_v36 }
 0x126   : > { %1814 = vmatprep.subr.bf16.mxu0 %v1496_v44 }
 0x127   : > { %1815 = vmatpush1.bf16.msra.mxu0 %v1495_v46  ;;  %v1504_v25 = vpop.permute.xlu1 %1503 }
 0x128   : > { %v1507_v54 = vsel %vm1505_vm2, %v1500_v42, %v1504_v25  ;;  %v1509_v33 = vsel %vm1505_vm2, %v1504_v25, %v1500_v42  ;;  %v1502_v8 = vpop.permute.xlu0 %1501 }
 0x129   : > { %v1534_v12 = vmul.f32 %v1507_v54, %v4280_v19  ;;  %v1535_v60 = vmul.f32 %v4564_v57, %v1509_v33  ;;  %v1506_v61 = vsel %vm1505_vm2, %v1498_v51, %v1502_v8  ;;  %v1508_v55 = vsel %vm1505_vm2, %v1502_v8, %v1498_v51 }
 0x12a   : > { %v1532_v62 = vmul.f32 %v1506_v61, %v4280_v19  ;;  %v1533_v63 = vmul.f32 %v4564_v57, %v1508_v55 }
 0x12b   : > { %v1541_v9 = vpop.permute.xlu1 %1540 }
 0x12c   : > { %v1536_v10 = vpack.c.bf16 %v1534_v12, %v1532_v62  ;;  %v1539_v13 = vpop.permute.xlu0 %1538  ;;  %v1537_v14 = vpack.c.bf16 %v1535_v60, %v1533_v63  ;;  %v3307_v62 = vsel %vm1624_vm12, 1.0, %v3466_v47 }
 0x12e   : > { %1816 = vmatprep.subr.bf16.mxu0 %v1537_v14  ;;  %v1636_v14 = vrot.slane %v3307_v62, %v3600_v5 }
 0x12f   : > { %1817 = vmatpush1.bf16.msra.mxu0 %v1536_v10  ;;  %v1545_v16 = vpop.permute.xlu1 %1544 }
 0x130   : > { %v1548_v43 = vsel %vm1546_vm8, %v1541_v9, %v1545_v16  ;;  %v1550_v24 = vsel %vm1546_vm8, %v1545_v16, %v1541_v9  ;;  %v1543_v20 = vpop.permute.xlu0 %1542 }
 0x131   : > { %v1569_v7 = vmul.f32 %v1548_v43, %v4320_v27  ;;  %v1570_v11 = vmul.f32 %v1566_v15, %v1550_v24  ;;  %v1547_v37 = vsel %vm1546_vm8, %v1539_v13, %v1543_v20  ;;  %v1549_v32 = vsel %vm1546_vm8, %v1543_v20, %v1539_v13 }
 0x132   : > { %v1567_v39 = vmul.f32 %v1547_v37, %v4320_v27  ;;  %v1568_v36 = vmul.f32 %v1566_v15, %v1549_v32  ;;  %v3309_v37 = vsel %vm1659_vm5, 1.0, %v3466_v47  ;;  %vm5930_vm8 = vcmp.lt.s32.totalorder %v3826_v40, 32 }
 0x133   : > { %v1576_v42 = vpop.permute.xlu1 %1575  ;;  %v4648_v41 = vrot.slane %v3309_v37, %v3600_v5  ;;  %vm5933_vm12 = vmmov %vm5930_vm8 }
 0x134   : > { %v1571_v46 = vpack.c.bf16 %v1569_v7, %v1567_v39  ;;  %v1574_v51 = vpop.permute.xlu0 %1573  ;;  %v1572_v29 = vpack.c.bf16 %v1570_v11, %v1568_v36  ;;  %vm5934_vm14 = vmmov %vm5930_vm8 }
 0x136   : > { %1818 = vmatprep.subr.bf16.mxu0 %v1572_v29 }
 0x137   : > { %1819 = vmatpush1.bf16.msra.mxu0 %v1571_v46  ;;  %v1580_v25 = vpop.permute.xlu1 %1579 }
 0x138   : > { %v1583_v0 = vsel %vm1581_vm6, %v1576_v42, %v1580_v25  ;;  %v1585_v54 = vsel %vm1581_vm6, %v1580_v25, %v1576_v42  ;;  %v1578_v33 = vpop.permute.xlu0 %1577 }
 0x139   : > { %v1604_v8 = vmul.f32 %v1583_v0, %v4324_v28  ;;  %v1605_v12 = vmul.f32 %v4610_v56, %v1585_v54  ;;  %v1582_v60 = vsel %vm1581_vm6, %v1574_v51, %v1578_v33  ;;  %v1584_v1 = vsel %vm1581_vm6, %v1578_v33, %v1574_v51 }
 0x13a   : > { %v1602_v61 = vmul.f32 %v1582_v60, %v4324_v28  ;;  %v1603_v55 = vmul.f32 %v4610_v56, %v1584_v1  ;;  %v3425_v60 = vld [vmem:[%s5736_s4 + $0x2c] ss:$16 sps:$4 sm:$0xff]   ;;  %v3427_v1 = vld [vmem:[%s5736_s4 + $0x28] ss:$16 sps:$4 sm:$0xff]  }
 0x13b   : > { %v1611_v63 = vpop.permute.xlu1 %1610 }
 0x13c   : > { %v1606_v22 = vpack.c.bf16 %v1604_v8, %v1602_v61  ;;  %v1609_v9 = vpop.permute.xlu0 %1608  ;;  %v1607_v10 = vpack.c.bf16 %v1605_v12, %v1603_v55  ;;  %v3422_v12 = vld [vmem:[%s5736_s4 + $0x8] ss:$16 sps:$4 sm:$0xff]  }
 0x13e   : > { %1820 = vmatprep.subr.bf16.mxu0 %v1607_v10 }
 0x13f   : > { %1821 = vmatpush1.bf16.msra.mxu0 %v1606_v22  ;;  %v1615_v18 = vpop.permute.xlu1 %1614 }
 0x140   : > { %v1618_v15 = vsel %vm1616_vm9, %v1611_v63, %v1615_v18  ;;  %v1620_v49 = vsel %vm1616_vm9, %v1615_v18, %v1611_v63  ;;  %v1613_v16 = vpop.permute.xlu0 %1612 }
 0x141   : > { %v1639_v26 = vmul.f32 %v1618_v15, %v4365_v34  ;;  %v1640_v43 = vmul.f32 %v1636_v14, %v1620_v49  ;;  %v1617_v24 = vsel %vm1616_vm9, %v1609_v9, %v1613_v16  ;;  %v1619_v20 = vsel %vm1616_vm9, %v1613_v16, %v1609_v9 }
 0x142   : > { %v1637_v7 = vmul.f32 %v1617_v24, %v4365_v34  ;;  %v1638_v11 = vmul.f32 %v1636_v14, %v1619_v20 }
 0x143   : > { %v1646_v32 = vpop.permute.xlu1 %1645 }
 0x144   : > { %v1641_v39 = vpack.c.bf16 %v1639_v26, %v1637_v7  ;;  %v1644_v36 = vpop.permute.xlu0 %1643  ;;  %v1642_v50 = vpack.c.bf16 %v1640_v43, %v1638_v11 }
 0x146   : > { %1822 = vmatprep.subr.bf16.mxu0 %v1642_v50 }
 0x147   : > { %1823 = vmatpush1.bf16.msra.mxu0 %v1641_v39  ;;  %v1650_v42 = vpop.permute.xlu1 %1649 }
 0x148   : > { %v1653_v46 = vsel %vm1651_vm1, %v1646_v32, %v1650_v42  ;;  %v1655_v51 = vsel %vm1651_vm1, %v1650_v42, %v1646_v32  ;;  %v1648_v29 = vpop.permute.xlu0 %1647 }
 0x149   : > { %v1674_v47 = vmul.f32 %v1653_v46, %v4399_v31  ;;  %v1675_v44 = vmul.f32 %v4648_v41, %v1655_v51  ;;  %v1652_v25 = vsel %vm1651_vm1, %v1644_v36, %v1648_v29  ;;  %v1654_v5 = vsel %vm1651_vm1, %v1648_v29, %v1644_v36 }
 0x14a   : > { %v1672_v0 = vmul.f32 %v1652_v25, %v4399_v31  ;;  %v1673_v54 = vmul.f32 %v4648_v41, %v1654_v5 }
 0x14c   : > { %v1676_v33 = vpack.c.bf16 %v1674_v47, %v1672_v0  ;;  %v1677_v8 = vpack.c.bf16 %v1675_v44, %v1673_v54  ;;  %v3428_v0 = vld [vmem:[%s5738_s6] sm:$0xff]   ;;  %v3429_v54 = vld [vmem:[%s5738_s6 + $0x8] sm:$0xff]  }
 0x14e   : > { %1824 = vmatprep.subr.bf16.mxu0 %v1677_v8 }
 0x14f   : > { %1825 = vmatpush1.bf16.msra.mxu0 %v1676_v33 }
 0x152   : > { %1841 = vmatmul.mubr.bf16.vlgmr.msra.gmra.mrb[0].mxu0 %v3422_v12 }
 0x153   : > { %3319 = vmatprep.mubr.msk.bf16.mxu0 %vm1748_vm4, %v3425_v60  ;;  %vm5927_vm4 = vmmov %vm5926_vm13 }
 0x154   : > { %vm5928_vm15 = vmmov %vm5927_vm4 }
 0x155   : > { %vm5929_vm0 = vmmov %vm5927_vm4 }
 0x156   : > { %vm5931_vm3 = vmmov %vm5929_vm0 }
 0x157   : > { %vm5932_vm10 = vmmov %vm5929_vm0 }
 0x158   : > { %v1698_v22 = vpop.permute.xlu1 %1697  ;;  %vm5935_vm9 = vmmov %vm5929_vm0 }
 0x159   : > { %v1693_v61 = vpop.permute.xlu0 %1692  ;;  %vm5936_vm5 = vmmov %vm5929_vm0 }
 0x15a   : > { %1851 = vmatmul.mubr.bf16.gmra.mrb[4].mxu0 %v3427_v1  ;;  %v650_v1 = vld [vmem:[%s620_s29] sm:$0xff] }
 0x15c   : > { %v1703_v24 = vpop.permute.xlu1 %1702 }
 0x15d   : > { %v1708_v32 = vpop.permute.xlu0 %1707 }
 0x160   : > { %v1884_v33 = vpop.permute.xlu1 %1883 }
 0x161   : > { %v1889_v8 = vpop.permute.xlu0 %1888 }
 0x164   : > { %v1978_v12 = vpop.permute.xlu1 %1977 }
 0x165   : > { %v1983_v60 = vpop.permute.xlu0 %1982 }
 0x225   : > { %v1842_v55 = vpop.f32.mrb[0].mxu0 }
 0x226   : > { %v3347_v62 = vadd.f32 %v1842_v55, %v1693_v61  ;;  %v1844_v63 = vpop.f32.mrb[1].mxu0  ;;  %v652_v55 = vld [vmem:[%s620_s29 + $0x10] sm:$0xff] }
 0x227   : > { %v3348_v9 = vadd.f32 %v1844_v63, %v1693_v61  ;;  %v1846_v10 = vpop.f32.mrb[2].mxu0  ;;  %v651_v61 = vld [vmem:[%s620_s29 + $0x8] sm:$0xff] }
 0x228   : > { %v3349_v13 = vadd.f32 %v1846_v10, %v1698_v22  ;;  %v1848_v14 = vpop.f32.mrb[3].mxu0  ;;  %v1861_v15 = vmax.f32 %v3347_v62, 0.0  ;;  %v1894_v62 = vpop.permute.xlu1 %1893 }
 0x229   : > { %v3350_v18 = vadd.f32 %v1848_v14, %v1698_v22  ;;  %v1862_v16 = vmax.f32 %v3348_v9, 0.0  ;;  %v1995_v22 = vmul.f32 %v1978_v12, %v650_v1  ;;  %v653_v9 = vld [vmem:[%s620_s29 + $0x18] sm:$0xff]  ;;  %v1996_v14 = vmul.f32 %v1978_v12, %v651_v61 }
 0x22a   : > { %v1863_v49 = vmax.f32 %v3349_v13, 0.0 }
 0x22b   : > { %v1864_v26 = vmax.f32 %v3350_v18, 0.0  ;;  %v1899_v18 = vpop.permute.xlu0 %1898 }
 0x22c   : > { %v1873_v43 = vpack.c.bf16 %v1863_v49, %v1861_v15 }
 0x22d   : > { %v1852_v20 = vpop.f32.mrb[4].mxu0  ;;  %v1874_v7 = vpack.c.bf16 %v1864_v26, %v1862_v16  ;;  %v1997_v16 = vmul.f32 %v1983_v60, %v652_v55 }
 0x22e   : > { %v3351_v11 = vadd.f32 %v1852_v20, %v1703_v24  ;;  %v1854_v37 = vpop.f32.mrb[5].mxu0  ;;  %v1998_v20 = vmul.f32 %v1983_v60, %v653_v9 }
 0x22f   : > { %v3352_v39 = vadd.f32 %v1854_v37, %v1703_v24  ;;  %v1856_v36 = vpop.f32.mrb[6].mxu0  ;;  %1918 = vmatprep.subr.bf16.mxu1 %v1874_v7  ;;  %v654_v37 = vld [vmem:[%s620_s29 + $0x20] sm:$0xff] }
 0x230   : > { %v3353_v50 = vadd.f32 %v1856_v36, %v1708_v32  ;;  %v1858_v42 = vpop.f32.mrb[7].mxu0  ;;  %1919 = vmatpush1.bf16.msra.mxu1 %v1873_v43  ;;  %v1865_v51 = vmax.f32 %v3351_v11, 0.0  ;;  %v655_v36 = vld [vmem:[%s620_s29 + $0x28] sm:$0xff] }
 0x231   : > { %v3354_v46 = vadd.f32 %v1858_v42, %v1708_v32  ;;  %v1866_v47 = vmax.f32 %v3352_v39, 0.0  ;;  %v656_v42 = vld [vmem:[%s620_s29 + $0x30] sm:$0xff] }
 0x232   : > { %v1867_v29 = vmax.f32 %v3353_v50, 0.0  ;;  %v1988_v50 = vpop.permute.xlu1 %1987 }
 0x233   : > { %v1868_v44 = vmax.f32 %v3354_v46, 0.0  ;;  %v657_v46 = vld [vmem:[%s620_s29 + $0x38] sm:$0xff]  ;;  %s5969_s29 = smov 15  }
 0x234   : > { %v1875_v25 = vpack.c.bf16 %v1867_v29, %v1865_v51 }
 0x235   : > { %v1876_v5 = vpack.c.bf16 %v1868_v44, %v1866_v47  ;;  %v1993_v44 = vpop.permute.xlu0 %1992 }
 0x236   : > { %v2001_v1 = vmul.f32 %v1993_v44, %v656_v42  ;;  %v2329_v42 = vld [vmem:[%s5742_s10 + $0x10] sm:$0xff] }
 0x237   : > { %1920 = vmatprep.subr.bf16.mxu1 %v1876_v5 }
 0x238   : > { %1921 = vmatpush1.bf16.msra.mxu1 %v1875_v25 }
 0x23b   : > { %3322 = vmatmul.mubr.msk.bf16.vlgmr.msra.gmra.mrb[0].mxu1 %vm1911_vm7, %v3428_v0  ;;  %v1999_v0 = vmul.f32 %v1988_v50, %v654_v37  ;;  %v2327_v37 = vld [vmem:[%s5742_s10] sm:$0xff] }
 0x23c   : > { %1960 = vmatprep.mubr.bf16.mxu1 %v5806_v2 }
 0x243   : > { %3323 = vmatmul.mubr.msk.bf16.gmra.mrb[4].mxu1 %vm1911_vm7, %v3429_v54 }
 0x30e   : > { %v1952_v63 = vpop.f32.mrb[0].mxu1 }
 0x30f   : > { %v1953_v10 = vadd.f32 %v1952_v63, %v1884_v33  ;;  %v1954_v13 = vpop.f32.mrb[1].mxu1 }
 0x310   : > { %v1955_v15 = vadd.f32 %v1954_v13, %v1884_v33  ;;  %v1956_v49 = vpop.f32.mrb[2].mxu1 }
 0x311   : > { %v2003_v26 = vadd.f32 %v1995_v22, %v1953_v10  ;;  %v1957_v43 = vadd.f32 %v1956_v49, %v1889_v8  ;;  %v1958_v24 = vpop.f32.mrb[3].mxu1  ;;  %v2002_v22 = vmul.f32 %v1993_v44, %v657_v46 }
 0x312   : > { %v2004_v7 = vadd.f32 %v1996_v14, %v1955_v15  ;;  %v1959_v11 = vadd.f32 %v1958_v24, %v1889_v8  ;;  %v2000_v8 = vmul.f32 %v1988_v50, %v655_v36  ;;  %v2328_v36 = vld [vmem:[%s5742_s10 + $0x8] sm:$0xff] }
 0x313   : > { %v4694_v32 = vmax.f32 %v2003_v26, 0.0  ;;  %v2005_v39 = vadd.f32 %v1997_v16, %v1957_v43 }
 0x314   : > { %v4696_v51 = vmax.f32 %v2004_v7, 0.0  ;;  %v2006_v29 = vadd.f32 %v1998_v20, %v1959_v11 }
 0x315   : > { %3082 = vst [vmem:[%s4692_s0] sm:$0xff] %v4694_v32  ;;  %v4700_v47 = vmax.f32 %v2005_v39, 0.0  ;;  %2019 = vrot.lane.b32.xlu1 %v4694_v32, %s3451_s2 }
 0x316   : > { %3083 = vst [vmem:[%s4692_s0 + $0x8] sm:$0xff] %v4696_v51  ;;  %v4706_v25 = vmax.f32 %v2006_v29, 0.0  ;;  %v1962_v5 = vpop.f32.mrb[4].mxu1  ;;  %v2330_v29 = vld [vmem:[%s5742_s10 + $0x18] sm:$0xff] }
 0x317   : > { %3084 = vst [vmem:[%s4692_s0 + $0x10] sm:$0xff] %v4700_v47  ;;  %v1963_v54 = vadd.f32 %v1962_v5, %v1894_v62  ;;  %v1964_v33 = vpop.f32.mrb[5].mxu1  ;;  %2021 = vrot.lane.b32.xlu0 %v4700_v47, %s3451_s2  ;;  %v2509_v5 = vld [vmem:[%s5744_s12] sm:$0xff] }
 0x318   : > { %3085 = vst [vmem:[%s4692_s0 + $0x18] sm:$0xff] %v4706_v25  ;;  %v1965_v12 = vadd.f32 %v1964_v33, %v1894_v62  ;;  %v1966_v60 = vpop.f32.mrb[6].mxu1 }
 0x319   : > { %v2007_v61 = vadd.f32 %v1999_v0, %v1963_v54  ;;  %v1967_v55 = vadd.f32 %v1966_v60, %v1899_v18  ;;  %v1968_v63 = vpop.f32.mrb[7].mxu1  ;;  %2055 = vrot.lane.b32.xlu1 %v4694_v32, %s3453_s24 }
 0x31a   : > { %v2008_v9 = vadd.f32 %v2000_v8, %v1965_v12  ;;  %v1969_v10 = vadd.f32 %v1968_v63, %v1899_v18  ;;  %v3432_v18 = vld [vmem:[%s5741_s9 + $0x4] ss:$12 sps:$4 sm:$0xff]   ;;  %v2510_v8 = vld [vmem:[%s5744_s12 + $0x8] sm:$0xff] }
 0x31b   : > { %v4716_v13 = vmax.f32 %v2007_v61, 0.0  ;;  %v2009_v14 = vadd.f32 %v2001_v1, %v1967_v55  ;;  %2057 = vrot.lane.b32.xlu0 %v4700_v47, %s3453_s24  ;;  %2419 = vmatprep.mubr.bf16.mxu1 %v3432_v18  ;;  %v2602_v61 = vld [vmem:[%s5745_s13] sm:$0xff] }
 0x31c   : > { %v4720_v62 = vmax.f32 %v2008_v9, 0.0  ;;  %v2010_v15 = vadd.f32 %v2002_v22, %v1969_v10 }
 0x31d   : > { %3086 = vst [vmem:[%s4692_s0 + $0x20] sm:$0xff] %v4716_v13  ;;  %v4724_v49 = vmax.f32 %v2009_v14, 0.0  ;;  %2091 = vrot.lane.b32.xlu1 %v4694_v32, %s3455_s26  ;;  %v2603_v14 = vld [vmem:[%s5745_s13 + $0x8] sm:$0xff] }
 0x31e   : > { %3087 = vst [vmem:[%s4692_s0 + $0x28] sm:$0xff] %v4720_v62  ;;  %v4730_v16 = vmax.f32 %v2010_v15, 0.0 }
 0x31f   : > { %3088 = vst [vmem:[%s4692_s0 + $0x30] sm:$0xff] %v4724_v49  ;;  %2093 = vrot.lane.b32.xlu0 %v4700_v47, %s3455_s26 }
 0x320   : > { %3089 = vst [vmem:[%s4692_s0 + $0x38] sm:$0xff] %v4730_v16  ;;  %s5972_s0 = smov 113  }
 0x321   : > { %2127 = vrot.lane.b32.xlu1 %v4694_v32, %s3461_s20 }
 0x323   : > { %2129 = vrot.lane.b32.xlu0 %v4700_v47, %s3461_s20 }
 0x325   : > { %2175 = vrot.lane.b32.xlu1 %v4694_v32, %s5922_s21 }
 0x327   : > { %2177 = vrot.lane.b32.xlu0 %v4700_v47, %s5922_s21 }
 0x329   : > { %2027 = vrot.lane.b32.xlu1 %v4696_v51, %s3451_s2 }
 0x32b   : > { %2029 = vrot.lane.b32.xlu0 %v4706_v25, %s3451_s2 }
 0x32d   : > { %2063 = vrot.lane.b32.xlu1 %v4696_v51, %s3453_s24 }
 0x32f   : > { %2065 = vrot.lane.b32.xlu0 %v4706_v25, %s3453_s24 }
 0x331   : > { %2099 = vrot.lane.b32.xlu1 %v4696_v51, %s3455_s26 }
 0x333   : > { %2101 = vrot.lane.b32.xlu0 %v4706_v25, %s3455_s26 }
 0x335   : > { %2135 = vrot.lane.b32.xlu1 %v4696_v51, %s3461_s20 }
 0x337   : > { %2137 = vrot.lane.b32.xlu0 %v4706_v25, %s3461_s20 }
 0x339   : > { %2023 = vrot.lane.b32.xlu1 %v4716_v13, %s3451_s2 }
 0x33b   : > { %2025 = vrot.lane.b32.xlu0 %v4724_v49, %s3451_s2 }
 0x33d   : > { %2059 = vrot.lane.b32.xlu1 %v4716_v13, %s3453_s24 }
 0x33f   : > { %2061 = vrot.lane.b32.xlu0 %v4724_v49, %s3453_s24 }
 0x341   : > { %2095 = vrot.lane.b32.xlu1 %v4716_v13, %s3455_s26 }
 0x343   : > { %2097 = vrot.lane.b32.xlu0 %v4724_v49, %s3455_s26 }
 0x345   : > { %2131 = vrot.lane.b32.xlu1 %v4716_v13, %s3461_s20 }
 0x347   : > { %2133 = vrot.lane.b32.xlu0 %v4724_v49, %s3461_s20 }
 0x349   : > { %2031 = vrot.lane.b32.xlu1 %v4720_v62, %s3451_s2 }
 0x34b   : > { %2033 = vrot.lane.b32.xlu0 %v4730_v16, %s3451_s2  ;;  %s5923_s2 = smov 98  }
 0x34d   : > { %2183 = vrot.lane.b32.xlu1 %v4696_v51, %s5922_s21 }
 0x34f   : > { %2185 = vrot.lane.b32.xlu0 %v4706_v25, %s5922_s21 }
 0x351   : > { %2067 = vrot.lane.b32.xlu1 %v4720_v62, %s3453_s24 }
 0x353   : > { %2069 = vrot.lane.b32.xlu0 %v4730_v16, %s3453_s24  ;;  %s5924_s24 = smov 96  }
 0x355   : > { %2103 = vrot.lane.b32.xlu1 %v4720_v62, %s3455_s26 }
 0x357   : > { %2181 = vrot.lane.b32.xlu0 %v4724_v49, %s5922_s21 }
 0x359   : > { %2139 = vrot.lane.b32.xlu1 %v4720_v62, %s3461_s20 }
 0x35b   : > { %2105 = vrot.lane.b32.xlu0 %v4730_v16, %s3455_s26 }
 0x35d   : > { %2179 = vrot.lane.b32.xlu1 %v4716_v13, %s5922_s21 }
 0x35f   : > { %2213 = vrot.lane.b32.xlu0 %v4700_v47, %s5923_s2 }
 0x361   : > { %2187 = vrot.lane.b32.xlu1 %v4720_v62, %s5922_s21 }
 0x363   : > { %2141 = vrot.lane.b32.xlu0 %v4730_v16, %s3461_s20 }
 0x365   : > { %2211 = vrot.lane.b32.xlu1 %v4694_v32, %s5923_s2 }
 0x367   : > { %2221 = vrot.lane.b32.xlu0 %v4706_v25, %s5923_s2 }
 0x369   : > { %2219 = vrot.lane.b32.xlu1 %v4696_v51, %s5923_s2 }
 0x36b   : > { %2217 = vrot.lane.b32.xlu0 %v4724_v49, %s5923_s2 }
 0x36d   : > { %2215 = vrot.lane.b32.xlu1 %v4716_v13, %s5923_s2 }
 0x36f   : > { %2249 = vrot.lane.b32.xlu0 %v4700_v47, %s5924_s24 }
 0x371   : > { %2223 = vrot.lane.b32.xlu1 %v4720_v62, %s5923_s2 }
 0x373   : > { %2189 = vrot.lane.b32.xlu0 %v4730_v16, %s5922_s21  ;;  %s5973_s21 = smov 112  }
 0x375   : > { %2247 = vrot.lane.b32.xlu1 %v4694_v32, %s5924_s24 }
 0x377   : > { %2257 = vrot.lane.b32.xlu0 %v4706_v25, %s5924_s24 }
 0x379   : > { %2255 = vrot.lane.b32.xlu1 %v4696_v51, %s5924_s24 }
 0x37b   : > { %2225 = vrot.lane.b32.xlu0 %v4730_v16, %s5923_s2  ;;  %s5974_s2 = smov 111  }
 0x37d   : > { %2251 = vrot.lane.b32.xlu1 %v4716_v13, %s5924_s24 }
 0x37f   : > { %2253 = vrot.lane.b32.xlu0 %v4724_v49, %s5924_s24 }
 0x381   : > { %2259 = vrot.lane.b32.xlu1 %v4720_v62, %s5924_s24 }
 0x383   : > { %2261 = vrot.lane.b32.xlu0 %v4730_v16, %s5924_s24  ;;  %s625_s24 = scalar_lea.vmem %s5735_s3, %s4682_s19 }
 0x385   : > { %2283 = vrot.lane.b32.xlu1 %v4694_v32, %s5925_s25 }
 0x387   : > { %2285 = vrot.lane.b32.xlu0 %v4700_v47, %s5925_s25  ;;  %v2020_v26 = vpop.permute.xlu1 %2019 }
 0x389   : > { %v2022_v43 = vpop.permute.xlu0 %2021  ;;  %2291 = vrot.lane.b32.xlu1 %v4696_v51, %s5925_s25 }
 0x38b   : > { %2293 = vrot.lane.b32.xlu0 %v4706_v25, %s5925_s25  ;;  %v4849_v24 = vpop.permute.xlu1 %2055 }
 0x38d   : > { %v4851_v20 = vpop.permute.xlu0 %2057  ;;  %2287 = vrot.lane.b32.xlu1 %v4716_v13, %s5925_s25 }
 0x38f   : > { %2289 = vrot.lane.b32.xlu0 %v4724_v49, %s5925_s25  ;;  %v4857_v7 = vpop.permute.xlu1 %2091 }
 0x391   : > { %v4859_v11 = vpop.permute.xlu0 %2093  ;;  %2295 = vrot.lane.b32.xlu1 %v4720_v62, %s5925_s25 }
 0x393   : > { %2297 = vrot.lane.b32.xlu0 %v4730_v16, %s5925_s25  ;;  %v4868_v39 = vpop.permute.xlu1 %2127  ;;  %s5211_s25 = scalar_lea.vmem %s5750_s18, %s4682_s19  ;;  %s5967_s19 = smov 17  }
 0x395   : > { %v4873_v50 = vpop.permute.xlu0 %2129  ;;  %2333 = vperm.xlu1 %3415, %v2327_v37  }
 0x397   : > { %2338 = vperm.xlu0 %3414, %v2328_v36   ;;  %v4878_v46 = vpop.permute.xlu1 %2175  ;;  %v2512_v36 = vld [vmem:[%s5744_s12 + $0x18] sm:$0xff] }
 0x399   : > { %v4883_v44 = vpop.permute.xlu0 %2177  ;;  %2343 = vperm.xlu1 %3415, %v2329_v42  }
 0x39b   : > { %2348 = vperm.xlu0 %3414, %v2330_v29   ;;  %v2028_v0 = vpop.permute.xlu1 %2027  ;;  %v2604_v29 = vld [vmem:[%s5745_s13 + $0x10] sm:$0xff] }
 0x39c   : > { %v2035_v54 = vsel %vm5926_vm13, %v2020_v26, %v2028_v0  ;;  %v2039_v33 = vsel %vm5927_vm4, %v2028_v0, %v2020_v26  ;;  %v2605_v0 = vld [vmem:[%s5745_s13 + $0x18] sm:$0xff]  ;;  %vm5937_vm13 = vmmov %vm5930_vm8  ;;  %vm5938_vm4 = vcmp.lt.s32.totalorder %v3826_v40, 30 }
 0x39d   : > { %v2030_v12 = vpop.permute.xlu0 %2029  ;;  %2515 = vperm.xlu1 %3415, %v2509_v5   ;;  %v2043_v55 = vmul.f32 %v2039_v33, %v3895_v58  ;;  %v2044_v63 = vmul.f32 %v2035_v54, %v3877_v53 }
 0x39e   : > { %v2036_v60 = vsel %vm5928_vm15, %v2022_v43, %v2030_v12  ;;  %v2040_v1 = vsel %vm5929_vm0, %v2030_v12, %v2022_v43  ;;  %v2511_v43 = vld [vmem:[%s5744_s12 + $0x10] sm:$0xff]  ;;  %vm5939_vm15 = vmmov %vm5930_vm8 }
 0x39f   : > { %v2045_v22 = vmul.f32 %v2040_v1, %v3895_v58  ;;  %v2046_v9 = vmul.f32 %v2036_v60, %v3877_v53  ;;  %2520 = vperm.xlu0 %3414, %v2510_v8   ;;  %v2064_v10 = vpop.permute.xlu1 %2063  ;;  %vm5940_vm0 = vmmov %vm5930_vm8 }
 0x3a1   : > { %v2051_v15 = vpack.c.bf16 %v2045_v22, %v2043_v55  ;;  %v2066_v18 = vpop.permute.xlu0 %2065  ;;  %2608 = vperm.xlu1 %3415, %v2602_v61   ;;  %v2052_v26 = vpack.c.bf16 %v2046_v9, %v2044_v63 }
 0x3a2   : > { %v2072_v22 = vsel %vm5930_vm8, %v4851_v20, %v2066_v18  ;;  %vm5941_vm8 = vmmov %vm5938_vm4 }
 0x3a3   : > { %2613 = vperm.xlu0 %3414, %v2603_v14   ;;  %2387 = vmatprep.subr.bf16.mxu1 %v2052_v26  ;;  %v4912_v37 = vpop.permute.xlu1 %2099  ;;  %v2071_v26 = vsel %vm5933_vm12, %v4849_v24, %v2064_v10  ;;  %vm5944_vm12 = vmmov %vm5940_vm0 }
 0x3a4   : > { %2388 = vmatpush1.bf16.msra.mxu1 %v2051_v15 }
 0x3a5   : > { %v2102_v42 = vpop.permute.xlu0 %2101  ;;  %2525 = vperm.xlu1 %3415, %v2511_v43  }
 0x3a7   : > { %2530 = vperm.xlu0 %3414, %v2512_v36   ;;  %v4920_v5 = vpop.permute.xlu1 %2135  ;;  %v2076_v36 = vsel %vm5934_vm14, %v2066_v18, %v4851_v20  ;;  %v2075_v20 = vsel %vm5937_vm13, %v2064_v10, %v4849_v24  ;;  %v2080_v18 = vmul.f32 %v2071_v26, %v4003_v6 }
 0x3a9   : > { %v4925_v54 = vpop.permute.xlu0 %2137  ;;  %2618 = vperm.xlu1 %3415, %v2604_v29   ;;  %v2082_v29 = vmul.f32 %v2072_v22, %v4003_v6  ;;  %v2081_v22 = vmul.f32 %v2076_v36, %v4000_v4 }
 0x3ab   : > { %2623 = vperm.xlu0 %3414, %v2605_v0   ;;  %v2024_v33 = vpop.permute.xlu1 %2023 }
 0x3ad   : > { %v2026_v8 = vpop.permute.xlu0 %2025 }
 0x3af   : > { %v2060_v12 = vpop.permute.xlu1 %2059 }
 0x3b1   : > { %v2062_v60 = vpop.permute.xlu0 %2061 }
 0x3b3   : > { %v2096_v1 = vpop.permute.xlu1 %2095 }
 0x3b5   : > { %v4927_v61 = vpop.permute.xlu0 %2097 }
 0x3b7   : > { %v4929_v55 = vpop.permute.xlu1 %2131 }
 0x3b9   : > { %v4931_v63 = vpop.permute.xlu0 %2133 }
 0x3bb   : > { %v2032_v9 = vpop.permute.xlu1 %2031 }
 0x3bc   : > { %v2037_v14 = vsel %vm5931_vm3, %v2024_v33, %v2032_v9  ;;  %v2041_v15 = vsel %vm5932_vm10, %v2032_v9, %v2024_v33  ;;  %vm5942_vm3 = vmmov %vm5938_vm4 }
 0x3bd   : > { %v2034_v43 = vpop.permute.xlu0 %2033  ;;  %v2047_v21 = vmul.f32 %v2041_v15, %v3895_v58  ;;  %v2048_v33 = vmul.f32 %v2037_v14, %v3877_v53  ;;  %v2079_v14 = vmul.f32 %v2075_v20, %v4000_v4  ;;  %v2112_v36 = vsel %vm5942_vm3, %v2102_v42, %v4859_v11  ;;  %vm5943_vm10 = vmmov %vm5940_vm0 }
 0x3be   : > { %v2038_v0 = vsel %vm5935_vm9, %v2026_v8, %v2034_v43  ;;  %v2042_v2 = vsel %vm5936_vm5, %v2034_v43, %v2026_v8  ;;  %v2088_v43 = vpack.c.bf16 %v2082_v29, %v2080_v18  ;;  %vm5945_vm14 = vmmov %vm5942_vm3  ;;  %vm5946_vm9 = vcmp.lt.s32.totalorder %v3826_v40, 2 }
 0x3bf   : > { %v2049_v9 = vmul.f32 %v2042_v2, %v3895_v58  ;;  %v2050_v48 = vmul.f32 %v2038_v0, %v3877_v53  ;;  %v4955_v38 = vpop.permute.xlu1 %2183  ;;  %v2108_v2 = vsel %vm5938_vm4, %v4859_v11, %v2102_v42  ;;  %v2111_v11 = vsel %vm5945_vm14, %v4912_v37, %v4857_v7  ;;  %vm5947_vm5 = vmmov %vm5942_vm3 }
 0x3c0   : > { %v2118_v29 = vmul.f32 %v2108_v2, %v4101_v30  ;;  %v2115_v2 = vmul.f32 %v2111_v11, %v4098_v23  ;;  %vm5948_vm13 = vmmov %vm5942_vm3 }
 0x3c1   : > { %v2053_v34 = vpack.c.bf16 %v2049_v9, %v2047_v21  ;;  %v4962_v8 = vpop.permute.xlu0 %2185  ;;  %v2054_v15 = vpack.c.bf16 %v2050_v48, %v2048_v33  ;;  %v2087_v21 = vpack.c.bf16 %v2081_v22, %v2079_v14  ;;  %v2107_v48 = vsel %vm5941_vm8, %v4857_v7, %v4912_v37  ;;  %vm5949_vm4 = vmmov %vm5946_vm9 }
 0x3c2   : > { %v2116_v42 = vmul.f32 %v2107_v48, %v4101_v30  ;;  %v2117_v22 = vmul.f32 %v2112_v36, %v4098_v23 }
 0x3c3   : > { %2389 = vmatprep.subr.bf16.mxu1 %v2054_v15  ;;  %v2068_v58 = vpop.permute.xlu1 %2067 }
 0x3c4   : > { %v2073_v24 = vsel %vm5939_vm15, %v2060_v12, %v2068_v58  ;;  %v2077_v10 = vsel %vm5940_vm0, %v2068_v58, %v2060_v12  ;;  %2390 = vmatpush1.bf16.msra.mxu1 %v2053_v34  ;;  %vm5950_vm15 = vmmov %vm5949_vm4 }
 0x3c5   : > { %v2070_v26 = vpop.permute.xlu0 %2069  ;;  %2391 = vmatprep.subr.bf16.mxu1 %v2088_v43  ;;  %v2083_v12 = vmul.f32 %v2077_v10, %v4000_v4  ;;  %v2084_v33 = vmul.f32 %v2073_v24, %v4003_v6  ;;  %v2124_v43 = vpack.c.bf16 %v2118_v29, %v2116_v42  ;;  %v2123_v24 = vpack.c.bf16 %v2117_v22, %v2115_v2  ;;  %vm5951_vm0 = vmmov %vm5942_vm3 }
 0x3c6   : > { %v2074_v0 = vsel %vm5943_vm10, %v2062_v60, %v2070_v26  ;;  %v2078_v34 = vsel %vm5944_vm12, %v2070_v26, %v2062_v60  ;;  %v2143_v10 = vsel %vm5949_vm4, %v4868_v39, %v4920_v5  ;;  %v2148_v48 = vsel %vm5950_vm15, %v4925_v54, %v4873_v50  ;;  %vm5952_vm8 = vmmov %vm5951_vm0 }
 0x3c7   : > { %v2085_v9 = vmul.f32 %v2078_v34, %v4000_v4  ;;  %v2086_v20 = vmul.f32 %v2074_v0, %v4003_v6  ;;  %v2104_v18 = vpop.permute.xlu1 %2103  ;;  %v2144_v4 = vsel %vm5946_vm9, %v4873_v50, %v4925_v54  ;;  %vm5953_vm3 = vmmov %vm5949_vm4  ;;  %v2152_v54 = vmul.f32 %v2143_v10, %v3877_v53 }
 0x3c8   : > { %2392 = vmatpush1.bf16.msra.mxu1 %v2087_v21  ;;  %v2109_v7 = vsel %vm5947_vm5, %v2096_v1, %v2104_v18  ;;  %v2113_v37 = vsel %vm5948_vm13, %v2104_v18, %v2096_v1  ;;  %v2154_v26 = vmul.f32 %v2144_v4, %v3877_v53  ;;  %v2147_v50 = vsel %vm5953_vm3, %v4920_v5, %v4868_v39  ;;  %vm5954_vm10 = vmmov %vm5953_vm3 }
 0x3c9   : > { %v2089_v60 = vpack.c.bf16 %v2085_v9, %v2083_v12  ;;  %v4994_v15 = vpop.permute.xlu0 %2181  ;;  %v2090_v14 = vpack.c.bf16 %v2086_v20, %v2084_v33  ;;  %v2119_v29 = vmul.f32 %v2113_v37, %v4098_v23  ;;  %v2120_v0 = vmul.f32 %v2109_v7, %v4101_v30  ;;  %vm5955_vm12 = vmmov %vm5953_vm3 }
 0x3ca   : > { %v2153_v18 = vmul.f32 %v2148_v48, %v4280_v19  ;;  %v2151_v42 = vmul.f32 %v2147_v50, %v4280_v19  ;;  %vm5956_vm14 = vmmov %vm5953_vm3  ;;  %v2166_v4 = vmul.f32 %v4706_v25, %v4003_v6  ;;  %v2164_v48 = vmul.f32 %v4696_v51, %v4003_v6 }
 0x3cb   : > { %2393 = vmatprep.subr.bf16.mxu1 %v2090_v14  ;;  %v2140_v58 = vpop.permute.xlu1 %2139  ;;  %vm5957_vm9 = vmmov %vm5953_vm3  ;;  %vm5958_vm5 = vcmp.lt.s32.totalorder %v3826_v40, 126  ;;  %v2168_v51 = vmul.f32 %v4720_v62, %v4003_v6 }
 0x3cc   : > { %2394 = vmatpush1.bf16.msra.mxu1 %v2089_v60  ;;  %v2145_v22 = vsel %vm5954_vm10, %v4929_v55, %v2140_v58  ;;  %v2149_v39 = vsel %vm5955_vm12, %v2140_v58, %v4929_v55  ;;  %v2159_v60 = vpack.c.bf16 %v2153_v18, %v2151_v42  ;;  %vm5959_vm13 = vmmov %vm5958_vm5 }
 0x3cd   : > { %v2106_v21 = vpop.permute.xlu0 %2105  ;;  %2395 = vmatprep.subr.bf16.mxu1 %v2124_v43  ;;  %v2155_v43 = vmul.f32 %v2149_v39, %v4280_v19  ;;  %v2156_v7 = vmul.f32 %v2145_v22, %v3877_v53  ;;  %vm5960_vm4 = vmmov %vm5958_vm5 }
 0x3ce   : > { %v2110_v1 = vsel %vm5951_vm0, %v4927_v61, %v2106_v21  ;;  %v2114_v36 = vsel %vm5952_vm8, %v2106_v21, %v4927_v61  ;;  %vm5961_vm15 = vmmov %vm5960_vm4 }
 0x3cf   : > { %v2121_v34 = vmul.f32 %v2114_v36, %v4098_v23  ;;  %v2122_v12 = vmul.f32 %v2110_v1, %v4101_v30  ;;  %v2180_v33 = vpop.permute.xlu1 %2179  ;;  %v2160_v23 = vpack.c.bf16 %v2154_v26, %v2152_v54  ;;  %v2172_v26 = vpack.c.bf16 %v2166_v4, %v2164_v48  ;;  %vm5962_vm0 = vmmov %vm5960_vm4 }
 0x3d0   : > { %2396 = vmatpush1.bf16.msra.mxu1 %v2123_v24  ;;  %v2170_v1 = vmul.f32 %v4730_v16, %v4003_v6  ;;  %v2163_v36 = vmul.f32 %v4694_v32, %v4324_v28  ;;  %v2192_v16 = vsel %vm5960_vm4, %v4883_v44, %v4962_v8  ;;  %v2191_v62 = vsel %vm5961_vm15, %v4878_v46, %v4955_v38  ;;  %vm5963_vm8 = vmmov %vm5962_vm0 }
 0x3d1   : > { %v2125_v9 = vpack.c.bf16 %v2121_v34, %v2119_v29  ;;  %v5029_v20 = vpop.permute.xlu0 %2213  ;;  %v2126_v61 = vpack.c.bf16 %v2122_v12, %v2120_v0  ;;  %v2169_v34 = vmul.f32 %v4724_v49, %v4324_v28  ;;  %v2167_v54 = vmul.f32 %v4716_v13, %v4324_v28  ;;  %vm5964_vm3 = vmmov %vm5962_vm0 }
 0x3d2   : > { %v2174_v50 = vpack.c.bf16 %v2170_v1, %v2168_v51  ;;  %v2199_v18 = vmul.f32 %v2191_v62, %v4399_v31  ;;  %vm5965_vm10 = vmmov %vm5962_vm0 }
 0x3d3   : > { %2397 = vmatprep.subr.bf16.mxu1 %v2126_v61  ;;  %v2188_v11 = vpop.permute.xlu1 %2187  ;;  %v2173_v61 = vpack.c.bf16 %v2169_v34, %v2167_v54 }
 0x3d4   : > { %2398 = vmatpush1.bf16.msra.mxu1 %v2125_v9  ;;  %v2193_v49 = vsel %vm5962_vm0, %v2180_v33, %v2188_v11  ;;  %vm5985_vm0 = vcmp.lt.s32.totalorder %v3826_v40, 1 }
 0x3d5   : > { %v2142_v5 = vpop.permute.xlu0 %2141  ;;  %2399 = vmatprep.subr.bf16.mxu1 %v2160_v23  ;;  %v2203_v22 = vmul.f32 %v2193_v49, %v4399_v31 }
 0x3d6   : > { %v2146_v14 = vsel %vm5956_vm14, %v4931_v63, %v2142_v5  ;;  %v2150_v2 = vsel %vm5957_vm9, %v2142_v5, %v4931_v63  ;;  %v2165_v63 = vmul.f32 %v4700_v47, %v4324_v28  ;;  %v2195_v47 = vsel %vm5959_vm13, %v4955_v38, %v4878_v46 }
 0x3d7   : > { %v2157_v55 = vmul.f32 %v2150_v2, %v4280_v19  ;;  %v2158_v58 = vmul.f32 %v2146_v14, %v3877_v53  ;;  %v2212_v37 = vpop.permute.xlu1 %2211  ;;  %v2196_v53 = vsel %vm5958_vm5, %v4962_v8, %v4883_v44  ;;  %v2200_v9 = vmul.f32 %v2195_v47, %v4101_v30 }
 0x3d8   : > { %2400 = vmatpush1.bf16.msra.mxu1 %v2159_v60  ;;  %v2171_v0 = vpack.c.bf16 %v2165_v63, %v2163_v36  ;;  %v2202_v32 = vmul.f32 %v2196_v53, %v4101_v30  ;;  %v2201_v44 = vmul.f32 %v2192_v16, %v4399_v31  ;;  %v2197_v38 = vsel %vm5963_vm8, %v2188_v11, %v2180_v33  ;;  %vm5986_vm8 = vmmov %vm5985_vm0 }
 0x3d9   : > { %v2161_v24 = vpack.c.bf16 %v2157_v55, %v2155_v43  ;;  %v2222_v10 = vpop.permute.xlu0 %2221  ;;  %v2162_v21 = vpack.c.bf16 %v2158_v58, %v2156_v7  ;;  %v2204_v14 = vmul.f32 %v2197_v38, %v4101_v30  ;;  %vm5979_vm14 = vcmp.lt.s32.totalorder %v3826_v40, 16 }
 0x3da   : > { %v2208_v42 = vpack.c.bf16 %v2202_v32, %v2200_v9  ;;  %v2207_v46 = vpack.c.bf16 %v2201_v44, %v2199_v18  ;;  %v2232_v5 = vsel %vm1505_vm2, %v2222_v10, %v5029_v20  ;;  %v2228_v55 = vsel %vm1505_vm2, %v5029_v20, %v2222_v10  ;;  %vm5980_vm9 = vmmov %vm5979_vm14 }
 0x3db   : > { %2401 = vmatprep.subr.bf16.mxu1 %v2162_v21  ;;  %v2220_v25 = vpop.permute.xlu1 %2219  ;;  %v2238_v58 = vmul.f32 %v2232_v5, %v4564_v57  ;;  %v2237_v63 = vmul.f32 %v2228_v55, %v4280_v19  ;;  %vm5981_vm5 = vcmp.lt.s32.totalorder %v3826_v40, 15 }
 0x3dc   : > { %2402 = vmatpush1.bf16.msra.mxu1 %v2161_v24  ;;  %v2231_v13 = vsel %vm1505_vm2, %v2220_v25, %v2212_v37  ;;  %v2227_v60 = vsel %vm1505_vm2, %v2212_v37, %v2220_v25  ;;  %vm5982_vm13 = vmmov %vm5981_vm5 }
 0x3dd   : > { %v2218_v29 = vpop.permute.xlu0 %2217  ;;  %2403 = vmatprep.subr.bf16.mxu1 %v2172_v26  ;;  %v2236_v2 = vmul.f32 %v2231_v13, %v4564_v57  ;;  %v2235_v37 = vmul.f32 %v2227_v60, %v4280_v19  ;;  %vm5983_vm4 = vmmov %vm5981_vm5 }
 0x3de   : > { %vm5984_vm15 = vmmov %vm5983_vm4 }
 0x3df   : > { %v2216_v12 = vpop.permute.xlu1 %2215  ;;  %v2244_v26 = vpack.c.bf16 %v2238_v58, %v2236_v2  ;;  %v2243_v10 = vpack.c.bf16 %v2237_v63, %v2235_v37 }
 0x3e0   : > { %2404 = vmatpush1.bf16.msra.mxu1 %v2171_v0 }
 0x3e1   : > { %v2250_v8 = vpop.permute.xlu0 %2249  ;;  %2405 = vmatprep.subr.bf16.mxu1 %v2174_v50 }
 0x3e3   : > { %v2224_v23 = vpop.permute.xlu1 %2223 }
 0x3e4   : > { %2406 = vmatpush1.bf16.msra.mxu1 %v2173_v61  ;;  %v2229_v48 = vsel %vm1505_vm2, %v2216_v12, %v2224_v23 }
 0x3e5   : > { %v2190_v39 = vpop.permute.xlu0 %2189  ;;  %2407 = vmatprep.subr.bf16.mxu1 %v2208_v42  ;;  %v2239_v1 = vmul.f32 %v2229_v48, %v4280_v19 }
 0x3e6   : > { %v2194_v33 = vsel %vm5964_vm3, %v4994_v15, %v2190_v39  ;;  %v2198_v11 = vsel %vm5965_vm10, %v2190_v39, %v4994_v15  ;;  %vm5987_vm3 = vmmov %vm5985_vm0 }
 0x3e7   : > { %v2205_v4 = vmul.f32 %v2194_v33, %v4399_v31  ;;  %v2206_v43 = vmul.f32 %v2198_v11, %v4101_v30  ;;  %v2248_v7 = vpop.permute.xlu1 %2247  ;;  %v2233_v30 = vsel %vm1505_vm2, %v2224_v23, %v2216_v12  ;;  %vm5988_vm10 = vmmov %vm5985_vm0 }
 0x3e8   : > { %2408 = vmatpush1.bf16.msra.mxu1 %v2207_v46  ;;  %v2240_v36 = vmul.f32 %v2233_v30, %v4564_v57 }
 0x3e9   : > { %v2209_v24 = vpack.c.bf16 %v2205_v4, %v2203_v22  ;;  %v2258_v15 = vpop.permute.xlu0 %2257  ;;  %v2210_v21 = vpack.c.bf16 %v2206_v43, %v2204_v14  ;;  %v3430_v4 = vld [vmem:[%s5741_s9] ss:$12 sps:$4 sm:$0xff]  }
 0x3ea   : > { %v2268_v51 = vsel %vm1581_vm6, %v2258_v15, %v2250_v8  ;;  %v2264_v62 = vsel %vm1581_vm6, %v2250_v8, %v2258_v15 }
 0x3eb   : > { %v2256_v25 = vpop.permute.xlu1 %2255  ;;  %2409 = vmatprep.subr.bf16.mxu1 %v2210_v21  ;;  %v2274_v54 = vmul.f32 %v2268_v51, %v4610_v56  ;;  %v2273_v23 = vmul.f32 %v2264_v62, %v4324_v28 }
 0x3ec   : > { %v2267_v20 = vsel %vm1581_vm6, %v2256_v25, %v2248_v7  ;;  %2410 = vmatpush1.bf16.msra.mxu1 %v2209_v24  ;;  %v2263_v0 = vsel %vm1581_vm6, %v2248_v7, %v2256_v25 }
 0x3ed   : > { %v2226_v53 = vpop.permute.xlu0 %2225  ;;  %2411 = vmatprep.subr.bf16.mxu1 %v2244_v26  ;;  %v2272_v34 = vmul.f32 %v2267_v20, %v4610_v56 }
 0x3ee   : > { %v2230_v47 = vsel %vm1505_vm2, %v2218_v29, %v2226_v53  ;;  %v2234_v16 = vsel %vm1505_vm2, %v2226_v53, %v2218_v29  ;;  %v2271_v29 = vmul.f32 %v2263_v0, %v4324_v28  ;;  %vm5975_vm2 = vcmp.lt.s32.totalorder %v3826_v40, 17 }
 0x3ef   : > { %v2241_v32 = vmul.f32 %v2230_v47, %v4280_v19  ;;  %v2242_v12 = vmul.f32 %v2234_v16, %v4564_v57  ;;  %v2252_v50 = vpop.permute.xlu1 %2251  ;;  %v2280_v18 = vpack.c.bf16 %v2274_v54, %v2272_v34  ;;  %v3436_v54 = vld [vmem:[%s5741_s9 + $0x8] ss:$12 sps:$4 sm:$0xff]  }
 0x3f0   : > { %2412 = vmatpush1.bf16.msra.mxu1 %v2243_v10  ;;  %v2279_v42 = vpack.c.bf16 %v2273_v23, %v2271_v29  ;;  %v3435_v10 = vld [vmem:[%s5741_s9 + $0x18] ss:$12 sps:$4 sm:$0xff]  }
 0x3f1   : > { %v2245_v9 = vpack.c.bf16 %v2241_v32, %v2239_v1  ;;  %v2254_v44 = vpop.permute.xlu0 %2253  ;;  %v2246_v49 = vpack.c.bf16 %v2242_v12, %v2240_v36  ;;  %v5966_v12 = vmov 0  }
 0x3f3   : > { %v2260_v61 = vpop.permute.xlu1 %2259  ;;  %2413 = vmatprep.subr.bf16.mxu1 %v2246_v49 }
 0x3f4   : > { %v2265_v19 = vsel %vm1581_vm6, %v2252_v50, %v2260_v61  ;;  %v2269_v57 = vsel %vm1581_vm6, %v2260_v61, %v2252_v50  ;;  %2414 = vmatpush1.bf16.msra.mxu1 %v2245_v9 }
 0x3f5   : > { %v2262_v8 = vpop.permute.xlu0 %2261  ;;  %2415 = vmatprep.subr.bf16.mxu1 %v2280_v18  ;;  %v2275_v46 = vmul.f32 %v2265_v19, %v4324_v28  ;;  %v2276_v22 = vmul.f32 %v2269_v57, %v4610_v56 }
 0x3f6   : > { %v2266_v38 = vsel %vm1581_vm6, %v2254_v44, %v2262_v8  ;;  %v2270_v13 = vsel %vm1581_vm6, %v2262_v8, %v2254_v44  ;;  %vm5976_vm6 = vmmov %vm5975_vm2 }
 0x3f7   : > { %v2277_v39 = vmul.f32 %v2266_v38, %v4324_v28  ;;  %v2278_v5 = vmul.f32 %v2270_v13, %v4610_v56  ;;  %v2284_v60 = vpop.permute.xlu1 %2283  ;;  %v3433_v56 = vld [vmem:[%s5741_s9 + $0x1c] ss:$12 sps:$4 sm:$0xff]  }
 0x3f8   : > { %2416 = vmatpush1.bf16.msra.mxu1 %v2279_v42 }
 0x3f9   : > { %v2281_v33 = vpack.c.bf16 %v2277_v39, %v2275_v46  ;;  %v2286_v11 = vpop.permute.xlu0 %2285  ;;  %v2282_v14 = vpack.c.bf16 %v2278_v5, %v2276_v22 }
 0x3fb   : > { %v2292_v2 = vpop.permute.xlu1 %2291  ;;  %2417 = vmatprep.subr.bf16.mxu1 %v2282_v14 }
 0x3fc   : > { %v2299_v43 = vsel %vm1651_vm1, %v2284_v60, %v2292_v2  ;;  %v2303_v7 = vsel %vm1651_vm1, %v2292_v2, %v2284_v60  ;;  %2418 = vmatpush1.bf16.msra.mxu1 %v2281_v33 }
 0x3fd   : > { %v2294_v55 = vpop.permute.xlu0 %2293  ;;  %v2307_v24 = vmul.f32 %v2299_v43, %v4399_v31  ;;  %v2308_v15 = vmul.f32 %v2303_v7, %v4648_v41 }
 0x3fe   : > { %v2300_v58 = vsel %vm1651_vm1, %v2286_v11, %v2294_v55  ;;  %v2304_v37 = vsel %vm1651_vm1, %v2294_v55, %v2286_v11 }
 0x3ff   : > { %v2309_v21 = vmul.f32 %v2300_v58, %v4399_v31  ;;  %v2310_v48 = vmul.f32 %v2304_v37, %v4648_v41  ;;  %v2288_v63 = vpop.permute.xlu1 %2287  ;;  %2420 = vmatmul.mubr.bf16.vlgmr.msra.gmra.mrb[8].mxu1 %v3430_v4 }
 0x400   : > { %2429 = vmatprep.mubr.bf16.mxu1 %v3433_v56 }
 0x401   : > { %v2315_v30 = vpack.c.bf16 %v2309_v21, %v2307_v24  ;;  %v2290_v25 = vpop.permute.xlu0 %2289  ;;  %v2316_v26 = vpack.c.bf16 %v2310_v48, %v2308_v15  ;;  %v3438_v21 = vld [vmem:[%s5743_s11] sm:$0xff]   ;;  %v3439_v48 = vld [vmem:[%s5743_s11 + $0x8] sm:$0xff]  }
 0x403   : > { %v2296_v20 = vpop.permute.xlu1 %2295  ;;  %2440 = vmatprep.subr.bf16.mxu1 %v2316_v26 }
 0x404   : > { %v2301_v1 = vsel %vm1651_vm1, %v2288_v63, %v2296_v20  ;;  %v2305_v53 = vsel %vm1651_vm1, %v2296_v20, %v2288_v63  ;;  %2441 = vmatpush1.bf16.msra.mxu1 %v2315_v30  ;;  %v658_v20 = vld [vmem:[%s625_s24] sm:$0xff] }
 0x405   : > { %v2298_v36 = vpop.permute.xlu0 %2297  ;;  %v2311_v16 = vmul.f32 %v2301_v1, %v4399_v31  ;;  %v2312_v0 = vmul.f32 %v2305_v53, %v4648_v41  ;;  %v660_v1 = vld [vmem:[%s625_s24 + $0x10] sm:$0xff] }
 0x406   : > { %v2302_v51 = vsel %vm1651_vm1, %v2290_v25, %v2298_v36  ;;  %v2306_v47 = vsel %vm1651_vm1, %v2298_v36, %v2290_v25  ;;  %vm5977_vm1 = vmmov %vm5975_vm2 }
 0x407   : > { %v2313_v34 = vmul.f32 %v2302_v51, %v4399_v31  ;;  %v2314_v32 = vmul.f32 %v2306_v47, %v4648_v41  ;;  %2430 = vmatmul.mubr.bf16.gmra.mrb[12].mxu1 %v3435_v10  ;;  %v3437_v31 = vld [vmem:[%s5741_s9 + $0x20] ss:$12 sps:$4 sm:$0xff]   ;;  %v661_v47 = vld [vmem:[%s625_s24 + $0x18] sm:$0xff]  ;;  %vm5978_vm12 = vmmov %vm5977_vm1 }
 0x408   : > { %2472 = vmatprep.mubr.bf16.mxu1 %v5966_v12  ;;  %v659_v10 = vld [vmem:[%s625_s24 + $0x8] sm:$0xff] }
 0x409   : > { %v2317_v50 = vpack.c.bf16 %v2313_v34, %v2311_v16  ;;  %v2318_v62 = vpack.c.bf16 %v2314_v32, %v2312_v0 }
 0x40b   : > { %2442 = vmatprep.subr.bf16.mxu1 %v2318_v62 }
 0x40c   : > { %2443 = vmatpush1.bf16.msra.mxu1 %v2317_v50 }
 0x40f   : > { %3330 = vmatmul.mubr.msk.bf16.vlgmr.msra.gmra.mrb[8].mxu1 %vm1911_vm7, %v3436_v54 }
 0x410   : > { %2482 = vmatprep.mubr.bf16.mxu1 %v5966_v12 }
 0x414   : > { %v2334_v41 = vpop.permute.xlu1 %2333 }
 0x416   : > { %v2339_v29 = vpop.permute.xlu0 %2338 }
 0x417   : > { %3331 = vmatmul.mubr.msk.bf16.gmra.mrb[12].mxu1 %vm1911_vm7, %v3437_v31 }
 0x418   : > { %2581 = vmatprep.mubr.bf16.mxu1 %v5966_v12  ;;  %v2344_v22 = vpop.permute.xlu1 %2343 }
 0x41a   : > { %v2349_v11 = vpop.permute.xlu0 %2348 }
 0x41c   : > { %v2516_v63 = vpop.permute.xlu1 %2515 }
 0x41e   : > { %v2521_v30 = vpop.permute.xlu0 %2520 }
 0x420   : > { %v2609_v25 = vpop.permute.xlu1 %2608 }
 0x421   : > { %v2626_v51 = vmul.f32 %v2609_v25, %v658_v20  ;;  %v2627_v34 = vmul.f32 %v2609_v25, %v659_v10  ;;  %v3476_v25 = vmov 1966171168   ;;  %v3336_v10 = vld.sshfl [vmem:[%s5746_s14] sm:$0x13 pattern:$0x75316420] }
 0x422   : > { %v2614_v26 = vpop.permute.xlu0 %2613 }
 0x423   : > { %v2628_v62 = vmul.f32 %v2614_v26, %v660_v1  ;;  %v2965_v1 = vcombine.high %v3336_v10, %v3336_v10 }
 0x424   : > { %v2526_v53 = vpop.permute.xlu1 %2525 }
 0x426   : > { %v2531_v32 = vpop.permute.xlu0 %2530 }
 0x4e2   : > { %v2474_v9 = vpop.f32.mrb[8].mxu1 }
 0x4e3   : > { %v3355_v44 = vadd.f32 %v2474_v9, %v2334_v41  ;;  %v2476_v49 = vpop.f32.mrb[9].mxu1  ;;  %v2629_v9 = vmul.f32 %v2614_v26, %v661_v47  ;;  %v2967_v26 = vunpack.c.l.s4 %v3476_v25 }
 0x4e4   : > { %v3356_v61 = vadd.f32 %v2476_v49, %v2334_v41  ;;  %v2478_v18 = vpop.f32.mrb[10].mxu1 }
 0x4e5   : > { %v3357_v23 = vadd.f32 %v2478_v18, %v2339_v29  ;;  %v2480_v19 = vpop.f32.mrb[11].mxu1  ;;  %v2493_v8 = vmax.f32 %v3355_v44, 0.0  ;;  %v2968_v20 = vunpack.c.0.s8 %v2967_v26 }
 0x4e6   : > { %v3358_v57 = vadd.f32 %v2480_v19, %v2339_v29  ;;  %v2494_v38 = vmax.f32 %v3356_v61, 0.0  ;;  %v662_v29 = vld [vmem:[%s625_s24 + $0x20] sm:$0xff]  ;;  %v2619_v19 = vpop.permute.xlu1 %2618 }
 0x4e7   : > { %v2495_v42 = vmax.f32 %v3357_v23, 0.0  ;;  %v663_v23 = vld [vmem:[%s625_s24 + $0x28] sm:$0xff] }
 0x4e8   : > { %v2496_v13 = vmax.f32 %v3358_v57, 0.0  ;;  %v664_v57 = vld [vmem:[%s625_s24 + $0x30] sm:$0xff] }
 0x4e9   : > { %v2505_v46 = vpack.c.bf16 %v2495_v42, %v2493_v8  ;;  %v665_v8 = vld [vmem:[%s625_s24 + $0x38] sm:$0xff] }
 0x4ea   : > { %v2506_v39 = vpack.c.bf16 %v2496_v13, %v2494_v38  ;;  %v2484_v5 = vpop.f32.mrb[12].mxu1 }
 0x4eb   : > { %v3359_v60 = vadd.f32 %v2484_v5, %v2344_v22  ;;  %v2486_v33 = vpop.f32.mrb[13].mxu1  ;;  %v2630_v5 = vmul.f32 %v2619_v19, %v662_v29 }
 0x4ec   : > { %v3360_v14 = vadd.f32 %v2486_v33, %v2344_v22  ;;  %v2488_v2 = vpop.f32.mrb[14].mxu1  ;;  %2549 = vmatprep.subr.bf16.mxu1 %v2506_v39 }
 0x4ed   : > { %v3361_v4 = vadd.f32 %v2488_v2, %v2349_v11  ;;  %v2490_v43 = vpop.f32.mrb[15].mxu1  ;;  %2550 = vmatpush1.bf16.msra.mxu1 %v2505_v46  ;;  %v2497_v56 = vmax.f32 %v3359_v60, 0.0  ;;  %v2624_v46 = vpop.permute.xlu0 %2623 }
 0x4ee   : > { %v3362_v7 = vadd.f32 %v2490_v43, %v2349_v11  ;;  %v2498_v58 = vmax.f32 %v3360_v14, 0.0  ;;  %v2631_v11 = vmul.f32 %v2619_v19, %v663_v23 }
 0x4ef   : > { %v2499_v55 = vmax.f32 %v3361_v4, 0.0  ;;  %v2632_v4 = vmul.f32 %v2624_v46, %v664_v57 }
 0x4f0   : > { %v2500_v37 = vmax.f32 %v3362_v7, 0.0 }
 0x4f1   : > { %v2507_v24 = vpack.c.bf16 %v2499_v55, %v2497_v56  ;;  %v2633_v55 = vmul.f32 %v2624_v46, %v665_v8 }
 0x4f2   : > { %v2508_v15 = vpack.c.bf16 %v2500_v37, %v2498_v58 }
 0x4f4   : > { %2551 = vmatprep.subr.bf16.mxu1 %v2508_v15 }
 0x4f5   : > { %2552 = vmatpush1.bf16.msra.mxu1 %v2507_v24 }
 0x4f8   : > { %3334 = vmatmul.mubr.msk.bf16.vlgmr.msra.gmra.mrb[16].mxu1 %vm1911_vm7, %v3438_v21 }
 0x4f9   : > { %2591 = vmatprep.mubr.bf16.mxu1 %v5966_v12 }
 0x500   : > { %3335 = vmatmul.mubr.msk.bf16.gmra.mrb[20].mxu1 %vm1911_vm7, %v3439_v48 }
 0x501   : > { %3059 = vmatprep.mubr.bf16.mxu1 %v5966_v12 }
 0x5cb   : > { %v2583_v36 = vpop.f32.mrb[16].mxu1 }
 0x5cc   : > { %v2584_v16 = vadd.f32 %v2583_v36, %v2516_v63  ;;  %v2585_v0 = vpop.f32.mrb[17].mxu1 }
 0x5cd   : > { %v2586_v12 = vadd.f32 %v2585_v0, %v2516_v63  ;;  %v2587_v50 = vpop.f32.mrb[18].mxu1 }
 0x5ce   : > { %v2634_v54 = vadd.f32 %v2626_v51, %v2584_v16  ;;  %v2588_v31 = vadd.f32 %v2587_v50, %v2521_v30  ;;  %v2589_v41 = vpop.f32.mrb[19].mxu1 }
 0x5cf   : > { %v2635_v44 = vadd.f32 %v2627_v34, %v2586_v12  ;;  %v2590_v49 = vadd.f32 %v2589_v41, %v2521_v30  ;;  %v2951_v12 = vld [vmem:[%s5747_s15] sm:$0x3] }
 0x5d0   : > { %v5213_v61 = vmax.f32 %v2634_v54, 0.0  ;;  %v2636_v18 = vadd.f32 %v2628_v62, %v2588_v31 }
 0x5d1   : > { %v5215_v42 = vmax.f32 %v2635_v44, 0.0  ;;  %v2637_v38 = vadd.f32 %v2629_v9, %v2590_v49 }
 0x5d2   : > { %3090 = vst [vmem:[%s5211_s25] sm:$0xff] %v5213_v61  ;;  %v5219_v13 = vmax.f32 %v2636_v18, 0.0  ;;  %2650 = vrot.lane.b32.xlu1 %v5213_v61, %s5967_s19 }
 0x5d3   : > { %3091 = vst [vmem:[%s5211_s25 + $0x8] sm:$0xff] %v5215_v42  ;;  %v5225_v22 = vmax.f32 %v2637_v38, 0.0  ;;  %v2593_v39 = vpop.f32.mrb[20].mxu1 }
 0x5d4   : > { %3092 = vst [vmem:[%s5211_s25 + $0x10] sm:$0xff] %v5219_v13  ;;  %v2594_v60 = vadd.f32 %v2593_v39, %v2526_v53  ;;  %v2595_v33 = vpop.f32.mrb[21].mxu1  ;;  %2652 = vrot.lane.b32.xlu0 %v5219_v13, %s5967_s19 }
 0x5d5   : > { %3093 = vst [vmem:[%s5211_s25 + $0x18] sm:$0xff] %v5225_v22  ;;  %v2596_v14 = vadd.f32 %v2595_v33, %v2526_v53  ;;  %v2597_v2 = vpop.f32.mrb[22].mxu1  ;;  %v2971_v53 = vsub.s32 %v2968_v20, %v3592_v3 }
 0x5d6   : > { %v2638_v43 = vadd.f32 %v2630_v5, %v2594_v60  ;;  %v2598_v7 = vadd.f32 %v2597_v2, %v2531_v32  ;;  %v2599_v56 = vpop.f32.mrb[23].mxu1  ;;  %2686 = vrot.lane.b32.xlu1 %v5213_v61, %s5968_s1 }
 0x5d7   : > { %v2639_v58 = vadd.f32 %v2631_v11, %v2596_v14  ;;  %v2600_v37 = vadd.f32 %v2599_v56, %v2531_v32  ;;  %v2979_v51 = vrot.slane %v2965_v1, %v2971_v53  ;;  %v5367_v16 = vrot.slane %v3336_v10, %v2971_v53 }
 0x5d8   : > { %v5235_v24 = vmax.f32 %v2638_v43, 0.0  ;;  %v2640_v15 = vadd.f32 %v2632_v4, %v2598_v7  ;;  %2688 = vrot.lane.b32.xlu0 %v5219_v13, %s5968_s1 }
 0x5d9   : > { %v5239_v21 = vmax.f32 %v2639_v58, 0.0  ;;  %v2641_v48 = vadd.f32 %v2633_v55, %v2600_v37  ;;  %3018 = vmatprep.mubr.bf16.mxu0 %v2979_v51 }
 0x5da   : > { %3094 = vst [vmem:[%s5211_s25 + $0x20] sm:$0xff] %v5235_v24  ;;  %v5243_v63 = vmax.f32 %v2640_v15, 0.0  ;;  %2722 = vrot.lane.b32.xlu1 %v5213_v61, %s5969_s29 }
 0x5db   : > { %3095 = vst [vmem:[%s5211_s25 + $0x28] sm:$0xff] %v5239_v21  ;;  %v5249_v30 = vmax.f32 %v2641_v48, 0.0 }
 0x5dc   : > { %3096 = vst [vmem:[%s5211_s25 + $0x30] sm:$0xff] %v5243_v63  ;;  %2724 = vrot.lane.b32.xlu0 %v5219_v13, %s5969_s29 }
 0x5dd   : > { %3097 = vst [vmem:[%s5211_s25 + $0x38] sm:$0xff] %v5249_v30 }
 0x5de   : > { %2758 = vrot.lane.b32.xlu1 %v5213_v61, %s5970_s23 }
 0x5e0   : > { %2760 = vrot.lane.b32.xlu0 %v5219_v13, %s5970_s23 }
 0x5e2   : > { %2806 = vrot.lane.b32.xlu1 %v5213_v61, %s5971_s30 }
 0x5e4   : > { %2808 = vrot.lane.b32.xlu0 %v5219_v13, %s5971_s30 }
 0x5e6   : > { %2842 = vrot.lane.b32.xlu1 %v5213_v61, %s5972_s0 }
 0x5e8   : > { %2844 = vrot.lane.b32.xlu0 %v5219_v13, %s5972_s0 }
 0x5ea   : > { %2658 = vrot.lane.b32.xlu1 %v5215_v42, %s5967_s19 }
 0x5ec   : > { %2660 = vrot.lane.b32.xlu0 %v5225_v22, %s5967_s19 }
 0x5ee   : > { %2694 = vrot.lane.b32.xlu1 %v5215_v42, %s5968_s1 }
 0x5f0   : > { %2696 = vrot.lane.b32.xlu0 %v5225_v22, %s5968_s1 }
 0x5f2   : > { %2730 = vrot.lane.b32.xlu1 %v5215_v42, %s5969_s29 }
 0x5f4   : > { %2732 = vrot.lane.b32.xlu0 %v5225_v22, %s5969_s29 }
 0x5f6   : > { %2766 = vrot.lane.b32.xlu1 %v5215_v42, %s5970_s23 }
 0x5f8   : > { %2768 = vrot.lane.b32.xlu0 %v5225_v22, %s5970_s23 }
 0x5fa   : > { %2814 = vrot.lane.b32.xlu1 %v5215_v42, %s5971_s30 }
 0x5fc   : > { %2816 = vrot.lane.b32.xlu0 %v5225_v22, %s5971_s30 }
 0x5fe   : > { %2654 = vrot.lane.b32.xlu1 %v5235_v24, %s5967_s19 }
 0x600   : > { %2656 = vrot.lane.b32.xlu0 %v5243_v63, %s5967_s19 }
 0x602   : > { %2690 = vrot.lane.b32.xlu1 %v5235_v24, %s5968_s1 }
 0x604   : > { %2692 = vrot.lane.b32.xlu0 %v5243_v63, %s5968_s1 }
 0x606   : > { %2726 = vrot.lane.b32.xlu1 %v5235_v24, %s5969_s29 }
 0x608   : > { %2728 = vrot.lane.b32.xlu0 %v5243_v63, %s5969_s29 }
 0x60a   : > { %2762 = vrot.lane.b32.xlu1 %v5235_v24, %s5970_s23 }
 0x60c   : > { %2764 = vrot.lane.b32.xlu0 %v5243_v63, %s5970_s23 }
 0x60e   : > { %2810 = vrot.lane.b32.xlu1 %v5235_v24, %s5971_s30 }
 0x610   : > { %2812 = vrot.lane.b32.xlu0 %v5243_v63, %s5971_s30 }
 0x612   : > { %2662 = vrot.lane.b32.xlu1 %v5239_v21, %s5967_s19 }
 0x614   : > { %2664 = vrot.lane.b32.xlu0 %v5249_v30, %s5967_s19  ;;  %s3344_s19 = sshll.u32 %s6039_s28, 2 }
 0x616   : > { %2850 = vrot.lane.b32.xlu1 %v5215_v42, %s5972_s0 }
 0x618   : > { %2852 = vrot.lane.b32.xlu0 %v5225_v22, %s5972_s0 }
 0x61a   : > { %2698 = vrot.lane.b32.xlu1 %v5239_v21, %s5968_s1 }
 0x61c   : > { %2700 = vrot.lane.b32.xlu0 %v5249_v30, %s5968_s1 }
 0x61e   : > { %2734 = vrot.lane.b32.xlu1 %v5239_v21, %s5969_s29 }
 0x620   : > { %2848 = vrot.lane.b32.xlu0 %v5243_v63, %s5972_s0 }
 0x622   : > { %2770 = vrot.lane.b32.xlu1 %v5239_v21, %s5970_s23 }
 0x624   : > { %2736 = vrot.lane.b32.xlu0 %v5249_v30, %s5969_s29 }
 0x626   : > { %2818 = vrot.lane.b32.xlu1 %v5239_v21, %s5971_s30 }
 0x628   : > { %2880 = vrot.lane.b32.xlu0 %v5219_v13, %s5973_s21 }
 0x62a   : > { %2846 = vrot.lane.b32.xlu1 %v5235_v24, %s5972_s0 }
 0x62c   : > { %2772 = vrot.lane.b32.xlu0 %v5249_v30, %s5970_s23  ;;  %s630_s23 = scalar_lea.vmem %s5748_s16, %s3344_s19 }
 0x62e   : > { %2854 = vrot.lane.b32.xlu1 %v5239_v21, %s5972_s0 }
 0x630   : > { %2888 = vrot.lane.b32.xlu0 %v5225_v22, %s5973_s21 }
 0x632   : > { %2878 = vrot.lane.b32.xlu1 %v5213_v61, %s5973_s21 }
 0x634   : > { %2916 = vrot.lane.b32.xlu0 %v5219_v13, %s5974_s2 }
 0x636   : > { %2886 = vrot.lane.b32.xlu1 %v5215_v42, %s5973_s21 }
 0x638   : > { %2924 = vrot.lane.b32.xlu0 %v5225_v22, %s5974_s2 }
 0x63a   : > { %2914 = vrot.lane.b32.xlu1 %v5213_v61, %s5974_s2 }
 0x63c   : > { %2820 = vrot.lane.b32.xlu0 %v5249_v30, %s5971_s30 }
 0x63e   : > { %2922 = vrot.lane.b32.xlu1 %v5215_v42, %s5974_s2 }
 0x640   : > { %2884 = vrot.lane.b32.xlu0 %v5243_v63, %s5973_s21 }
 0x642   : > { %2882 = vrot.lane.b32.xlu1 %v5235_v24, %s5973_s21 }
 0x644   : > { %2856 = vrot.lane.b32.xlu0 %v5249_v30, %s5972_s0  ;;  %v2651_v36 = vpop.permute.xlu1 %2650 }
 0x646   : > { %v2653_v47 = vpop.permute.xlu0 %2652  ;;  %2890 = vrot.lane.b32.xlu1 %v5239_v21, %s5973_s21 }
 0x648   : > { %2920 = vrot.lane.b32.xlu0 %v5243_v63, %s5974_s2  ;;  %v5371_v0 = vpop.permute.xlu1 %2686 }
 0x64a   : > { %v5373_v34 = vpop.permute.xlu0 %2688  ;;  %2918 = vrot.lane.b32.xlu1 %v5235_v24, %s5974_s2 }
 0x64c   : > { %2892 = vrot.lane.b32.xlu0 %v5249_v30, %s5973_s21  ;;  %v2723_v3 = vpop.permute.xlu1 %2722 }
 0x64e   : > { %v2725_v32 = vpop.permute.xlu0 %2724  ;;  %2926 = vrot.lane.b32.xlu1 %v5239_v21, %s5974_s2 }
 0x650   : > { %2928 = vrot.lane.b32.xlu0 %v5249_v30, %s5974_s2  ;;  %v2759_v50 = vpop.permute.xlu1 %2758 }
 0x652   : > { %v2761_v62 = vpop.permute.xlu0 %2760  ;;  %2954 = vperm.xlu1 %3415, %v2951_v12  }
 0x654   : > { %v2807_v54 = vpop.permute.xlu1 %2806 }
 0x656   : > { %v2809_v31 = vpop.permute.xlu0 %2808 }
 0x658   : > { %v5386_v41 = vpop.permute.xlu1 %2842 }
 0x65a   : > { %v5388_v9 = vpop.permute.xlu0 %2844 }
 0x65c   : > { %v2659_v44 = vpop.permute.xlu1 %2658 }
 0x65d   : > { %v2666_v49 = vsel %vm5975_vm2, %v2651_v36, %v2659_v44  ;;  %v2670_v29 = vsel %vm5976_vm6, %v2659_v44, %v2651_v36  ;;  %vm5989_vm2 = vcmp.lt.s32.totalorder %v3826_v40, 127 }
 0x65e   : > { %v2661_v18 = vpop.permute.xlu0 %2660  ;;  %v2674_v57 = vmul.f32 %v2670_v29, %v4157_v45  ;;  %v2675_v8 = vmul.f32 %v2666_v49, %v3953_v35  ;;  %vm5990_vm6 = vmmov %vm5989_vm2 }
 0x65f   : > { %v2667_v23 = vsel %vm5977_vm1, %v2653_v47, %v2661_v18  ;;  %v2671_v19 = vsel %vm5978_vm12, %v2661_v18, %v2653_v47  ;;  %vm5991_vm1 = vmmov %vm5989_vm2 }
 0x660   : > { %v2676_v38 = vmul.f32 %v2671_v19, %v4157_v45  ;;  %v2677_v46 = vmul.f32 %v2667_v23, %v3953_v35  ;;  %v2695_v39 = vpop.permute.xlu1 %2694  ;;  %vm5992_vm12 = vmmov %vm5991_vm1 }
 0x661   : > { %v2706_v5 = vsel %vm5979_vm14, %v2695_v39, %v5371_v0  ;;  %vm5994_vm14 = vmmov %vm5980_vm9 }
 0x662   : > { %v2682_v60 = vpack.c.bf16 %v2676_v38, %v2674_v57  ;;  %v2697_v33 = vpop.permute.xlu0 %2696  ;;  %v2683_v11 = vpack.c.bf16 %v2677_v46, %v2675_v8  ;;  %v5409_v2 = vmul.f32 %v2706_v5, %v4195_v17  ;;  %v5993_v46 = vld [vmem:[#allocation2_spill] sm:$0xff] }
 0x663   : > { %v2707_v14 = vsel %vm5980_vm9, %v2697_v33, %v5373_v34  ;;  %vm5995_vm9 = vcmp.lt.s32.totalorder %v3826_v40, 17 }
 0x664   : > { %v5412_v4 = vmul.f32 %v2707_v14, %v4195_v17  ;;  %2986 = vmatprep.subr.bf16.mxu0 %v2683_v11  ;;  %v2731_v43 = vpop.permute.xlu1 %2730 }
 0x665   : > { %v2738_v7 = vsel %vm5981_vm5, %v2723_v3, %v2731_v43  ;;  %v2742_v56 = vsel %vm5982_vm13, %v2731_v43, %v2723_v3  ;;  %2987 = vmatpush1.bf16.msra.mxu0 %v2682_v60  ;;  %vm5996_vm5 = vmmov %vm5995_vm9 }
 0x666   : > { %v2718_v55 = vpack.c.bf16 %v5412_v4, %v5409_v2  ;;  %v2733_v58 = vpop.permute.xlu0 %2732  ;;  %v5425_v48 = vmul.f32 %v2742_v56, %v4227_v59  ;;  %v5428_v25 = vmul.f32 %v2738_v7, %v4063_v52  ;;  %vm5997_vm13 = vmmov %vm5994_vm14 }
 0x667   : > { %v2739_v37 = vsel %vm5983_vm4, %v2725_v32, %v2733_v58  ;;  %v2743_v15 = vsel %vm5984_vm15, %v2733_v58, %v2725_v32  ;;  %vm5998_vm4 = vmmov %vm5996_vm5 }
 0x668   : > { %v5431_v26 = vmul.f32 %v2743_v15, %v4227_v59  ;;  %v5434_v20 = vmul.f32 %v2739_v37, %v4063_v52  ;;  %v2767_v10 = vpop.permute.xlu1 %2766  ;;  %vm5999_vm15 = vmmov %vm5998_vm4 }
 0x669   : > { %v2774_v1 = vsel %vm5985_vm0, %v2759_v50, %v2767_v10  ;;  %v2778_v53 = vsel %vm5986_vm8, %v2767_v10, %v2759_v50  ;;  %vm6000_vm0 = vcmp.lt.s32.totalorder %v3826_v40, 113 }
 0x66a   : > { %v2754_v36 = vpack.c.bf16 %v5431_v26, %v5425_v48  ;;  %v2769_v51 = vpop.permute.xlu0 %2768  ;;  %v2755_v47 = vpack.c.bf16 %v5434_v20, %v5428_v25  ;;  %v5449_v12 = vmul.f32 %v2778_v53, %v4320_v27  ;;  %v5452_v44 = vmul.f32 %v2774_v1, %v3953_v35  ;;  %vm6001_vm8 = vmmov %vm6000_vm0 }
 0x66b   : > { %v2775_v3 = vsel %vm5987_vm3, %v2761_v62, %v2769_v51  ;;  %v2779_v32 = vsel %vm5988_vm10, %v2769_v51, %v2761_v62  ;;  %vm6002_vm3 = vmmov %vm6000_vm0 }
 0x66c   : > { %v5455_v50 = vmul.f32 %v2779_v32, %v4320_v27  ;;  %v5458_v49 = vmul.f32 %v2775_v3, %v3953_v35  ;;  %v2815_v29 = vpop.permute.xlu1 %2814  ;;  %v2703_v3 = vsel %vm5994_vm14, %v5373_v34, %v2697_v33  ;;  %vm6003_vm10 = vmmov %vm6000_vm0  ;;  %vm6009_vm14 = vcmp.lt.s32.totalorder %v3826_v40, 15 }
 0x66d   : > { %v2822_v18 = vsel %vm5989_vm2, %v2807_v54, %v2815_v29  ;;  %v2826_v23 = vsel %vm5990_vm6, %v2815_v29, %v2807_v54  ;;  %vm6005_vm2 = vmmov %vm5997_vm13 }
 0x66e   : > { %v2817_v19 = vpop.permute.xlu0 %2816  ;;  %v2791_v57 = vpack.c.bf16 %v5458_v49, %v5452_v44  ;;  %v5473_v5 = vmul.f32 %v2822_v18, %v5993_v46  ;;  %v5476_v60 = vmul.f32 %v2826_v23, %v4063_v52  ;;  %v2702_v23 = vsel %vm5997_vm13, %v5371_v0, %v2695_v39  ;;  %vm6006_vm6 = vmmov %vm6005_vm2 }
 0x66f   : > { %v2823_v8 = vsel %vm5991_vm1, %v2809_v31, %v2817_v19  ;;  %v2827_v38 = vsel %vm5992_vm12, %v2817_v19, %v2809_v31  ;;  %v2711_v0 = vmul.f32 %v2702_v23, %v4003_v6  ;;  %vm6007_vm1 = vmmov %vm6005_vm2 }
 0x670   : > { %v5479_v54 = vmul.f32 %v2823_v8, %v5993_v46  ;;  %v5482_v11 = vmul.f32 %v2827_v38, %v4063_v52  ;;  %v2655_v14 = vpop.permute.xlu1 %2654  ;;  %v2713_v8 = vmul.f32 %v2703_v3, %v4003_v6  ;;  %vm6008_vm12 = vmmov %vm6007_vm1 }
 0x672   : > { %v2657_v7 = vpop.permute.xlu0 %2656  ;;  %v2719_v23 = vpack.c.bf16 %v2713_v8, %v2711_v0 }
 0x674   : > { %v2691_v56 = vpop.permute.xlu1 %2690 }
 0x676   : > { %v2693_v58 = vpop.permute.xlu0 %2692 }
 0x678   : > { %v2727_v37 = vpop.permute.xlu1 %2726 }
 0x67a   : > { %v2729_v15 = vpop.permute.xlu0 %2728 }
 0x67c   : > { %v5488_v10 = vpop.permute.xlu1 %2762 }
 0x67e   : > { %v5490_v1 = vpop.permute.xlu0 %2764 }
 0x680   : > { %v5492_v53 = vpop.permute.xlu1 %2810 }
 0x682   : > { %v5494_v51 = vpop.permute.xlu0 %2812 }
 0x684   : > { %v2663_v32 = vpop.permute.xlu1 %2662 }
 0x685   : > { %v2668_v29 = vsel %vm5995_vm9, %v2655_v14, %v2663_v32  ;;  %v2672_v18 = vsel %vm5996_vm5, %v2663_v32, %v2655_v14  ;;  %vm6010_vm9 = vmmov %vm6009_vm14 }
 0x686   : > { %v2665_v19 = vpop.permute.xlu0 %2664  ;;  %v2678_v33 = vmul.f32 %v2672_v18, %v4157_v45  ;;  %v2679_v43 = vmul.f32 %v2668_v29, %v3953_v35  ;;  %vm6011_vm5 = vmmov %vm6010_vm9 }
 0x687   : > { %v2669_v38 = vsel %vm5998_vm4, %v2657_v7, %v2665_v19  ;;  %v2673_v34 = vsel %vm5999_vm15, %v2665_v19, %v2657_v7  ;;  %vm6012_vm13 = vmmov %vm6011_vm5  ;;  %vm6013_vm4 = vcmp.lt.s32.totalorder %v3826_v40, 1 }
 0x688   : > { %v2680_v31 = vmul.f32 %v2673_v34, %v4157_v45  ;;  %v2681_v14 = vmul.f32 %v2669_v38, %v3953_v35  ;;  %v2851_v32 = vpop.permute.xlu1 %2850  ;;  %v6004_v34 = vld [vmem:[#allocation3_spill] sm:$0xff]  ;;  %vm6014_vm15 = vmmov %vm6013_vm4 }
 0x689   : > { %v2858_v39 = vsel %vm6000_vm0, %v5386_v41, %v2851_v32  ;;  %v2862_v3 = vsel %vm6001_vm8, %v2851_v32, %v5386_v41  ;;  %vm6015_vm0 = vmmov %vm6013_vm4 }
 0x68a   : > { %v2684_v7 = vpack.c.bf16 %v2680_v31, %v2678_v33  ;;  %v2853_v19 = vpop.permute.xlu0 %2852  ;;  %v2685_v18 = vpack.c.bf16 %v2681_v14, %v2679_v43  ;;  %v5529_v38 = vmul.f32 %v2858_v39, %v4320_v27  ;;  %v5532_v62 = vmul.f32 %v2862_v3, %v6004_v34  ;;  %vm6016_vm8 = vmmov %vm6015_vm0 }
 0x68b   : > { %v2859_v45 = vsel %vm6002_vm3, %v5388_v9, %v2853_v19  ;;  %v2863_v29 = vsel %vm6003_vm10, %v2853_v19, %v5388_v9  ;;  %vm6018_vm3 = vcmp.lt.s32.totalorder %v3826_v40, 127 }
 0x68c   : > { %v5535_v41 = vmul.f32 %v2859_v45, %v4320_v27  ;;  %v5538_v43 = vmul.f32 %v2863_v29, %v6004_v34  ;;  %2988 = vmatprep.subr.bf16.mxu0 %v2685_v18  ;;  %v2699_v31 = vpop.permute.xlu1 %2698  ;;  %vm6019_vm10 = vmmov %vm6018_vm3 }
 0x68d   : > { %v2704_v33 = vsel %vm6005_vm2, %v2691_v56, %v2699_v31  ;;  %v2708_v9 = vsel %vm6006_vm6, %v2699_v31, %v2691_v56  ;;  %2989 = vmatpush1.bf16.msra.mxu0 %v2684_v7  ;;  %vm6021_vm2 = vmmov %vm6018_vm3 }
 0x68e   : > { %v2874_v8 = vpack.c.bf16 %v5535_v41, %v5529_v38  ;;  %v2701_v14 = vpop.permute.xlu0 %2700  ;;  %2990 = vmatprep.subr.bf16.mxu0 %v2719_v23  ;;  %v2875_v32 = vpack.c.bf16 %v5538_v43, %v5532_v62  ;;  %v2714_v3 = vmul.f32 %v2708_v9, %v4195_v17  ;;  %v2715_v19 = vmul.f32 %v2704_v33, %v4003_v6  ;;  %vm6022_vm6 = vmmov %vm6021_vm2  ;;  %v6032_v43 = vld [vmem:[#allocation4_spill] sm:$0xff] }
 0x68f   : > { %v2705_v0 = vsel %vm6007_vm1, %v2693_v58, %v2701_v14  ;;  %v2709_v39 = vsel %vm6008_vm12, %v2701_v14, %v2693_v58  ;;  %vm6025_vm1 = vcmp.lt.s32.totalorder %v3826_v40, 113 }
 0x690   : > { %v2716_v56 = vmul.f32 %v2709_v39, %v4195_v17  ;;  %v2717_v7 = vmul.f32 %v2705_v0, %v4003_v6  ;;  %v2735_v18 = vpop.permute.xlu1 %2734  ;;  %vm6026_vm12 = vmmov %vm6025_vm1 }
 0x691   : > { %2991 = vmatpush1.bf16.msra.mxu0 %v2718_v55  ;;  %v2740_v58 = vsel %vm6009_vm14, %v2727_v37, %v2735_v18  ;;  %v2744_v33 = vsel %vm6010_vm9, %v2735_v18, %v2727_v37  ;;  %vm6027_vm14 = vcmp.lt.s32.totalorder %v3826_v40, 112 }
 0x692   : > { %v2720_v45 = vpack.c.bf16 %v2716_v56, %v2714_v3  ;;  %v5559_v29 = vpop.permute.xlu0 %2848  ;;  %v2721_v23 = vpack.c.bf16 %v2717_v7, %v2715_v19  ;;  %v2750_v55 = vmul.f32 %v2744_v33, %v4227_v59  ;;  %v2751_v9 = vmul.f32 %v2740_v58, %v4063_v52  ;;  %vm6028_vm9 = vmmov %vm6027_vm14 }
 0x693   : > { %v2799_v58 = vmul.f32 %v5239_v21, %v4003_v6 }
 0x694   : > { %2992 = vmatprep.subr.bf16.mxu0 %v2721_v23  ;;  %v2771_v31 = vpop.permute.xlu1 %2770 }
 0x695   : > { %2993 = vmatpush1.bf16.msra.mxu0 %v2720_v45  ;;  %v2796_v45 = vmul.f32 %v5219_v13, %v4324_v28 }
 0x696   : > { %v2737_v17 = vpop.permute.xlu0 %2736  ;;  %2994 = vmatprep.subr.bf16.mxu0 %v2755_v47 }
 0x697   : > { %v2741_v2 = vsel %vm6011_vm5, %v2729_v15, %v2737_v17  ;;  %v2745_v4 = vsel %vm6012_vm13, %v2737_v17, %v2729_v15  ;;  %v2776_v15 = vsel %vm6013_vm4, %v5488_v10, %v2771_v31  ;;  %vm6029_vm5 = vmmov %vm6025_vm1 }
 0x698   : > { %v2752_v14 = vmul.f32 %v2745_v4, %v4227_v59  ;;  %v2753_v37 = vmul.f32 %v2741_v2, %v4063_v52  ;;  %v2819_v0 = vpop.permute.xlu1 %2818  ;;  %v2780_v59 = vsel %vm6014_vm15, %v2771_v31, %v5488_v10  ;;  %v2787_v10 = vmul.f32 %v2776_v15, %v3953_v35  ;;  %vm6030_vm13 = vmmov %vm6025_vm1 }
 0x699   : > { %2995 = vmatpush1.bf16.msra.mxu0 %v2754_v36  ;;  %v2797_v36 = vmul.f32 %v5225_v22, %v4003_v6  ;;  %v2786_v19 = vmul.f32 %v2780_v59, %v4320_v27  ;;  %v2795_v22 = vmul.f32 %v5215_v42, %v4003_v6  ;;  %v2800_v42 = vmul.f32 %v5243_v63, %v4324_v28  ;;  %vm6031_vm4 = vmmov %vm6028_vm9 }
 0x69a   : > { %v2756_v25 = vpack.c.bf16 %v2752_v14, %v2750_v55  ;;  %v5579_v20 = vpop.permute.xlu0 %2880  ;;  %v2757_v47 = vpack.c.bf16 %v2753_v37, %v2751_v9  ;;  %v2798_v2 = vmul.f32 %v5235_v24, %v4324_v28  ;;  %v6020_v9 = vpack.c.bf16 %v5482_v11, %v5476_v60  ;;  %v6023_v11 = vld [vmem:[#allocation5_spill] sm:$0xff]  ;;  %vm6033_vm15 = vmmov %vm6031_vm4 }
 0x69b   : > { %v2803_v31 = vpack.c.bf16 %v2797_v36, %v2795_v22 }
 0x69c   : > { %2996 = vmatprep.subr.bf16.mxu0 %v2757_v47  ;;  %v5581_v39 = vpop.permute.xlu1 %2846  ;;  %v2804_v4 = vpack.c.bf16 %v2800_v42, %v2798_v2 }
 0x69d   : > { %2997 = vmatpush1.bf16.msra.mxu0 %v2756_v25 }
 0x69e   : > { %v2773_v3 = vpop.permute.xlu0 %2772  ;;  %2998 = vmatprep.subr.bf16.mxu0 %v2791_v57  ;;  %v6017_v57 = vpack.c.bf16 %v5455_v50, %v5449_v12  ;;  %v2794_v12 = vmul.f32 %v5213_v61, %v4324_v28  ;;  %v2824_v61 = vsel %vm6018_vm3, %v5492_v53, %v2819_v0 }
 0x69f   : > { %v2777_v48 = vsel %vm6015_vm0, %v5490_v1, %v2773_v3  ;;  %v2781_v26 = vsel %vm6016_vm8, %v2773_v3, %v5490_v1  ;;  %v2834_v37 = vmul.f32 %v2824_v61, %v5993_v46  ;;  %vm6034_vm0 = vmmov %vm6031_vm4 }
 0x6a0   : > { %v2788_v56 = vmul.f32 %v2781_v26, %v4320_v27  ;;  %v2789_v44 = vmul.f32 %v2777_v48, %v3953_v35  ;;  %v2855_v49 = vpop.permute.xlu1 %2854  ;;  %v2801_v35 = vmul.f32 %v5249_v30, %v4003_v6  ;;  %v2802_v33 = vpack.c.bf16 %v2796_v45, %v2794_v12  ;;  %vm6035_vm8 = vmmov %vm6034_vm0 }
 0x6a1   : > { %2999 = vmatpush1.bf16.msra.mxu0 %v6017_v57  ;;  %v2828_v6 = vsel %vm6019_vm10, %v2819_v0, %v5492_v53  ;;  %vm6036_vm3 = vmmov %vm6034_vm0 }
 0x6a2   : > { %v2792_v7 = vpack.c.bf16 %v2788_v56, %v2786_v19  ;;  %v5607_v18 = vpop.permute.xlu0 %2888  ;;  %v2793_v1 = vpack.c.bf16 %v2789_v44, %v2787_v10  ;;  %v2805_v17 = vpack.c.bf16 %v2801_v35, %v2799_v58  ;;  %v2835_v0 = vmul.f32 %v2828_v6, %v4063_v52  ;;  %vm6037_vm10 = vmmov %vm6034_vm0 }
 0x6a3   : > { %v2860_v56 = vsel %vm6025_vm1, %v5581_v39, %v2855_v49  ;;  %v2864_v44 = vsel %vm6026_vm12, %v2855_v49, %v5581_v39  ;;  %v2899_v39 = vsel %vm6028_vm9, %v5607_v18, %v5579_v20 }
 0x6a4   : > { %3000 = vmatprep.subr.bf16.mxu0 %v2793_v1  ;;  %v2879_v23 = vpop.permute.xlu1 %2878  ;;  %v2870_v1 = vmul.f32 %v2860_v56, %v4320_v27  ;;  %v2871_v45 = vmul.f32 %v2864_v44, %v6004_v34  ;;  %v2905_v58 = vmul.f32 %v2899_v39, %v6032_v43 }
 0x6a5   : > { %3001 = vmatpush1.bf16.msra.mxu0 %v2792_v7 }
 0x6a6   : > { %v2917_v50 = vpop.permute.xlu0 %2916  ;;  %3002 = vmatprep.subr.bf16.mxu0 %v2803_v31 }
 0x6a8   : > { %v2887_v13 = vpop.permute.xlu1 %2886 }
 0x6a9   : > { %3003 = vmatpush1.bf16.msra.mxu0 %v2802_v33  ;;  %v2894_v62 = vsel %vm6031_vm4, %v2879_v23, %v2887_v13 }
 0x6aa   : > { %v2925_v30 = vpop.permute.xlu0 %2924  ;;  %3004 = vmatprep.subr.bf16.mxu0 %v2805_v17 }
 0x6ab   : > { %v2931_v21 = vsel %vm1435_vm11, %v2917_v50, %v2925_v30  ;;  %v2935_v63 = vsel %vm1435_vm11, %v2925_v30, %v2917_v50 }
 0x6ac   : > { %v2915_v55 = vpop.permute.xlu1 %2914  ;;  %v2940_v60 = vmul.f32 %v2931_v21, %v5993_v46  ;;  %v2941_v59 = vmul.f32 %v2935_v63, %v6023_v11 }
 0x6ad   : > { %3005 = vmatpush1.bf16.msra.mxu0 %v2804_v4 }
 0x6ae   : > { %v2821_v24 = vpop.permute.xlu0 %2820  ;;  %3006 = vmatprep.subr.bf16.mxu0 %v6020_v9 }
 0x6af   : > { %v2825_v14 = vsel %vm6021_vm2, %v5494_v51, %v2821_v24  ;;  %v2829_v53 = vsel %vm6022_vm6, %v2821_v24, %v5494_v51  ;;  %v6024_v51 = vpack.c.bf16 %v5479_v54, %v5473_v5  ;;  %v2898_v54 = vsel %vm6027_vm14, %v2887_v13, %v2879_v23 }
 0x6b0   : > { %v2836_v25 = vmul.f32 %v2825_v14, %v5993_v46  ;;  %v2837_v47 = vmul.f32 %v2829_v53, %v4063_v52  ;;  %v2923_v15 = vpop.permute.xlu1 %2922  ;;  %v2902_v13 = vmul.f32 %v2894_v62, %v4324_v28 }
 0x6b1   : > { %v2930_v3 = vsel %vm1435_vm11, %v2915_v55, %v2923_v15  ;;  %v2934_v48 = vsel %vm1435_vm11, %v2923_v15, %v2915_v55  ;;  %3007 = vmatpush1.bf16.msra.mxu0 %v6024_v51 }
 0x6b2   : > { %v2840_v26 = vpack.c.bf16 %v2836_v25, %v2834_v37  ;;  %v2938_v36 = vmul.f32 %v2930_v3, %v5993_v46  ;;  %v2939_v52 = vmul.f32 %v2934_v48, %v6023_v11  ;;  %v2885_v19 = vpop.permute.xlu0 %2884  ;;  %v2841_v10 = vpack.c.bf16 %v2837_v47, %v2835_v0 }
 0x6b4   : > { %v2946_v57 = vpack.c.bf16 %v2940_v60, %v2938_v36  ;;  %v2883_v7 = vpop.permute.xlu1 %2882  ;;  %3008 = vmatprep.subr.bf16.mxu0 %v2841_v10  ;;  %v2947_v5 = vpack.c.bf16 %v2941_v59, %v2939_v52  ;;  %v2980_v59 = vcombine.high %v5367_v16, %v5367_v16 }
 0x6b5   : > { %3009 = vmatpush1.bf16.msra.mxu0 %v2840_v26 }
 0x6b6   : > { %v2857_v22 = vpop.permute.xlu0 %2856  ;;  %3010 = vmatprep.subr.bf16.mxu0 %v2875_v32  ;;  %3027 = vmatprep.subr.bf16.mxu1 %v2947_v5  ;;  %v2903_v32 = vmul.f32 %v2898_v54, %v6032_v43 }
 0x6b7   : > { %v2861_v49 = vsel %vm6029_vm5, %v5559_v29, %v2857_v22  ;;  %v2865_v31 = vsel %vm6030_vm13, %v2857_v22, %v5559_v29  ;;  %3028 = vmatpush1.bf16.msra.mxu1 %v2946_v57  ;;  %v2895_v29 = vsel %vm6033_vm15, %v5579_v20, %v5607_v18 }
 0x6b8   : > { %v2872_v35 = vmul.f32 %v2861_v49, %v4320_v27  ;;  %v2873_v12 = vmul.f32 %v2865_v31, %v6004_v34  ;;  %v2891_v50 = vpop.permute.xlu1 %2890  ;;  %v2911_v34 = vpack.c.bf16 %v2905_v58, %v2903_v32  ;;  %v2904_v17 = vmul.f32 %v2895_v29, %v4324_v28 }
 0x6b9   : > { %3011 = vmatpush1.bf16.msra.mxu0 %v2874_v8  ;;  %v2896_v38 = vsel %vm6034_vm0, %v2883_v7, %v2891_v50  ;;  %v2900_v41 = vsel %vm6035_vm8, %v2891_v50, %v2883_v7  ;;  %v3441_v7 = vld [vmem:[%s3608_s22 + $0x8] sm:$0xff] }
 0x6ba   : > { %v2876_v33 = vpack.c.bf16 %v2872_v35, %v2870_v1  ;;  %v2921_v23 = vpop.permute.xlu0 %2920  ;;  %v2877_v42 = vpack.c.bf16 %v2873_v12, %v2871_v45  ;;  %v2910_v20 = vpack.c.bf16 %v2904_v17, %v2902_v13  ;;  %v2906_v30 = vmul.f32 %v2896_v38, %v4324_v28 }
 0x6bb   : > { %v2907_v4 = vmul.f32 %v2900_v41, %v6032_v43 }
 0x6bc   : > { %v2919_v27 = vpop.permute.xlu1 %2918  ;;  %3012 = vmatprep.subr.bf16.mxu0 %v2877_v42 }
 0x6bd   : > { %3013 = vmatpush1.bf16.msra.mxu0 %v2876_v33 }
 0x6be   : > { %v2893_v8 = vpop.permute.xlu0 %2892  ;;  %3014 = vmatprep.subr.bf16.mxu0 %v2911_v34 }
 0x6bf   : > { %v2897_v18 = vsel %vm6036_vm3, %v2885_v19, %v2893_v8  ;;  %v2901_v2 = vsel %vm6037_vm10, %v2893_v8, %v2885_v19 }
 0x6c0   : > { %v2908_v55 = vmul.f32 %v2897_v18, %v4324_v28  ;;  %v2909_v61 = vmul.f32 %v2901_v2, %v6032_v43  ;;  %v2927_v6 = vpop.permute.xlu1 %2926 }
 0x6c1   : > { %v2932_v21 = vsel %vm1435_vm11, %v2919_v27, %v2927_v6  ;;  %v2936_v63 = vsel %vm1435_vm11, %v2927_v6, %v2919_v27  ;;  %3015 = vmatpush1.bf16.msra.mxu0 %v2910_v20 }
 0x6c2   : > { %v2912_v24 = vpack.c.bf16 %v2908_v55, %v2906_v30  ;;  %v2929_v9 = vpop.permute.xlu0 %2928  ;;  %v2913_v14 = vpack.c.bf16 %v2909_v61, %v2907_v4  ;;  %v2942_v28 = vmul.f32 %v2932_v21, %v5993_v46  ;;  %v2943_v0 = vmul.f32 %v2936_v63, %v6023_v11 }
 0x6c3   : > { %v2933_v53 = vsel %vm1435_vm11, %v2921_v23, %v2929_v9  ;;  %v2937_v37 = vsel %vm1435_vm11, %v2929_v9, %v2921_v23 }
 0x6c4   : > { %v2944_v25 = vmul.f32 %v2933_v53, %v5993_v46  ;;  %v2945_v47 = vmul.f32 %v2937_v37, %v6023_v11  ;;  %3016 = vmatprep.subr.bf16.mxu0 %v2913_v14 }
 0x6c5   : > { %3017 = vmatpush1.bf16.msra.mxu0 %v2912_v24 }
 0x6c6   : > { %v2948_v15 = vpack.c.bf16 %v2944_v25, %v2942_v28  ;;  %v2949_v60 = vpack.c.bf16 %v2945_v47, %v2943_v0 }
 0x6c8   : > { %3019 = vmatmul.mubr.bf16.vlgmr.msra.gmra.mrb[8].mxu0 %v5367_v16  ;;  %3029 = vmatprep.subr.bf16.mxu1 %v2949_v60  ;;  %v3440_v16 = vld [vmem:[%s3608_s22] sm:$0xff] }
 0x6c9   : > { %3030 = vmatpush1.bf16.msra.mxu1 %v2948_v15 }
 0x6cc   : > { %3337 = vmatmul.mubr.msk.bf16.vlgmr.msra.gmra.mrb[24].mxu1 %vm1911_vm7, %v2980_v59 }
 0x6d1   : > { %v2955_v3 = vpop.permute.xlu1 %2954 }
 0x79b   : > { %v3020_v40 = vpop.f32.mrb[8].mxu0 }
 0x79c   : > { %v3022_v46 = vpop.f32.mrb[9].mxu0  ;;  %v3021_v48 = vadd.f32 %v3020_v40, %v2955_v3 }
 0x79d   : > { %v3024_v11 = vpop.f32.mrb[10].mxu0  ;;  %v3023_v26 = vadd.f32 %v3022_v46, %v2955_v3 }
 0x79e   : > { %v3025_v51 = vpop.f32.mrb[11].mxu0 }
 0x79f   : > { %v3061_v36 = vpop.f32.mrb[24].mxu1 }
 0x7a0   : > { %v3062_v52 = vadd.f32 %v3061_v36, %v3021_v48  ;;  %v3063_v19 = vpop.f32.mrb[25].mxu1 }
 0x7a1   : > { %v3064_v10 = vadd.f32 %v3063_v19, %v3023_v26  ;;  %v3065_v56 = vpop.f32.mrb[26].mxu1 }
 0x7a2   : > { %v3068_v44 = vadd.f32 %v3440_v16, %v3062_v52  ;;  %v3066_v57 = vpop.f32.mrb[27].mxu1 }
 0x7a3   : > { %v3069_v5 = vadd.f32 %v3441_v7, %v3064_v10 }
 0x7a5   : > { %v3072_v54 = vcombine.low %v3068_v44, %v3069_v5 }
 0x7a7   : > { %3338 = vst.sshfl [vmem:[%s630_s23] sm:$0x33 pattern:$0x76325410] %v3072_v54 }
 0x7a8 PF: > { %s29_s27 = sadd.s32 1, %s3448_s27  }
 0x7a9   : > { %p26_p4 = scmp.ge.s32.totalorder %s29_s27, 4  }
 0x7ab   :  { %28 = sbr.rel (!%p26_p4) target bundleno = 4 (0x4), region = 144 }

</bundles_post_ra>
